<compile_context>
chip_gen: v7x
topology: tpu7x:2x2x1
jax: 0.10.0
libtpu: 0.0.40
codegen_flags: <defaults>
</compile_context>

<pallas_src>
import jax
import jax.numpy as jnp
from jax.experimental import pallas as pl
from jax.experimental.pallas import tpu as pltpu


# ------------------------- Fused conv+relu+pool+fc+tanh ------------------------
def fused_cnn_kernel(p_ref, cw_ref, cb_ref, fw_ref, fb_ref, o_ref, pooled_ref):
    # p_ref:      (4*n*B, 9*Cin) bf16  im2col rows ordered (q, r, b); n = Ho*Wo
    # cw_ref:     (9*Cin, Cout)  bf16  flattened HWIO conv weight
    # cb_ref:     (1, Cout)      f32   conv bias
    # fw_ref:     (n, Cout, E)   bf16  FC weight, rows = spatial position r
    # fb_ref:     (1, E)         f32   FC bias
    # o_ref:      (B, E)         f32   output embedding
    # pooled_ref: (n*B, Cout)    bf16  VMEM scratch for the pooled activation
    B, E = o_ref.shape
    n, Cout, _ = fw_ref.shape
    nb = n * B

    # Conv: one MXU matmul over every (pool-member, spatial, batch) patch row.
    acc = jnp.dot(p_ref[...], cw_ref[...], preferred_element_type=jnp.float32)
    acc = jnp.maximum(acc + cb_ref[...], 0.0)            # bias + ReLU, (4*nb, Cout)

    # 2x2 / stride-2 max-pool: the four window members are the four contiguous
    # nb-row blocks (vreg-aligned static slices) -> three VPU maximums.
    pooled = jnp.maximum(
        jnp.maximum(acc[0 * nb:1 * nb], acc[1 * nb:2 * nb]),
        jnp.maximum(acc[2 * nb:3 * nb], acc[3 * nb:4 * nb]))   # (nb, Cout), rows (r, b)
    pooled_ref[...] = pooled.astype(jnp.bfloat16)

    # FC accumulated per spatial row r: y[b,:] += pooled[r,b,:] @ fc_w[r]
    # (avoids the unsupported sublane->lane flatten; all operands stay in VMEM).
    y = jnp.zeros((B, E), jnp.float32)
    for r in range(n):                                    # static, unrolled
        y = y + jnp.dot(pooled_ref[r * B:(r + 1) * B, :], fw_ref[r],
                        preferred_element_type=jnp.float32)
    o_ref[...] = jnp.tanh(y + fb_ref[...])


def fused_forward(patches, conv_w_flat, conv_b, fc_w_packed, fc_b, *, B):
    R, K9 = patches.shape
    Cout = conv_w_flat.shape[1]
    n, _, E = fc_w_packed.shape
    return pl.pallas_call(
        fused_cnn_kernel,
        out_shape=jax.ShapeDtypeStruct((B, E), jnp.float32),
        grid_spec=pltpu.PrefetchScalarGridSpec(
            num_scalar_prefetch=0,
            grid=(1,),
            in_specs=[
                pl.BlockSpec((R, K9), lambda i: (0, 0)),
                pl.BlockSpec((K9, Cout), lambda i: (0, 0)),
                pl.BlockSpec((1, Cout), lambda i: (0, 0)),
                pl.BlockSpec((n, Cout, E), lambda i: (0, 0, 0)),
                pl.BlockSpec((1, E), lambda i: (0, 0)),
            ],
            out_specs=pl.BlockSpec((B, E), lambda i: (0, 0)),
            scratch_shapes=[pltpu.VMEM((n * B, Cout), jnp.bfloat16)],
        ),
        compiler_params=pltpu.CompilerParams(
            dimension_semantics=("arbitrary",)),
    )(patches, conv_w_flat, conv_b, fc_w_packed, fc_b)


# ------------------------------ Wrapper / packing -----------------------------
def im2col_3x3_pool_order(x_nchw):
    """3x3 / pad=1 im2col with rows ordered (q, r, b):
    q = 2x2 pool-window member, r = pooled spatial position, b = batch.
    The four members of each pool window therefore form four contiguous
    row blocks, and the per-spatial-row (B, Cout) FC slices are contiguous."""
    B, Cin, H, W = x_nchw.shape
    Ho, Wo = H // 2, W // 2
    x = jnp.transpose(x_nchw, (0, 2, 3, 1))                       # NHWC
    xp = jnp.pad(x, ((0, 0), (1, 1), (1, 1), (0, 0)))
    taps = [xp[:, dy:dy + H, dx:dx + W, :]
            for dy in range(3) for dx in range(3)]
    p = jnp.concatenate(taps, axis=-1)                            # (B, H, W, 9*Cin)
    p = p.reshape(B, Ho, 2, Wo, 2, 9 * Cin)                       # (b, ho, qy, wo, qx, k)
    p = jnp.transpose(p, (2, 4, 1, 3, 0, 5))                      # (qy, qx, ho, wo, b, k)
    return p.reshape(4 * Ho * Wo * B, 9 * Cin).astype(jnp.bfloat16)


def pack_params(conv_w_oihw, conv_b, fc_w, fc_b, *, Ho, Wo):
    """Convert torch-layout weights (Conv2d OIHW, Linear (E, F) with F in
    (c, h, w) order) into kernel layouts: conv weight flattened to (9*Cin,
    Cout) bf16; FC weight regrouped per spatial row as (Ho*Wo, Cout, E) bf16
    (folds the NCHW flatten permutation into the weight)."""
    Cout, Cin, KH, KW = conv_w_oihw.shape
    E = fc_w.shape[0]
    conv_w_flat = jnp.transpose(conv_w_oihw, (2, 3, 1, 0)).reshape(
        KH * KW * Cin, Cout).astype(jnp.bfloat16)                  # (9*Cin, Cout)
    w4 = fc_w.reshape(E, Cout, Ho, Wo)
    fc_w_packed = jnp.transpose(w4, (2, 3, 1, 0)).reshape(
        Ho * Wo, Cout, E).astype(jnp.bfloat16)                     # (r, c, e)
    return {"conv_w_flat": conv_w_flat,
            "conv_b": conv_b.reshape(1, Cout).astype(jnp.float32),
            "fc_w_packed": fc_w_packed,
            "fc_b": fc_b.reshape(1, E).astype(jnp.float32)}


def basic_cnn_forward(x_nchw, params):
    """Equivalent of BasicCNN.forward on NCHW input."""
    B, _, H, W = x_nchw.shape
    if H % 2 or W % 2:
        raise ValueError("2x2/stride-2 max-pool requires even H and W")
    patches = im2col_3x3_pool_order(x_nchw)                        # (4*Ho*Wo*B, 9*Cin)
    return fused_forward(patches, params["conv_w_flat"], params["conv_b"],
                         params["fc_w_packed"], params["fc_b"], B=B)


# ------------------------------ Pure-JAX reference ----------------------------
def reference_forward(x_nchw, conv_w_oihw, conv_b, fc_w, fc_b):
    """Full-f32 reference matching the PyTorch module semantics."""
    y = jax.lax.conv_general_dilated(
        x_nchw, conv_w_oihw, window_strides=(1, 1), padding=((1, 1), (1, 1)),
        dimension_numbers=("NCHW", "OIHW", "NCHW"))
    y = jnp.maximum(y + conv_b[None, :, None, None], 0.0)
    B, C, H, W = y.shape
    y = y.reshape(B, C, H // 2, 2, W // 2, 2).max(axis=(3, 5))
    flat = y.reshape(B, -1)
    return jnp.tanh(flat @ fc_w.T + fc_b)


# ----------------------------------- Main --------------------------------------
if __name__ == "__main__":
    batch, in_channels, input_sz, embedding_sz = 2, 4, 16, 128
    conv_out = 64
    Ho = Wo = input_sz // 2
    flat_dim = conv_out * Ho * Wo
    # Matches the hard-coded nn.Linear(input_sz*input_sz*16, ...) in the module.
    assert flat_dim == input_sz * input_sz * 16

    key = jax.random.PRNGKey(0)
    kx, k1, k2, k3, k4 = jax.random.split(key, 5)
    x = jax.random.normal(kx, (batch, in_channels, input_sz, input_sz),
                          jnp.float32)
    # Weights in the original torch layouts, packed once.
    conv_w = jax.random.normal(k1, (conv_out, in_channels, 3, 3),
                               jnp.float32) * 0.05
    conv_b = jax.random.normal(k2, (conv_out,), jnp.float32) * 0.05
    fc_w = jax.random.normal(k3, (embedding_sz, flat_dim), jnp.float32) * 0.02
    fc_b = jax.random.normal(k4, (embedding_sz,), jnp.float32) * 0.02
    params = pack_params(conv_w, conv_b, fc_w, fc_b, Ho=Ho, Wo=Wo)

    fwd = jax.jit(basic_cnn_forward)
    out = jax.block_until_ready(fwd(x, params))

    assert out.shape == (batch, embedding_sz), out.shape
    assert bool(jnp.all(jnp.isfinite(out)))
    ref = reference_forward(x, conv_w, conv_b, fc_w, fc_b)
    assert bool(jnp.allclose(out, ref, atol=2e-2)), \
        float(jnp.max(jnp.abs(out - ref)))
    print("KERNEL_OK")
</pallas_src>

<mosaic_0001>
module attributes {stable_mosaic.version = 11 : i64} {
  func.func @fused_cnn_kernel(%arg0: i32, %arg1: memref<512x36xbf16, #tpu.memory_space<vmem>>, %arg2: memref<36x64xbf16, #tpu.memory_space<vmem>>, %arg3: memref<1x64xf32, #tpu.memory_space<vmem>>, %arg4: memref<64x64x128xbf16, #tpu.memory_space<vmem>>, %arg5: memref<1x128xf32, #tpu.memory_space<vmem>>, %arg6: memref<2x128xf32, #tpu.memory_space<vmem>>, %arg7: memref<128x64xbf16, #tpu.memory_space<vmem>>) attributes {dimension_semantics = [#tpu.dimension_semantics<arbitrary>], iteration_bounds = array<i64: 1>, scalar_prefetch = 0 : i64, scratch_operands = 1 : i64, tpu.core_type = #tpu.core_type<tc>, window_params = [{pipeline_mode = #tpu.pipeline_mode<synchronous>, transform_indices = @transform_0, window_bounds = array<i64: 512, 36>}, {pipeline_mode = #tpu.pipeline_mode<synchronous>, transform_indices = @transform_1, window_bounds = array<i64: 36, 64>}, {pipeline_mode = #tpu.pipeline_mode<synchronous>, transform_indices = @transform_2, window_bounds = array<i64: 1, 64>}, {pipeline_mode = #tpu.pipeline_mode<synchronous>, transform_indices = @transform_3, window_bounds = array<i64: 64, 64, 128>}, {pipeline_mode = #tpu.pipeline_mode<synchronous>, transform_indices = @transform_4, window_bounds = array<i64: 1, 128>}, {pipeline_mode = #tpu.pipeline_mode<synchronous>, transform_indices = @transform_5, window_bounds = array<i64: 2, 128>}]} {
    %c0 = arith.constant 0 : index
    %c0_0 = arith.constant 0 : index
    %0 = vector.load %arg1[%c0, %c0_0] : memref<512x36xbf16, #tpu.memory_space<vmem>>, vector<512x36xbf16>
    %c0_1 = arith.constant 0 : index
    %c0_2 = arith.constant 0 : index
    %1 = vector.load %arg2[%c0_1, %c0_2] : memref<36x64xbf16, #tpu.memory_space<vmem>>, vector<36x64xbf16>
    %cst = arith.constant dense<0.000000e+00> : vector<512x64xf32>
    %2 = tpu.matmul %0, %1, %cst {dimension_numbers = #tpu.dot_dimension_numbers<[1], [0], [0], [1], [0, 0, 1, 1], [], []>} : vector<512x36xbf16>, vector<36x64xbf16>, vector<512x64xf32> -> vector<512x64xf32>
    %c0_3 = arith.constant 0 : index
    %c0_4 = arith.constant 0 : index
    %3 = vector.load %arg3[%c0_3, %c0_4] : memref<1x64xf32, #tpu.memory_space<vmem>>, vector<1x64xf32>
    %4 = vector.broadcast %3 : vector<1x64xf32> to vector<512x64xf32>
    %5 = arith.addf %2, %4 : vector<512x64xf32>
    %cst_5 = arith.constant 0.000000e+00 : f32
    %6 = vector.broadcast %cst_5 : f32 to vector<512x64xf32>
    %7 = arith.maximumf %5, %6 : vector<512x64xf32>
    %8 = vector.extract_strided_slice %7 {offsets = [0, 0], sizes = [128, 64], strides = [1, 1]} : vector<512x64xf32> to vector<128x64xf32>
    %9 = vector.extract_strided_slice %7 {offsets = [128, 0], sizes = [128, 64], strides = [1, 1]} : vector<512x64xf32> to vector<128x64xf32>
    %10 = arith.maximumf %8, %9 : vector<128x64xf32>
    %11 = vector.extract_strided_slice %7 {offsets = [256, 0], sizes = [128, 64], strides = [1, 1]} : vector<512x64xf32> to vector<128x64xf32>
    %12 = vector.extract_strided_slice %7 {offsets = [384, 0], sizes = [128, 64], strides = [1, 1]} : vector<512x64xf32> to vector<128x64xf32>
    %13 = arith.maximumf %11, %12 : vector<128x64xf32>
    %14 = arith.maximumf %10, %13 : vector<128x64xf32>
    %15 = arith.truncf %14 : vector<128x64xf32> to vector<128x64xbf16>
    %c0_6 = arith.constant 0 : index
    %c0_7 = arith.constant 0 : index
    %16 = vector.load %arg7[%c0_6, %c0_7] : memref<128x64xbf16, #tpu.memory_space<vmem>>, vector<128x64xbf16>
    tpu.vector_store %arg7[%c0_6, %c0_7], %15 {strides = array<i32>} : memref<128x64xbf16, #tpu.memory_space<vmem>>, vector<128x64xbf16>,
    %cst_8 = arith.constant 0.000000e+00 : f32
    %17 = vector.broadcast %cst_8 : f32 to vector<2x128xf32>
    %c0_9 = arith.constant 0 : index
    %c0_10 = arith.constant 0 : index
    %18 = vector.load %arg7[%c0_9, %c0_10] : memref<128x64xbf16, #tpu.memory_space<vmem>>, vector<2x64xbf16>
    %c0_11 = arith.constant 0 : index
    %c0_12 = arith.constant 0 : index
    %c0_13 = arith.constant 0 : index
    %19 = vector.load %arg4[%c0_11, %c0_12, %c0_13] : memref<64x64x128xbf16, #tpu.memory_space<vmem>>, vector<1x64x128xbf16>
    %20 = vector.shape_cast %19 : vector<1x64x128xbf16> to vector<64x128xbf16>
    %cst_14 = arith.constant dense<0.000000e+00> : vector<2x128xf32>
    %21 = tpu.matmul %18, %20, %cst_14 {dimension_numbers = #tpu.dot_dimension_numbers<[1], [0], [0], [1], [0, 0, 1, 1], [], []>} : vector<2x64xbf16>, vector<64x128xbf16>, vector<2x128xf32> -> vector<2x128xf32>
    %22 = arith.addf %17, %21 : vector<2x128xf32>
    %c2 = arith.constant 2 : index
    %c0_15 = arith.constant 0 : index
    %23 = vector.load %arg7[%c2, %c0_15] : memref<128x64xbf16, #tpu.memory_space<vmem>>, vector<2x64xbf16>
    %c1 = arith.constant 1 : index
    %c0_16 = arith.constant 0 : index
    %c0_17 = arith.constant 0 : index
    %24 = vector.load %arg4[%c1, %c0_16, %c0_17] : memref<64x64x128xbf16, #tpu.memory_space<vmem>>, vector<1x64x128xbf16>
    %25 = vector.shape_cast %24 : vector<1x64x128xbf16> to vector<64x128xbf16>
    %cst_18 = arith.constant dense<0.000000e+00> : vector<2x128xf32>
    %26 = tpu.matmul %23, %25, %cst_18 {dimension_numbers = #tpu.dot_dimension_numbers<[1], [0], [0], [1], [0, 0, 1, 1], [], []>} : vector<2x64xbf16>, vector<64x128xbf16>, vector<2x128xf32> -> vector<2x128xf32>
    %27 = arith.addf %22, %26 : vector<2x128xf32>
    %c4 = arith.constant 4 : index
    %c0_19 = arith.constant 0 : index
    %28 = vector.load %arg7[%c4, %c0_19] : memref<128x64xbf16, #tpu.memory_space<vmem>>, vector<2x64xbf16>
    %c2_20 = arith.constant 2 : index
    %c0_21 = arith.constant 0 : index
    %c0_22 = arith.constant 0 : index
    %29 = vector.load %arg4[%c2_20, %c0_21, %c0_22] : memref<64x64x128xbf16, #tpu.memory_space<vmem>>, vector<1x64x128xbf16>
    %30 = vector.shape_cast %29 : vector<1x64x128xbf16> to vector<64x128xbf16>
    %cst_23 = arith.constant dense<0.000000e+00> : vector<2x128xf32>
    %31 = tpu.matmul %28, %30, %cst_23 {dimension_numbers = #tpu.dot_dimension_numbers<[1], [0], [0], [1], [0, 0, 1, 1], [], []>} : vector<2x64xbf16>, vector<64x128xbf16>, vector<2x128xf32> -> vector<2x128xf32>
    %32 = arith.addf %27, %31 : vector<2x128xf32>
    %c6 = arith.constant 6 : index
    %c0_24 = arith.constant 0 : index
    %33 = vector.load %arg7[%c6, %c0_24] : memref<128x64xbf16, #tpu.memory_space<vmem>>, vector<2x64xbf16>
    %c3 = arith.constant 3 : index
    %c0_25 = arith.constant 0 : index
    %c0_26 = arith.constant 0 : index
    %34 = vector.load %arg4[%c3, %c0_25, %c0_26] : memref<64x64x128xbf16, #tpu.memory_space<vmem>>, vector<1x64x128xbf16>
    %35 = vector.shape_cast %34 : vector<1x64x128xbf16> to vector<64x128xbf16>
    %cst_27 = arith.constant dense<0.000000e+00> : vector<2x128xf32>
    %36 = tpu.matmul %33, %35, %cst_27 {dimension_numbers = #tpu.dot_dimension_numbers<[1], [0], [0], [1], [0, 0, 1, 1], [], []>} : vector<2x64xbf16>, vector<64x128xbf16>, vector<2x128xf32> -> vector<2x128xf32>
    %37 = arith.addf %32, %36 : vector<2x128xf32>
    %c8 = arith.constant 8 : index
    %c0_28 = arith.constant 0 : index
    %38 = vector.load %arg7[%c8, %c0_28] : memref<128x64xbf16, #tpu.memory_space<vmem>>, vector<2x64xbf16>
    %c4_29 = arith.constant 4 : index
    %c0_30 = arith.constant 0 : index
    %c0_31 = arith.constant 0 : index
    %39 = vector.load %arg4[%c4_29, %c0_30, %c0_31] : memref<64x64x128xbf16, #tpu.memory_space<vmem>>, vector<1x64x128xbf16>
    %40 = vector.shape_cast %39 : vector<1x64x128xbf16> to vector<64x128xbf16>
    %cst_32 = arith.constant dense<0.000000e+00> : vector<2x128xf32>
    %41 = tpu.matmul %38, %40, %cst_32 {dimension_numbers = #tpu.dot_dimension_numbers<[1], [0], [0], [1], [0, 0, 1, 1], [], []>} : vector<2x64xbf16>, vector<64x128xbf16>, vector<2x128xf32> -> vector<2x128xf32>
    %42 = arith.addf %37, %41 : vector<2x128xf32>
    %c10 = arith.constant 10 : index
    %c0_33 = arith.constant 0 : index
    %43 = vector.load %arg7[%c10, %c0_33] : memref<128x64xbf16, #tpu.memory_space<vmem>>, vector<2x64xbf16>
    %c5 = arith.constant 5 : index
    %c0_34 = arith.constant 0 : index
    %c0_35 = arith.constant 0 : index
    %44 = vector.load %arg4[%c5, %c0_34, %c0_35] : memref<64x64x128xbf16, #tpu.memory_space<vmem>>, vector<1x64x128xbf16>
    %45 = vector.shape_cast %44 : vector<1x64x128xbf16> to vector<64x128xbf16>
    %cst_36 = arith.constant dense<0.000000e+00> : vector<2x128xf32>
    %46 = tpu.matmul %43, %45, %cst_36 {dimension_numbers = #tpu.dot_dimension_numbers<[1], [0], [0], [1], [0, 0, 1, 1], [], []>} : vector<2x64xbf16>, vector<64x128xbf16>, vector<2x128xf32> -> vector<2x128xf32>
    %47 = arith.addf %42, %46 : vector<2x128xf32>
    %c12 = arith.constant 12 : index
    %c0_37 = arith.constant 0 : index
    %48 = vector.load %arg7[%c12, %c0_37] : memref<128x64xbf16, #tpu.memory_space<vmem>>, vector<2x64xbf16>
    %c6_38 = arith.constant 6 : index
    %c0_39 = arith.constant 0 : index
    %c0_40 = arith.constant 0 : index
    %49 = vector.load %arg4[%c6_38, %c0_39, %c0_40] : memref<64x64x128xbf16, #tpu.memory_space<vmem>>, vector<1x64x128xbf16>
    %50 = vector.shape_cast %49 : vector<1x64x128xbf16> to vector<64x128xbf16>
    %cst_41 = arith.constant dense<0.000000e+00> : vector<2x128xf32>
    %51 = tpu.matmul %48, %50, %cst_41 {dimension_numbers = #tpu.dot_dimension_numbers<[1], [0], [0], [1], [0, 0, 1, 1], [], []>} : vector<2x64xbf16>, vector<64x128xbf16>, vector<2x128xf32> -> vector<2x128xf32>
    %52 = arith.addf %47, %51 : vector<2x128xf32>
    %c14 = arith.constant 14 : index
    %c0_42 = arith.constant 0 : index
    %53 = vector.load %arg7[%c14, %c0_42] : memref<128x64xbf16, #tpu.memory_space<vmem>>, vector<2x64xbf16>
    %c7 = arith.constant 7 : index
    %c0_43 = arith.constant 0 : index
    %c0_44 = arith.constant 0 : index
    %54 = vector.load %arg4[%c7, %c0_43, %c0_44] : memref<64x64x128xbf16, #tpu.memory_space<vmem>>, vector<1x64x128xbf16>
    %55 = vector.shape_cast %54 : vector<1x64x128xbf16> to vector<64x128xbf16>
    %cst_45 = arith.constant dense<0.000000e+00> : vector<2x128xf32>
    %56 = tpu.matmul %53, %55, %cst_45 {dimension_numbers = #tpu.dot_dimension_numbers<[1], [0], [0], [1], [0, 0, 1, 1], [], []>} : vector<2x64xbf16>, vector<64x128xbf16>, vector<2x128xf32> -> vector<2x128xf32>
    %57 = arith.addf %52, %56 : vector<2x128xf32>
    %c16 = arith.constant 16 : index
    %c0_46 = arith.constant 0 : index
    %58 = vector.load %arg7[%c16, %c0_46] : memref<128x64xbf16, #tpu.memory_space<vmem>>, vector<2x64xbf16>
    %c8_47 = arith.constant 8 : index
    %c0_48 = arith.constant 0 : index
    %c0_49 = arith.constant 0 : index
    %59 = vector.load %arg4[%c8_47, %c0_48, %c0_49] : memref<64x64x128xbf16, #tpu.memory_space<vmem>>, vector<1x64x128xbf16>
    %60 = vector.shape_cast %59 : vector<1x64x128xbf16> to vector<64x128xbf16>
    %cst_50 = arith.constant dense<0.000000e+00> : vector<2x128xf32>
    %61 = tpu.matmul %58, %60, %cst_50 {dimension_numbers = #tpu.dot_dimension_numbers<[1], [0], [0], [1], [0, 0, 1, 1], [], []>} : vector<2x64xbf16>, vector<64x128xbf16>, vector<2x128xf32> -> vector<2x128xf32>
    %62 = arith.addf %57, %61 : vector<2x128xf32>
    %c18 = arith.constant 18 : index
    %c0_51 = arith.constant 0 : index
    %63 = vector.load %arg7[%c18, %c0_51] : memref<128x64xbf16, #tpu.memory_space<vmem>>, vector<2x64xbf16>
    %c9 = arith.constant 9 : index
    %c0_52 = arith.constant 0 : index
    %c0_53 = arith.constant 0 : index
    %64 = vector.load %arg4[%c9, %c0_52, %c0_53] : memref<64x64x128xbf16, #tpu.memory_space<vmem>>, vector<1x64x128xbf16>
    %65 = vector.shape_cast %64 : vector<1x64x128xbf16> to vector<64x128xbf16>
    %cst_54 = arith.constant dense<0.000000e+00> : vector<2x128xf32>
    %66 = tpu.matmul %63, %65, %cst_54 {dimension_numbers = #tpu.dot_dimension_numbers<[1], [0], [0], [1], [0, 0, 1, 1], [], []>} : vector<2x64xbf16>, vector<64x128xbf16>, vector<2x128xf32> -> vector<2x128xf32>
    %67 = arith.addf %62, %66 : vector<2x128xf32>
    %c20 = arith.constant 20 : index
    %c0_55 = arith.constant 0 : index
    %68 = vector.load %arg7[%c20, %c0_55] : memref<128x64xbf16, #tpu.memory_space<vmem>>, vector<2x64xbf16>
    %c10_56 = arith.constant 10 : index
    %c0_57 = arith.constant 0 : index
    %c0_58 = arith.constant 0 : index
    %69 = vector.load %arg4[%c10_56, %c0_57, %c0_58] : memref<64x64x128xbf16, #tpu.memory_space<vmem>>, vector<1x64x128xbf16>
    %70 = vector.shape_cast %69 : vector<1x64x128xbf16> to vector<64x128xbf16>
    %cst_59 = arith.constant dense<0.000000e+00> : vector<2x128xf32>
    %71 = tpu.matmul %68, %70, %cst_59 {dimension_numbers = #tpu.dot_dimension_numbers<[1], [0], [0], [1], [0, 0, 1, 1], [], []>} : vector<2x64xbf16>, vector<64x128xbf16>, vector<2x128xf32> -> vector<2x128xf32>
    %72 = arith.addf %67, %71 : vector<2x128xf32>
    %c22 = arith.constant 22 : index
    %c0_60 = arith.constant 0 : index
    %73 = vector.load %arg7[%c22, %c0_60] : memref<128x64xbf16, #tpu.memory_space<vmem>>, vector<2x64xbf16>
    %c11 = arith.constant 11 : index
    %c0_61 = arith.constant 0 : index
    %c0_62 = arith.constant 0 : index
    %74 = vector.load %arg4[%c11, %c0_61, %c0_62] : memref<64x64x128xbf16, #tpu.memory_space<vmem>>, vector<1x64x128xbf16>
    %75 = vector.shape_cast %74 : vector<1x64x128xbf16> to vector<64x128xbf16>
    %cst_63 = arith.constant dense<0.000000e+00> : vector<2x128xf32>
    %76 = tpu.matmul %73, %75, %cst_63 {dimension_numbers = #tpu.dot_dimension_numbers<[1], [0], [0], [1], [0, 0, 1, 1], [], []>} : vector<2x64xbf16>, vector<64x128xbf16>, vector<2x128xf32> -> vector<2x128xf32>
    %77 = arith.addf %72, %76 : vector<2x128xf32>
    %c24 = arith.constant 24 : index
    %c0_64 = arith.constant 0 : index
    %78 = vector.load %arg7[%c24, %c0_64] : memref<128x64xbf16, #tpu.memory_space<vmem>>, vector<2x64xbf16>
    %c12_65 = arith.constant 12 : index
    %c0_66 = arith.constant 0 : index
    %c0_67 = arith.constant 0 : index
    %79 = vector.load %arg4[%c12_65, %c0_66, %c0_67] : memref<64x64x128xbf16, #tpu.memory_space<vmem>>, vector<1x64x128xbf16>
    %80 = vector.shape_cast %79 : vector<1x64x128xbf16> to vector<64x128xbf16>
    %cst_68 = arith.constant dense<0.000000e+00> : vector<2x128xf32>
    %81 = tpu.matmul %78, %80, %cst_68 {dimension_numbers = #tpu.dot_dimension_numbers<[1], [0], [0], [1], [0, 0, 1, 1], [], []>} : vector<2x64xbf16>, vector<64x128xbf16>, vector<2x128xf32> -> vector<2x128xf32>
    %82 = arith.addf %77, %81 : vector<2x128xf32>
    %c26 = arith.constant 26 : index
    %c0_69 = arith.constant 0 : index
    %83 = vector.load %arg7[%c26, %c0_69] : memref<128x64xbf16, #tpu.memory_space<vmem>>, vector<2x64xbf16>
    %c13 = arith.constant 13 : index
    %c0_70 = arith.constant 0 : index
    %c0_71 = arith.constant 0 : index
    %84 = vector.load %arg4[%c13, %c0_70, %c0_71] : memref<64x64x128xbf16, #tpu.memory_space<vmem>>, vector<1x64x128xbf16>
    %85 = vector.shape_cast %84 : vector<1x64x128xbf16> to vector<64x128xbf16>
    %cst_72 = arith.constant dense<0.000000e+00> : vector<2x128xf32>
    %86 = tpu.matmul %83, %85, %cst_72 {dimension_numbers = #tpu.dot_dimension_numbers<[1], [0], [0], [1], [0, 0, 1, 1], [], []>} : vector<2x64xbf16>, vector<64x128xbf16>, vector<2x128xf32> -> vector<2x128xf32>
    %87 = arith.addf %82, %86 : vector<2x128xf32>
    %c28 = arith.constant 28 : index
    %c0_73 = arith.constant 0 : index
    %88 = vector.load %arg7[%c28, %c0_73] : memref<128x64xbf16, #tpu.memory_space<vmem>>, vector<2x64xbf16>
    %c14_74 = arith.constant 14 : index
    %c0_75 = arith.constant 0 : index
    %c0_76 = arith.constant 0 : index
    %89 = vector.load %arg4[%c14_74, %c0_75, %c0_76] : memref<64x64x128xbf16, #tpu.memory_space<vmem>>, vector<1x64x128xbf16>
    %90 = vector.shape_cast %89 : vector<1x64x128xbf16> to vector<64x128xbf16>
    %cst_77 = arith.constant dense<0.000000e+00> : vector<2x128xf32>
    %91 = tpu.matmul %88, %90, %cst_77 {dimension_numbers = #tpu.dot_dimension_numbers<[1], [0], [0], [1], [0, 0, 1, 1], [], []>} : vector<2x64xbf16>, vector<64x128xbf16>, vector<2x128xf32> -> vector<2x128xf32>
    %92 = arith.addf %87, %91 : vector<2x128xf32>
    %c30 = arith.constant 30 : index
    %c0_78 = arith.constant 0 : index
    %93 = vector.load %arg7[%c30, %c0_78] : memref<128x64xbf16, #tpu.memory_space<vmem>>, vector<2x64xbf16>
    %c15 = arith.constant 15 : index
    %c0_79 = arith.constant 0 : index
    %c0_80 = arith.constant 0 : index
    %94 = vector.load %arg4[%c15, %c0_79, %c0_80] : memref<64x64x128xbf16, #tpu.memory_space<vmem>>, vector<1x64x128xbf16>
    %95 = vector.shape_cast %94 : vector<1x64x128xbf16> to vector<64x128xbf16>
    %cst_81 = arith.constant dense<0.000000e+00> : vector<2x128xf32>
    %96 = tpu.matmul %93, %95, %cst_81 {dimension_numbers = #tpu.dot_dimension_numbers<[1], [0], [0], [1], [0, 0, 1, 1], [], []>} : vector<2x64xbf16>, vector<64x128xbf16>, vector<2x128xf32> -> vector<2x128xf32>
    %97 = arith.addf %92, %96 : vector<2x128xf32>
    %c32 = arith.constant 32 : index
    %c0_82 = arith.constant 0 : index
    %98 = vector.load %arg7[%c32, %c0_82] : memref<128x64xbf16, #tpu.memory_space<vmem>>, vector<2x64xbf16>
    %c16_83 = arith.constant 16 : index
    %c0_84 = arith.constant 0 : index
    %c0_85 = arith.constant 0 : index
    %99 = vector.load %arg4[%c16_83, %c0_84, %c0_85] : memref<64x64x128xbf16, #tpu.memory_space<vmem>>, vector<1x64x128xbf16>
    %100 = vector.shape_cast %99 : vector<1x64x128xbf16> to vector<64x128xbf16>
    %cst_86 = arith.constant dense<0.000000e+00> : vector<2x128xf32>
    %101 = tpu.matmul %98, %100, %cst_86 {dimension_numbers = #tpu.dot_dimension_numbers<[1], [0], [0], [1], [0, 0, 1, 1], [], []>} : vector<2x64xbf16>, vector<64x128xbf16>, vector<2x128xf32> -> vector<2x128xf32>
    %102 = arith.addf %97, %101 : vector<2x128xf32>
    %c34 = arith.constant 34 : index
    %c0_87 = arith.constant 0 : index
    %103 = vector.load %arg7[%c34, %c0_87] : memref<128x64xbf16, #tpu.memory_space<vmem>>, vector<2x64xbf16>
    %c17 = arith.constant 17 : index
    %c0_88 = arith.constant 0 : index
    %c0_89 = arith.constant 0 : index
    %104 = vector.load %arg4[%c17, %c0_88, %c0_89] : memref<64x64x128xbf16, #tpu.memory_space<vmem>>, vector<1x64x128xbf16>
    %105 = vector.shape_cast %104 : vector<1x64x128xbf16> to vector<64x128xbf16>
    %cst_90 = arith.constant dense<0.000000e+00> : vector<2x128xf32>
    %106 = tpu.matmul %103, %105, %cst_90 {dimension_numbers = #tpu.dot_dimension_numbers<[1], [0], [0], [1], [0, 0, 1, 1], [], []>} : vector<2x64xbf16>, vector<64x128xbf16>, vector<2x128xf32> -> vector<2x128xf32>
    %107 = arith.addf %102, %106 : vector<2x128xf32>
    %c36 = arith.constant 36 : index
    %c0_91 = arith.constant 0 : index
    %108 = vector.load %arg7[%c36, %c0_91] : memref<128x64xbf16, #tpu.memory_space<vmem>>, vector<2x64xbf16>
    %c18_92 = arith.constant 18 : index
    %c0_93 = arith.constant 0 : index
    %c0_94 = arith.constant 0 : index
    %109 = vector.load %arg4[%c18_92, %c0_93, %c0_94] : memref<64x64x128xbf16, #tpu.memory_space<vmem>>, vector<1x64x128xbf16>
    %110 = vector.shape_cast %109 : vector<1x64x128xbf16> to vector<64x128xbf16>
    %cst_95 = arith.constant dense<0.000000e+00> : vector<2x128xf32>
    %111 = tpu.matmul %108, %110, %cst_95 {dimension_numbers = #tpu.dot_dimension_numbers<[1], [0], [0], [1], [0, 0, 1, 1], [], []>} : vector<2x64xbf16>, vector<64x128xbf16>, vector<2x128xf32> -> vector<2x128xf32>
    %112 = arith.addf %107, %111 : vector<2x128xf32>
    %c38 = arith.constant 38 : index
    %c0_96 = arith.constant 0 : index
    %113 = vector.load %arg7[%c38, %c0_96] : memref<128x64xbf16, #tpu.memory_space<vmem>>, vector<2x64xbf16>
    %c19 = arith.constant 19 : index
    %c0_97 = arith.constant 0 : index
    %c0_98 = arith.constant 0 : index
    %114 = vector.load %arg4[%c19, %c0_97, %c0_98] : memref<64x64x128xbf16, #tpu.memory_space<vmem>>, vector<1x64x128xbf16>
    %115 = vector.shape_cast %114 : vector<1x64x128xbf16> to vector<64x128xbf16>
    %cst_99 = arith.constant dense<0.000000e+00> : vector<2x128xf32>
    %116 = tpu.matmul %113, %115, %cst_99 {dimension_numbers = #tpu.dot_dimension_numbers<[1], [0], [0], [1], [0, 0, 1, 1], [], []>} : vector<2x64xbf16>, vector<64x128xbf16>, vector<2x128xf32> -> vector<2x128xf32>
    %117 = arith.addf %112, %116 : vector<2x128xf32>
    %c40 = arith.constant 40 : index
    %c0_100 = arith.constant 0 : index
    %118 = vector.load %arg7[%c40, %c0_100] : memref<128x64xbf16, #tpu.memory_space<vmem>>, vector<2x64xbf16>
    %c20_101 = arith.constant 20 : index
    %c0_102 = arith.constant 0 : index
    %c0_103 = arith.constant 0 : index
    %119 = vector.load %arg4[%c20_101, %c0_102, %c0_103] : memref<64x64x128xbf16, #tpu.memory_space<vmem>>, vector<1x64x128xbf16>
    %120 = vector.shape_cast %119 : vector<1x64x128xbf16> to vector<64x128xbf16>
    %cst_104 = arith.constant dense<0.000000e+00> : vector<2x128xf32>
    %121 = tpu.matmul %118, %120, %cst_104 {dimension_numbers = #tpu.dot_dimension_numbers<[1], [0], [0], [1], [0, 0, 1, 1], [], []>} : vector<2x64xbf16>, vector<64x128xbf16>, vector<2x128xf32> -> vector<2x128xf32>
    %122 = arith.addf %117, %121 : vector<2x128xf32>
    %c42 = arith.constant 42 : index
    %c0_105 = arith.constant 0 : index
    %123 = vector.load %arg7[%c42, %c0_105] : memref<128x64xbf16, #tpu.memory_space<vmem>>, vector<2x64xbf16>
    %c21 = arith.constant 21 : index
    %c0_106 = arith.constant 0 : index
    %c0_107 = arith.constant 0 : index
    %124 = vector.load %arg4[%c21, %c0_106, %c0_107] : memref<64x64x128xbf16, #tpu.memory_space<vmem>>, vector<1x64x128xbf16>
    %125 = vector.shape_cast %124 : vector<1x64x128xbf16> to vector<64x128xbf16>
    %cst_108 = arith.constant dense<0.000000e+00> : vector<2x128xf32>
    %126 = tpu.matmul %123, %125, %cst_108 {dimension_numbers = #tpu.dot_dimension_numbers<[1], [0], [0], [1], [0, 0, 1, 1], [], []>} : vector<2x64xbf16>, vector<64x128xbf16>, vector<2x128xf32> -> vector<2x128xf32>
    %127 = arith.addf %122, %126 : vector<2x128xf32>
    %c44 = arith.constant 44 : index
    %c0_109 = arith.constant 0 : index
    %128 = vector.load %arg7[%c44, %c0_109] : memref<128x64xbf16, #tpu.memory_space<vmem>>, vector<2x64xbf16>
    %c22_110 = arith.constant 22 : index
    %c0_111 = arith.constant 0 : index
    %c0_112 = arith.constant 0 : index
    %129 = vector.load %arg4[%c22_110, %c0_111, %c0_112] : memref<64x64x128xbf16, #tpu.memory_space<vmem>>, vector<1x64x128xbf16>
    %130 = vector.shape_cast %129 : vector<1x64x128xbf16> to vector<64x128xbf16>
    %cst_113 = arith.constant dense<0.000000e+00> : vector<2x128xf32>
    %131 = tpu.matmul %128, %130, %cst_113 {dimension_numbers = #tpu.dot_dimension_numbers<[1], [0], [0], [1], [0, 0, 1, 1], [], []>} : vector<2x64xbf16>, vector<64x128xbf16>, vector<2x128xf32> -> vector<2x128xf32>
    %132 = arith.addf %127, %131 : vector<2x128xf32>
    %c46 = arith.constant 46 : index
    %c0_114 = arith.constant 0 : index
    %133 = vector.load %arg7[%c46, %c0_114] : memref<128x64xbf16, #tpu.memory_space<vmem>>, vector<2x64xbf16>
    %c23 = arith.constant 23 : index
    %c0_115 = arith.constant 0 : index
    %c0_116 = arith.constant 0 : index
    %134 = vector.load %arg4[%c23, %c0_115, %c0_116] : memref<64x64x128xbf16, #tpu.memory_space<vmem>>, vector<1x64x128xbf16>
    %135 = vector.shape_cast %134 : vector<1x64x128xbf16> to vector<64x128xbf16>
    %cst_117 = arith.constant dense<0.000000e+00> : vector<2x128xf32>
    %136 = tpu.matmul %133, %135, %cst_117 {dimension_numbers = #tpu.dot_dimension_numbers<[1], [0], [0], [1], [0, 0, 1, 1], [], []>} : vector<2x64xbf16>, vector<64x128xbf16>, vector<2x128xf32> -> vector<2x128xf32>
    %137 = arith.addf %132, %136 : vector<2x128xf32>
    %c48 = arith.constant 48 : index
    %c0_118 = arith.constant 0 : index
    %138 = vector.load %arg7[%c48, %c0_118] : memref<128x64xbf16, #tpu.memory_space<vmem>>, vector<2x64xbf16>
    %c24_119 = arith.constant 24 : index
    %c0_120 = arith.constant 0 : index
    %c0_121 = arith.constant 0 : index
    %139 = vector.load %arg4[%c24_119, %c0_120, %c0_121] : memref<64x64x128xbf16, #tpu.memory_space<vmem>>, vector<1x64x128xbf16>
    %140 = vector.shape_cast %139 : vector<1x64x128xbf16> to vector<64x128xbf16>
    %cst_122 = arith.constant dense<0.000000e+00> : vector<2x128xf32>
    %141 = tpu.matmul %138, %140, %cst_122 {dimension_numbers = #tpu.dot_dimension_numbers<[1], [0], [0], [1], [0, 0, 1, 1], [], []>} : vector<2x64xbf16>, vector<64x128xbf16>, vector<2x128xf32> -> vector<2x128xf32>
    %142 = arith.addf %137, %141 : vector<2x128xf32>
    %c50 = arith.constant 50 : index
    %c0_123 = arith.constant 0 : index
    %143 = vector.load %arg7[%c50, %c0_123] : memref<128x64xbf16, #tpu.memory_space<vmem>>, vector<2x64xbf16>
    %c25 = arith.constant 25 : index
    %c0_124 = arith.constant 0 : index
    %c0_125 = arith.constant 0 : index
    %144 = vector.load %arg4[%c25, %c0_124, %c0_125] : memref<64x64x128xbf16, #tpu.memory_space<vmem>>, vector<1x64x128xbf16>
    %145 = vector.shape_cast %144 : vector<1x64x128xbf16> to vector<64x128xbf16>
    %cst_126 = arith.constant dense<0.000000e+00> : vector<2x128xf32>
    %146 = tpu.matmul %143, %145, %cst_126 {dimension_numbers = #tpu.dot_dimension_numbers<[1], [0], [0], [1], [0, 0, 1, 1], [], []>} : vector<2x64xbf16>, vector<64x128xbf16>, vector<2x128xf32> -> vector<2x128xf32>
    %147 = arith.addf %142, %146 : vector<2x128xf32>
    %c52 = arith.constant 52 : index
    %c0_127 = arith.constant 0 : index
    %148 = vector.load %arg7[%c52, %c0_127] : memref<128x64xbf16, #tpu.memory_space<vmem>>, vector<2x64xbf16>
    %c26_128 = arith.constant 26 : index
    %c0_129 = arith.constant 0 : index
    %c0_130 = arith.constant 0 : index
    %149 = vector.load %arg4[%c26_128, %c0_129, %c0_130] : memref<64x64x128xbf16, #tpu.memory_space<vmem>>, vector<1x64x128xbf16>
    %150 = vector.shape_cast %149 : vector<1x64x128xbf16> to vector<64x128xbf16>
    %cst_131 = arith.constant dense<0.000000e+00> : vector<2x128xf32>
    %151 = tpu.matmul %148, %150, %cst_131 {dimension_numbers = #tpu.dot_dimension_numbers<[1], [0], [0], [1], [0, 0, 1, 1], [], []>} : vector<2x64xbf16>, vector<64x128xbf16>, vector<2x128xf32> -> vector<2x128xf32>
    %152 = arith.addf %147, %151 : vector<2x128xf32>
    %c54 = arith.constant 54 : index
    %c0_132 = arith.constant 0 : index
    %153 = vector.load %arg7[%c54, %c0_132] : memref<128x64xbf16, #tpu.memory_space<vmem>>, vector<2x64xbf16>
    %c27 = arith.constant 27 : index
    %c0_133 = arith.constant 0 : index
    %c0_134 = arith.constant 0 : index
    %154 = vector.load %arg4[%c27, %c0_133, %c0_134] : memref<64x64x128xbf16, #tpu.memory_space<vmem>>, vector<1x64x128xbf16>
    %155 = vector.shape_cast %154 : vector<1x64x128xbf16> to vector<64x128xbf16>
    %cst_135 = arith.constant dense<0.000000e+00> : vector<2x128xf32>
    %156 = tpu.matmul %153, %155, %cst_135 {dimension_numbers = #tpu.dot_dimension_numbers<[1], [0], [0], [1], [0, 0, 1, 1], [], []>} : vector<2x64xbf16>, vector<64x128xbf16>, vector<2x128xf32> -> vector<2x128xf32>
    %157 = arith.addf %152, %156 : vector<2x128xf32>
    %c56 = arith.constant 56 : index
    %c0_136 = arith.constant 0 : index
    %158 = vector.load %arg7[%c56, %c0_136] : memref<128x64xbf16, #tpu.memory_space<vmem>>, vector<2x64xbf16>
    %c28_137 = arith.constant 28 : index
    %c0_138 = arith.constant 0 : index
    %c0_139 = arith.constant 0 : index
    %159 = vector.load %arg4[%c28_137, %c0_138, %c0_139] : memref<64x64x128xbf16, #tpu.memory_space<vmem>>, vector<1x64x128xbf16>
    %160 = vector.shape_cast %159 : vector<1x64x128xbf16> to vector<64x128xbf16>
    %cst_140 = arith.constant dense<0.000000e+00> : vector<2x128xf32>
    %161 = tpu.matmul %158, %160, %cst_140 {dimension_numbers = #tpu.dot_dimension_numbers<[1], [0], [0], [1], [0, 0, 1, 1], [], []>} : vector<2x64xbf16>, vector<64x128xbf16>, vector<2x128xf32> -> vector<2x128xf32>
    %162 = arith.addf %157, %161 : vector<2x128xf32>
    %c58 = arith.constant 58 : index
    %c0_141 = arith.constant 0 : index
    %163 = vector.load %arg7[%c58, %c0_141] : memref<128x64xbf16, #tpu.memory_space<vmem>>, vector<2x64xbf16>
    %c29 = arith.constant 29 : index
    %c0_142 = arith.constant 0 : index
    %c0_143 = arith.constant 0 : index
    %164 = vector.load %arg4[%c29, %c0_142, %c0_143] : memref<64x64x128xbf16, #tpu.memory_space<vmem>>, vector<1x64x128xbf16>
    %165 = vector.shape_cast %164 : vector<1x64x128xbf16> to vector<64x128xbf16>
    %cst_144 = arith.constant dense<0.000000e+00> : vector<2x128xf32>
    %166 = tpu.matmul %163, %165, %cst_144 {dimension_numbers = #tpu.dot_dimension_numbers<[1], [0], [0], [1], [0, 0, 1, 1], [], []>} : vector<2x64xbf16>, vector<64x128xbf16>, vector<2x128xf32> -> vector<2x128xf32>
    %167 = arith.addf %162, %166 : vector<2x128xf32>
    %c60 = arith.constant 60 : index
    %c0_145 = arith.constant 0 : index
    %168 = vector.load %arg7[%c60, %c0_145] : memref<128x64xbf16, #tpu.memory_space<vmem>>, vector<2x64xbf16>
    %c30_146 = arith.constant 30 : index
    %c0_147 = arith.constant 0 : index
    %c0_148 = arith.constant 0 : index
    %169 = vector.load %arg4[%c30_146, %c0_147, %c0_148] : memref<64x64x128xbf16, #tpu.memory_space<vmem>>, vector<1x64x128xbf16>
    %170 = vector.shape_cast %169 : vector<1x64x128xbf16> to vector<64x128xbf16>
    %cst_149 = arith.constant dense<0.000000e+00> : vector<2x128xf32>
    %171 = tpu.matmul %168, %170, %cst_149 {dimension_numbers = #tpu.dot_dimension_numbers<[1], [0], [0], [1], [0, 0, 1, 1], [], []>} : vector<2x64xbf16>, vector<64x128xbf16>, vector<2x128xf32> -> vector<2x128xf32>
    %172 = arith.addf %167, %171 : vector<2x128xf32>
    %c62 = arith.constant 62 : index
    %c0_150 = arith.constant 0 : index
    %173 = vector.load %arg7[%c62, %c0_150] : memref<128x64xbf16, #tpu.memory_space<vmem>>, vector<2x64xbf16>
    %c31 = arith.constant 31 : index
    %c0_151 = arith.constant 0 : index
    %c0_152 = arith.constant 0 : index
    %174 = vector.load %arg4[%c31, %c0_151, %c0_152] : memref<64x64x128xbf16, #tpu.memory_space<vmem>>, vector<1x64x128xbf16>
    %175 = vector.shape_cast %174 : vector<1x64x128xbf16> to vector<64x128xbf16>
    %cst_153 = arith.constant dense<0.000000e+00> : vector<2x128xf32>
    %176 = tpu.matmul %173, %175, %cst_153 {dimension_numbers = #tpu.dot_dimension_numbers<[1], [0], [0], [1], [0, 0, 1, 1], [], []>} : vector<2x64xbf16>, vector<64x128xbf16>, vector<2x128xf32> -> vector<2x128xf32>
    %177 = arith.addf %172, %176 : vector<2x128xf32>
    %c64 = arith.constant 64 : index
    %c0_154 = arith.constant 0 : index
    %178 = vector.load %arg7[%c64, %c0_154] : memref<128x64xbf16, #tpu.memory_space<vmem>>, vector<2x64xbf16>
    %c32_155 = arith.constant 32 : index
    %c0_156 = arith.constant 0 : index
    %c0_157 = arith.constant 0 : index
    %179 = vector.load %arg4[%c32_155, %c0_156, %c0_157] : memref<64x64x128xbf16, #tpu.memory_space<vmem>>, vector<1x64x128xbf16>
    %180 = vector.shape_cast %179 : vector<1x64x128xbf16> to vector<64x128xbf16>
    %cst_158 = arith.constant dense<0.000000e+00> : vector<2x128xf32>
    %181 = tpu.matmul %178, %180, %cst_158 {dimension_numbers = #tpu.dot_dimension_numbers<[1], [0], [0], [1], [0, 0, 1, 1], [], []>} : vector<2x64xbf16>, vector<64x128xbf16>, vector<2x128xf32> -> vector<2x128xf32>
    %182 = arith.addf %177, %181 : vector<2x128xf32>
    %c66 = arith.constant 66 : index
    %c0_159 = arith.constant 0 : index
    %183 = vector.load %arg7[%c66, %c0_159] : memref<128x64xbf16, #tpu.memory_space<vmem>>, vector<2x64xbf16>
    %c33 = arith.constant 33 : index
    %c0_160 = arith.constant 0 : index
    %c0_161 = arith.constant 0 : index
    %184 = vector.load %arg4[%c33, %c0_160, %c0_161] : memref<64x64x128xbf16, #tpu.memory_space<vmem>>, vector<1x64x128xbf16>
    %185 = vector.shape_cast %184 : vector<1x64x128xbf16> to vector<64x128xbf16>
    %cst_162 = arith.constant dense<0.000000e+00> : vector<2x128xf32>
    %186 = tpu.matmul %183, %185, %cst_162 {dimension_numbers = #tpu.dot_dimension_numbers<[1], [0], [0], [1], [0, 0, 1, 1], [], []>} : vector<2x64xbf16>, vector<64x128xbf16>, vector<2x128xf32> -> vector<2x128xf32>
    %187 = arith.addf %182, %186 : vector<2x128xf32>
    %c68 = arith.constant 68 : index
    %c0_163 = arith.constant 0 : index
    %188 = vector.load %arg7[%c68, %c0_163] : memref<128x64xbf16, #tpu.memory_space<vmem>>, vector<2x64xbf16>
    %c34_164 = arith.constant 34 : index
    %c0_165 = arith.constant 0 : index
    %c0_166 = arith.constant 0 : index
    %189 = vector.load %arg4[%c34_164, %c0_165, %c0_166] : memref<64x64x128xbf16, #tpu.memory_space<vmem>>, vector<1x64x128xbf16>
    %190 = vector.shape_cast %189 : vector<1x64x128xbf16> to vector<64x128xbf16>
    %cst_167 = arith.constant dense<0.000000e+00> : vector<2x128xf32>
    %191 = tpu.matmul %188, %190, %cst_167 {dimension_numbers = #tpu.dot_dimension_numbers<[1], [0], [0], [1], [0, 0, 1, 1], [], []>} : vector<2x64xbf16>, vector<64x128xbf16>, vector<2x128xf32> -> vector<2x128xf32>
    %192 = arith.addf %187, %191 : vector<2x128xf32>
    %c70 = arith.constant 70 : index
    %c0_168 = arith.constant 0 : index
    %193 = vector.load %arg7[%c70, %c0_168] : memref<128x64xbf16, #tpu.memory_space<vmem>>, vector<2x64xbf16>
    %c35 = arith.constant 35 : index
    %c0_169 = arith.constant 0 : index
    %c0_170 = arith.constant 0 : index
    %194 = vector.load %arg4[%c35, %c0_169, %c0_170] : memref<64x64x128xbf16, #tpu.memory_space<vmem>>, vector<1x64x128xbf16>
    %195 = vector.shape_cast %194 : vector<1x64x128xbf16> to vector<64x128xbf16>
    %cst_171 = arith.constant dense<0.000000e+00> : vector<2x128xf32>
    %196 = tpu.matmul %193, %195, %cst_171 {dimension_numbers = #tpu.dot_dimension_numbers<[1], [0], [0], [1], [0, 0, 1, 1], [], []>} : vector<2x64xbf16>, vector<64x128xbf16>, vector<2x128xf32> -> vector<2x128xf32>
    %197 = arith.addf %192, %196 : vector<2x128xf32>
    %c72 = arith.constant 72 : index
    %c0_172 = arith.constant 0 : index
    %198 = vector.load %arg7[%c72, %c0_172] : memref<128x64xbf16, #tpu.memory_space<vmem>>, vector<2x64xbf16>
    %c36_173 = arith.constant 36 : index
    %c0_174 = arith.constant 0 : index
    %c0_175 = arith.constant 0 : index
    %199 = vector.load %arg4[%c36_173, %c0_174, %c0_175] : memref<64x64x128xbf16, #tpu.memory_space<vmem>>, vector<1x64x128xbf16>
    %200 = vector.shape_cast %199 : vector<1x64x128xbf16> to vector<64x128xbf16>
    %cst_176 = arith.constant dense<0.000000e+00> : vector<2x128xf32>
    %201 = tpu.matmul %198, %200, %cst_176 {dimension_numbers = #tpu.dot_dimension_numbers<[1], [0], [0], [1], [0, 0, 1, 1], [], []>} : vector<2x64xbf16>, vector<64x128xbf16>, vector<2x128xf32> -> vector<2x128xf32>
    %202 = arith.addf %197, %201 : vector<2x128xf32>
    %c74 = arith.constant 74 : index
    %c0_177 = arith.constant 0 : index
    %203 = vector.load %arg7[%c74, %c0_177] : memref<128x64xbf16, #tpu.memory_space<vmem>>, vector<2x64xbf16>
    %c37 = arith.constant 37 : index
    %c0_178 = arith.constant 0 : index
    %c0_179 = arith.constant 0 : index
    %204 = vector.load %arg4[%c37, %c0_178, %c0_179] : memref<64x64x128xbf16, #tpu.memory_space<vmem>>, vector<1x64x128xbf16>
    %205 = vector.shape_cast %204 : vector<1x64x128xbf16> to vector<64x128xbf16>
    %cst_180 = arith.constant dense<0.000000e+00> : vector<2x128xf32>
    %206 = tpu.matmul %203, %205, %cst_180 {dimension_numbers = #tpu.dot_dimension_numbers<[1], [0], [0], [1], [0, 0, 1, 1], [], []>} : vector<2x64xbf16>, vector<64x128xbf16>, vector<2x128xf32> -> vector<2x128xf32>
    %207 = arith.addf %202, %206 : vector<2x128xf32>
    %c76 = arith.constant 76 : index
    %c0_181 = arith.constant 0 : index
    %208 = vector.load %arg7[%c76, %c0_181] : memref<128x64xbf16, #tpu.memory_space<vmem>>, vector<2x64xbf16>
    %c38_182 = arith.constant 38 : index
    %c0_183 = arith.constant 0 : index
    %c0_184 = arith.constant 0 : index
    %209 = vector.load %arg4[%c38_182, %c0_183, %c0_184] : memref<64x64x128xbf16, #tpu.memory_space<vmem>>, vector<1x64x128xbf16>
    %210 = vector.shape_cast %209 : vector<1x64x128xbf16> to vector<64x128xbf16>
    %cst_185 = arith.constant dense<0.000000e+00> : vector<2x128xf32>
    %211 = tpu.matmul %208, %210, %cst_185 {dimension_numbers = #tpu.dot_dimension_numbers<[1], [0], [0], [1], [0, 0, 1, 1], [], []>} : vector<2x64xbf16>, vector<64x128xbf16>, vector<2x128xf32> -> vector<2x128xf32>
    %212 = arith.addf %207, %211 : vector<2x128xf32>
    %c78 = arith.constant 78 : index
    %c0_186 = arith.constant 0 : index
    %213 = vector.load %arg7[%c78, %c0_186] : memref<128x64xbf16, #tpu.memory_space<vmem>>, vector<2x64xbf16>
    %c39 = arith.constant 39 : index
    %c0_187 = arith.constant 0 : index
    %c0_188 = arith.constant 0 : index
    %214 = vector.load %arg4[%c39, %c0_187, %c0_188] : memref<64x64x128xbf16, #tpu.memory_space<vmem>>, vector<1x64x128xbf16>
    %215 = vector.shape_cast %214 : vector<1x64x128xbf16> to vector<64x128xbf16>
    %cst_189 = arith.constant dense<0.000000e+00> : vector<2x128xf32>
    %216 = tpu.matmul %213, %215, %cst_189 {dimension_numbers = #tpu.dot_dimension_numbers<[1], [0], [0], [1], [0, 0, 1, 1], [], []>} : vector<2x64xbf16>, vector<64x128xbf16>, vector<2x128xf32> -> vector<2x128xf32>
    %217 = arith.addf %212, %216 : vector<2x128xf32>
    %c80 = arith.constant 80 : index
    %c0_190 = arith.constant 0 : index
    %218 = vector.load %arg7[%c80, %c0_190] : memref<128x64xbf16, #tpu.memory_space<vmem>>, vector<2x64xbf16>
    %c40_191 = arith.constant 40 : index
    %c0_192 = arith.constant 0 : index
    %c0_193 = arith.constant 0 : index
    %219 = vector.load %arg4[%c40_191, %c0_192, %c0_193] : memref<64x64x128xbf16, #tpu.memory_space<vmem>>, vector<1x64x128xbf16>
    %220 = vector.shape_cast %219 : vector<1x64x128xbf16> to vector<64x128xbf16>
    %cst_194 = arith.constant dense<0.000000e+00> : vector<2x128xf32>
    %221 = tpu.matmul %218, %220, %cst_194 {dimension_numbers = #tpu.dot_dimension_numbers<[1], [0], [0], [1], [0, 0, 1, 1], [], []>} : vector<2x64xbf16>, vector<64x128xbf16>, vector<2x128xf32> -> vector<2x128xf32>
    %222 = arith.addf %217, %221 : vector<2x128xf32>
    %c82 = arith.constant 82 : index
    %c0_195 = arith.constant 0 : index
    %223 = vector.load %arg7[%c82, %c0_195] : memref<128x64xbf16, #tpu.memory_space<vmem>>, vector<2x64xbf16>
    %c41 = arith.constant 41 : index
    %c0_196 = arith.constant 0 : index
    %c0_197 = arith.constant 0 : index
    %224 = vector.load %arg4[%c41, %c0_196, %c0_197] : memref<64x64x128xbf16, #tpu.memory_space<vmem>>, vector<1x64x128xbf16>
    %225 = vector.shape_cast %224 : vector<1x64x128xbf16> to vector<64x128xbf16>
    %cst_198 = arith.constant dense<0.000000e+00> : vector<2x128xf32>
    %226 = tpu.matmul %223, %225, %cst_198 {dimension_numbers = #tpu.dot_dimension_numbers<[1], [0], [0], [1], [0, 0, 1, 1], [], []>} : vector<2x64xbf16>, vector<64x128xbf16>, vector<2x128xf32> -> vector<2x128xf32>
    %227 = arith.addf %222, %226 : vector<2x128xf32>
    %c84 = arith.constant 84 : index
    %c0_199 = arith.constant 0 : index
    %228 = vector.load %arg7[%c84, %c0_199] : memref<128x64xbf16, #tpu.memory_space<vmem>>, vector<2x64xbf16>
    %c42_200 = arith.constant 42 : index
    %c0_201 = arith.constant 0 : index
    %c0_202 = arith.constant 0 : index
    %229 = vector.load %arg4[%c42_200, %c0_201, %c0_202] : memref<64x64x128xbf16, #tpu.memory_space<vmem>>, vector<1x64x128xbf16>
    %230 = vector.shape_cast %229 : vector<1x64x128xbf16> to vector<64x128xbf16>
    %cst_203 = arith.constant dense<0.000000e+00> : vector<2x128xf32>
    %231 = tpu.matmul %228, %230, %cst_203 {dimension_numbers = #tpu.dot_dimension_numbers<[1], [0], [0], [1], [0, 0, 1, 1], [], []>} : vector<2x64xbf16>, vector<64x128xbf16>, vector<2x128xf32> -> vector<2x128xf32>
    %232 = arith.addf %227, %231 : vector<2x128xf32>
    %c86 = arith.constant 86 : index
    %c0_204 = arith.constant 0 : index
    %233 = vector.load %arg7[%c86, %c0_204] : memref<128x64xbf16, #tpu.memory_space<vmem>>, vector<2x64xbf16>
    %c43 = arith.constant 43 : index
    %c0_205 = arith.constant 0 : index
    %c0_206 = arith.constant 0 : index
    %234 = vector.load %arg4[%c43, %c0_205, %c0_206] : memref<64x64x128xbf16, #tpu.memory_space<vmem>>, vector<1x64x128xbf16>
    %235 = vector.shape_cast %234 : vector<1x64x128xbf16> to vector<64x128xbf16>
    %cst_207 = arith.constant dense<0.000000e+00> : vector<2x128xf32>
    %236 = tpu.matmul %233, %235, %cst_207 {dimension_numbers = #tpu.dot_dimension_numbers<[1], [0], [0], [1], [0, 0, 1, 1], [], []>} : vector<2x64xbf16>, vector<64x128xbf16>, vector<2x128xf32> -> vector<2x128xf32>
    %237 = arith.addf %232, %236 : vector<2x128xf32>
    %c88 = arith.constant 88 : index
    %c0_208 = arith.constant 0 : index
    %238 = vector.load %arg7[%c88, %c0_208] : memref<128x64xbf16, #tpu.memory_space<vmem>>, vector<2x64xbf16>
    %c44_209 = arith.constant 44 : index
    %c0_210 = arith.constant 0 : index
    %c0_211 = arith.constant 0 : index
    %239 = vector.load %arg4[%c44_209, %c0_210, %c0_211] : memref<64x64x128xbf16, #tpu.memory_space<vmem>>, vector<1x64x128xbf16>
    %240 = vector.shape_cast %239 : vector<1x64x128xbf16> to vector<64x128xbf16>
    %cst_212 = arith.constant dense<0.000000e+00> : vector<2x128xf32>
    %241 = tpu.matmul %238, %240, %cst_212 {dimension_numbers = #tpu.dot_dimension_numbers<[1], [0], [0], [1], [0, 0, 1, 1], [], []>} : vector<2x64xbf16>, vector<64x128xbf16>, vector<2x128xf32> -> vector<2x128xf32>
    %242 = arith.addf %237, %241 : vector<2x128xf32>
    %c90 = arith.constant 90 : index
    %c0_213 = arith.constant 0 : index
    %243 = vector.load %arg7[%c90, %c0_213] : memref<128x64xbf16, #tpu.memory_space<vmem>>, vector<2x64xbf16>
    %c45 = arith.constant 45 : index
    %c0_214 = arith.constant 0 : index
    %c0_215 = arith.constant 0 : index
    %244 = vector.load %arg4[%c45, %c0_214, %c0_215] : memref<64x64x128xbf16, #tpu.memory_space<vmem>>, vector<1x64x128xbf16>
    %245 = vector.shape_cast %244 : vector<1x64x128xbf16> to vector<64x128xbf16>
    %cst_216 = arith.constant dense<0.000000e+00> : vector<2x128xf32>
    %246 = tpu.matmul %243, %245, %cst_216 {dimension_numbers = #tpu.dot_dimension_numbers<[1], [0], [0], [1], [0, 0, 1, 1], [], []>} : vector<2x64xbf16>, vector<64x128xbf16>, vector<2x128xf32> -> vector<2x128xf32>
    %247 = arith.addf %242, %246 : vector<2x128xf32>
    %c92 = arith.constant 92 : index
    %c0_217 = arith.constant 0 : index
    %248 = vector.load %arg7[%c92, %c0_217] : memref<128x64xbf16, #tpu.memory_space<vmem>>, vector<2x64xbf16>
    %c46_218 = arith.constant 46 : index
    %c0_219 = arith.constant 0 : index
    %c0_220 = arith.constant 0 : index
    %249 = vector.load %arg4[%c46_218, %c0_219, %c0_220] : memref<64x64x128xbf16, #tpu.memory_space<vmem>>, vector<1x64x128xbf16>
    %250 = vector.shape_cast %249 : vector<1x64x128xbf16> to vector<64x128xbf16>
    %cst_221 = arith.constant dense<0.000000e+00> : vector<2x128xf32>
    %251 = tpu.matmul %248, %250, %cst_221 {dimension_numbers = #tpu.dot_dimension_numbers<[1], [0], [0], [1], [0, 0, 1, 1], [], []>} : vector<2x64xbf16>, vector<64x128xbf16>, vector<2x128xf32> -> vector<2x128xf32>
    %252 = arith.addf %247, %251 : vector<2x128xf32>
    %c94 = arith.constant 94 : index
    %c0_222 = arith.constant 0 : index
    %253 = vector.load %arg7[%c94, %c0_222] : memref<128x64xbf16, #tpu.memory_space<vmem>>, vector<2x64xbf16>
    %c47 = arith.constant 47 : index
    %c0_223 = arith.constant 0 : index
    %c0_224 = arith.constant 0 : index
    %254 = vector.load %arg4[%c47, %c0_223, %c0_224] : memref<64x64x128xbf16, #tpu.memory_space<vmem>>, vector<1x64x128xbf16>
    %255 = vector.shape_cast %254 : vector<1x64x128xbf16> to vector<64x128xbf16>
    %cst_225 = arith.constant dense<0.000000e+00> : vector<2x128xf32>
    %256 = tpu.matmul %253, %255, %cst_225 {dimension_numbers = #tpu.dot_dimension_numbers<[1], [0], [0], [1], [0, 0, 1, 1], [], []>} : vector<2x64xbf16>, vector<64x128xbf16>, vector<2x128xf32> -> vector<2x128xf32>
    %257 = arith.addf %252, %256 : vector<2x128xf32>
    %c96 = arith.constant 96 : index
    %c0_226 = arith.constant 0 : index
    %258 = vector.load %arg7[%c96, %c0_226] : memref<128x64xbf16, #tpu.memory_space<vmem>>, vector<2x64xbf16>
    %c48_227 = arith.constant 48 : index
    %c0_228 = arith.constant 0 : index
    %c0_229 = arith.constant 0 : index
    %259 = vector.load %arg4[%c48_227, %c0_228, %c0_229] : memref<64x64x128xbf16, #tpu.memory_space<vmem>>, vector<1x64x128xbf16>
    %260 = vector.shape_cast %259 : vector<1x64x128xbf16> to vector<64x128xbf16>
    %cst_230 = arith.constant dense<0.000000e+00> : vector<2x128xf32>
    %261 = tpu.matmul %258, %260, %cst_230 {dimension_numbers = #tpu.dot_dimension_numbers<[1], [0], [0], [1], [0, 0, 1, 1], [], []>} : vector<2x64xbf16>, vector<64x128xbf16>, vector<2x128xf32> -> vector<2x128xf32>
    %262 = arith.addf %257, %261 : vector<2x128xf32>
    %c98 = arith.constant 98 : index
    %c0_231 = arith.constant 0 : index
    %263 = vector.load %arg7[%c98, %c0_231] : memref<128x64xbf16, #tpu.memory_space<vmem>>, vector<2x64xbf16>
    %c49 = arith.constant 49 : index
    %c0_232 = arith.constant 0 : index
    %c0_233 = arith.constant 0 : index
    %264 = vector.load %arg4[%c49, %c0_232, %c0_233] : memref<64x64x128xbf16, #tpu.memory_space<vmem>>, vector<1x64x128xbf16>
    %265 = vector.shape_cast %264 : vector<1x64x128xbf16> to vector<64x128xbf16>
    %cst_234 = arith.constant dense<0.000000e+00> : vector<2x128xf32>
    %266 = tpu.matmul %263, %265, %cst_234 {dimension_numbers = #tpu.dot_dimension_numbers<[1], [0], [0], [1], [0, 0, 1, 1], [], []>} : vector<2x64xbf16>, vector<64x128xbf16>, vector<2x128xf32> -> vector<2x128xf32>
    %267 = arith.addf %262, %266 : vector<2x128xf32>
    %c100 = arith.constant 100 : index
    %c0_235 = arith.constant 0 : index
    %268 = vector.load %arg7[%c100, %c0_235] : memref<128x64xbf16, #tpu.memory_space<vmem>>, vector<2x64xbf16>
    %c50_236 = arith.constant 50 : index
    %c0_237 = arith.constant 0 : index
    %c0_238 = arith.constant 0 : index
    %269 = vector.load %arg4[%c50_236, %c0_237, %c0_238] : memref<64x64x128xbf16, #tpu.memory_space<vmem>>, vector<1x64x128xbf16>
    %270 = vector.shape_cast %269 : vector<1x64x128xbf16> to vector<64x128xbf16>
    %cst_239 = arith.constant dense<0.000000e+00> : vector<2x128xf32>
    %271 = tpu.matmul %268, %270, %cst_239 {dimension_numbers = #tpu.dot_dimension_numbers<[1], [0], [0], [1], [0, 0, 1, 1], [], []>} : vector<2x64xbf16>, vector<64x128xbf16>, vector<2x128xf32> -> vector<2x128xf32>
    %272 = arith.addf %267, %271 : vector<2x128xf32>
    %c102 = arith.constant 102 : index
    %c0_240 = arith.constant 0 : index
    %273 = vector.load %arg7[%c102, %c0_240] : memref<128x64xbf16, #tpu.memory_space<vmem>>, vector<2x64xbf16>
    %c51 = arith.constant 51 : index
    %c0_241 = arith.constant 0 : index
    %c0_242 = arith.constant 0 : index
    %274 = vector.load %arg4[%c51, %c0_241, %c0_242] : memref<64x64x128xbf16, #tpu.memory_space<vmem>>, vector<1x64x128xbf16>
    %275 = vector.shape_cast %274 : vector<1x64x128xbf16> to vector<64x128xbf16>
    %cst_243 = arith.constant dense<0.000000e+00> : vector<2x128xf32>
    %276 = tpu.matmul %273, %275, %cst_243 {dimension_numbers = #tpu.dot_dimension_numbers<[1], [0], [0], [1], [0, 0, 1, 1], [], []>} : vector<2x64xbf16>, vector<64x128xbf16>, vector<2x128xf32> -> vector<2x128xf32>
    %277 = arith.addf %272, %276 : vector<2x128xf32>
    %c104 = arith.constant 104 : index
    %c0_244 = arith.constant 0 : index
    %278 = vector.load %arg7[%c104, %c0_244] : memref<128x64xbf16, #tpu.memory_space<vmem>>, vector<2x64xbf16>
    %c52_245 = arith.constant 52 : index
    %c0_246 = arith.constant 0 : index
    %c0_247 = arith.constant 0 : index
    %279 = vector.load %arg4[%c52_245, %c0_246, %c0_247] : memref<64x64x128xbf16, #tpu.memory_space<vmem>>, vector<1x64x128xbf16>
    %280 = vector.shape_cast %279 : vector<1x64x128xbf16> to vector<64x128xbf16>
    %cst_248 = arith.constant dense<0.000000e+00> : vector<2x128xf32>
    %281 = tpu.matmul %278, %280, %cst_248 {dimension_numbers = #tpu.dot_dimension_numbers<[1], [0], [0], [1], [0, 0, 1, 1], [], []>} : vector<2x64xbf16>, vector<64x128xbf16>, vector<2x128xf32> -> vector<2x128xf32>
    %282 = arith.addf %277, %281 : vector<2x128xf32>
    %c106 = arith.constant 106 : index
    %c0_249 = arith.constant 0 : index
    %283 = vector.load %arg7[%c106, %c0_249] : memref<128x64xbf16, #tpu.memory_space<vmem>>, vector<2x64xbf16>
    %c53 = arith.constant 53 : index
    %c0_250 = arith.constant 0 : index
    %c0_251 = arith.constant 0 : index
    %284 = vector.load %arg4[%c53, %c0_250, %c0_251] : memref<64x64x128xbf16, #tpu.memory_space<vmem>>, vector<1x64x128xbf16>
    %285 = vector.shape_cast %284 : vector<1x64x128xbf16> to vector<64x128xbf16>
    %cst_252 = arith.constant dense<0.000000e+00> : vector<2x128xf32>
    %286 = tpu.matmul %283, %285, %cst_252 {dimension_numbers = #tpu.dot_dimension_numbers<[1], [0], [0], [1], [0, 0, 1, 1], [], []>} : vector<2x64xbf16>, vector<64x128xbf16>, vector<2x128xf32> -> vector<2x128xf32>
    %287 = arith.addf %282, %286 : vector<2x128xf32>
    %c108 = arith.constant 108 : index
    %c0_253 = arith.constant 0 : index
    %288 = vector.load %arg7[%c108, %c0_253] : memref<128x64xbf16, #tpu.memory_space<vmem>>, vector<2x64xbf16>
    %c54_254 = arith.constant 54 : index
    %c0_255 = arith.constant 0 : index
    %c0_256 = arith.constant 0 : index
    %289 = vector.load %arg4[%c54_254, %c0_255, %c0_256] : memref<64x64x128xbf16, #tpu.memory_space<vmem>>, vector<1x64x128xbf16>
    %290 = vector.shape_cast %289 : vector<1x64x128xbf16> to vector<64x128xbf16>
    %cst_257 = arith.constant dense<0.000000e+00> : vector<2x128xf32>
    %291 = tpu.matmul %288, %290, %cst_257 {dimension_numbers = #tpu.dot_dimension_numbers<[1], [0], [0], [1], [0, 0, 1, 1], [], []>} : vector<2x64xbf16>, vector<64x128xbf16>, vector<2x128xf32> -> vector<2x128xf32>
    %292 = arith.addf %287, %291 : vector<2x128xf32>
    %c110 = arith.constant 110 : index
    %c0_258 = arith.constant 0 : index
    %293 = vector.load %arg7[%c110, %c0_258] : memref<128x64xbf16, #tpu.memory_space<vmem>>, vector<2x64xbf16>
    %c55 = arith.constant 55 : index
    %c0_259 = arith.constant 0 : index
    %c0_260 = arith.constant 0 : index
    %294 = vector.load %arg4[%c55, %c0_259, %c0_260] : memref<64x64x128xbf16, #tpu.memory_space<vmem>>, vector<1x64x128xbf16>
    %295 = vector.shape_cast %294 : vector<1x64x128xbf16> to vector<64x128xbf16>
    %cst_261 = arith.constant dense<0.000000e+00> : vector<2x128xf32>
    %296 = tpu.matmul %293, %295, %cst_261 {dimension_numbers = #tpu.dot_dimension_numbers<[1], [0], [0], [1], [0, 0, 1, 1], [], []>} : vector<2x64xbf16>, vector<64x128xbf16>, vector<2x128xf32> -> vector<2x128xf32>
    %297 = arith.addf %292, %296 : vector<2x128xf32>
    %c112 = arith.constant 112 : index
    %c0_262 = arith.constant 0 : index
    %298 = vector.load %arg7[%c112, %c0_262] : memref<128x64xbf16, #tpu.memory_space<vmem>>, vector<2x64xbf16>
    %c56_263 = arith.constant 56 : index
    %c0_264 = arith.constant 0 : index
    %c0_265 = arith.constant 0 : index
    %299 = vector.load %arg4[%c56_263, %c0_264, %c0_265] : memref<64x64x128xbf16, #tpu.memory_space<vmem>>, vector<1x64x128xbf16>
    %300 = vector.shape_cast %299 : vector<1x64x128xbf16> to vector<64x128xbf16>
    %cst_266 = arith.constant dense<0.000000e+00> : vector<2x128xf32>
    %301 = tpu.matmul %298, %300, %cst_266 {dimension_numbers = #tpu.dot_dimension_numbers<[1], [0], [0], [1], [0, 0, 1, 1], [], []>} : vector<2x64xbf16>, vector<64x128xbf16>, vector<2x128xf32> -> vector<2x128xf32>
    %302 = arith.addf %297, %301 : vector<2x128xf32>
    %c114 = arith.constant 114 : index
    %c0_267 = arith.constant 0 : index
    %303 = vector.load %arg7[%c114, %c0_267] : memref<128x64xbf16, #tpu.memory_space<vmem>>, vector<2x64xbf16>
    %c57 = arith.constant 57 : index
    %c0_268 = arith.constant 0 : index
    %c0_269 = arith.constant 0 : index
    %304 = vector.load %arg4[%c57, %c0_268, %c0_269] : memref<64x64x128xbf16, #tpu.memory_space<vmem>>, vector<1x64x128xbf16>
    %305 = vector.shape_cast %304 : vector<1x64x128xbf16> to vector<64x128xbf16>
    %cst_270 = arith.constant dense<0.000000e+00> : vector<2x128xf32>
    %306 = tpu.matmul %303, %305, %cst_270 {dimension_numbers = #tpu.dot_dimension_numbers<[1], [0], [0], [1], [0, 0, 1, 1], [], []>} : vector<2x64xbf16>, vector<64x128xbf16>, vector<2x128xf32> -> vector<2x128xf32>
    %307 = arith.addf %302, %306 : vector<2x128xf32>
    %c116 = arith.constant 116 : index
    %c0_271 = arith.constant 0 : index
    %308 = vector.load %arg7[%c116, %c0_271] : memref<128x64xbf16, #tpu.memory_space<vmem>>, vector<2x64xbf16>
    %c58_272 = arith.constant 58 : index
    %c0_273 = arith.constant 0 : index
    %c0_274 = arith.constant 0 : index
    %309 = vector.load %arg4[%c58_272, %c0_273, %c0_274] : memref<64x64x128xbf16, #tpu.memory_space<vmem>>, vector<1x64x128xbf16>
    %310 = vector.shape_cast %309 : vector<1x64x128xbf16> to vector<64x128xbf16>
    %cst_275 = arith.constant dense<0.000000e+00> : vector<2x128xf32>
    %311 = tpu.matmul %308, %310, %cst_275 {dimension_numbers = #tpu.dot_dimension_numbers<[1], [0], [0], [1], [0, 0, 1, 1], [], []>} : vector<2x64xbf16>, vector<64x128xbf16>, vector<2x128xf32> -> vector<2x128xf32>
    %312 = arith.addf %307, %311 : vector<2x128xf32>
    %c118 = arith.constant 118 : index
    %c0_276 = arith.constant 0 : index
    %313 = vector.load %arg7[%c118, %c0_276] : memref<128x64xbf16, #tpu.memory_space<vmem>>, vector<2x64xbf16>
    %c59 = arith.constant 59 : index
    %c0_277 = arith.constant 0 : index
    %c0_278 = arith.constant 0 : index
    %314 = vector.load %arg4[%c59, %c0_277, %c0_278] : memref<64x64x128xbf16, #tpu.memory_space<vmem>>, vector<1x64x128xbf16>
    %315 = vector.shape_cast %314 : vector<1x64x128xbf16> to vector<64x128xbf16>
    %cst_279 = arith.constant dense<0.000000e+00> : vector<2x128xf32>
    %316 = tpu.matmul %313, %315, %cst_279 {dimension_numbers = #tpu.dot_dimension_numbers<[1], [0], [0], [1], [0, 0, 1, 1], [], []>} : vector<2x64xbf16>, vector<64x128xbf16>, vector<2x128xf32> -> vector<2x128xf32>
    %317 = arith.addf %312, %316 : vector<2x128xf32>
    %c120 = arith.constant 120 : index
    %c0_280 = arith.constant 0 : index
    %318 = vector.load %arg7[%c120, %c0_280] : memref<128x64xbf16, #tpu.memory_space<vmem>>, vector<2x64xbf16>
    %c60_281 = arith.constant 60 : index
    %c0_282 = arith.constant 0 : index
    %c0_283 = arith.constant 0 : index
    %319 = vector.load %arg4[%c60_281, %c0_282, %c0_283] : memref<64x64x128xbf16, #tpu.memory_space<vmem>>, vector<1x64x128xbf16>
    %320 = vector.shape_cast %319 : vector<1x64x128xbf16> to vector<64x128xbf16>
    %cst_284 = arith.constant dense<0.000000e+00> : vector<2x128xf32>
    %321 = tpu.matmul %318, %320, %cst_284 {dimension_numbers = #tpu.dot_dimension_numbers<[1], [0], [0], [1], [0, 0, 1, 1], [], []>} : vector<2x64xbf16>, vector<64x128xbf16>, vector<2x128xf32> -> vector<2x128xf32>
    %322 = arith.addf %317, %321 : vector<2x128xf32>
    %c122 = arith.constant 122 : index
    %c0_285 = arith.constant 0 : index
    %323 = vector.load %arg7[%c122, %c0_285] : memref<128x64xbf16, #tpu.memory_space<vmem>>, vector<2x64xbf16>
    %c61 = arith.constant 61 : index
    %c0_286 = arith.constant 0 : index
    %c0_287 = arith.constant 0 : index
    %324 = vector.load %arg4[%c61, %c0_286, %c0_287] : memref<64x64x128xbf16, #tpu.memory_space<vmem>>, vector<1x64x128xbf16>
    %325 = vector.shape_cast %324 : vector<1x64x128xbf16> to vector<64x128xbf16>
    %cst_288 = arith.constant dense<0.000000e+00> : vector<2x128xf32>
    %326 = tpu.matmul %323, %325, %cst_288 {dimension_numbers = #tpu.dot_dimension_numbers<[1], [0], [0], [1], [0, 0, 1, 1], [], []>} : vector<2x64xbf16>, vector<64x128xbf16>, vector<2x128xf32> -> vector<2x128xf32>
    %327 = arith.addf %322, %326 : vector<2x128xf32>
    %c124 = arith.constant 124 : index
    %c0_289 = arith.constant 0 : index
    %328 = vector.load %arg7[%c124, %c0_289] : memref<128x64xbf16, #tpu.memory_space<vmem>>, vector<2x64xbf16>
    %c62_290 = arith.constant 62 : index
    %c0_291 = arith.constant 0 : index
    %c0_292 = arith.constant 0 : index
    %329 = vector.load %arg4[%c62_290, %c0_291, %c0_292] : memref<64x64x128xbf16, #tpu.memory_space<vmem>>, vector<1x64x128xbf16>
    %330 = vector.shape_cast %329 : vector<1x64x128xbf16> to vector<64x128xbf16>
    %cst_293 = arith.constant dense<0.000000e+00> : vector<2x128xf32>
    %331 = tpu.matmul %328, %330, %cst_293 {dimension_numbers = #tpu.dot_dimension_numbers<[1], [0], [0], [1], [0, 0, 1, 1], [], []>} : vector<2x64xbf16>, vector<64x128xbf16>, vector<2x128xf32> -> vector<2x128xf32>
    %332 = arith.addf %327, %331 : vector<2x128xf32>
    %c126 = arith.constant 126 : index
    %c0_294 = arith.constant 0 : index
    %333 = vector.load %arg7[%c126, %c0_294] : memref<128x64xbf16, #tpu.memory_space<vmem>>, vector<2x64xbf16>
    %c63 = arith.constant 63 : index
    %c0_295 = arith.constant 0 : index
    %c0_296 = arith.constant 0 : index
    %334 = vector.load %arg4[%c63, %c0_295, %c0_296] : memref<64x64x128xbf16, #tpu.memory_space<vmem>>, vector<1x64x128xbf16>
    %335 = vector.shape_cast %334 : vector<1x64x128xbf16> to vector<64x128xbf16>
    %cst_297 = arith.constant dense<0.000000e+00> : vector<2x128xf32>
    %336 = tpu.matmul %333, %335, %cst_297 {dimension_numbers = #tpu.dot_dimension_numbers<[1], [0], [0], [1], [0, 0, 1, 1], [], []>} : vector<2x64xbf16>, vector<64x128xbf16>, vector<2x128xf32> -> vector<2x128xf32>
    %337 = arith.addf %332, %336 : vector<2x128xf32>
    %c0_298 = arith.constant 0 : index
    %c0_299 = arith.constant 0 : index
    %338 = vector.load %arg5[%c0_298, %c0_299] : memref<1x128xf32, #tpu.memory_space<vmem>>, vector<1x128xf32>
    %339 = vector.broadcast %338 : vector<1x128xf32> to vector<2x128xf32>
    %340 = arith.addf %337, %339 : vector<2x128xf32>
    %341 = math.tanh %340 : vector<2x128xf32>
    %c0_300 = arith.constant 0 : index
    %c0_301 = arith.constant 0 : index
    %342 = vector.load %arg6[%c0_300, %c0_301] : memref<2x128xf32, #tpu.memory_space<vmem>>, vector<2x128xf32>
    tpu.vector_store %arg6[%c0_300, %c0_301], %341 {strides = array<i32>} : memref<2x128xf32, #tpu.memory_space<vmem>>, vector<2x128xf32>,
    return
  }
  func.func @transform_0(%arg0: i32) -> (i32, i32) {
    %c0_i32 = arith.constant 0 : i32
    %c0_i32_0 = arith.constant 0 : i32
    %c0_i32_1 = arith.constant 0 : i32
    return %c0_i32, %c0_i32_0 : i32, i32
  }
  func.func @transform_1(%arg0: i32) -> (i32, i32) {
    %c0_i32 = arith.constant 0 : i32
    %c0_i32_0 = arith.constant 0 : i32
    %c0_i32_1 = arith.constant 0 : i32
    return %c0_i32, %c0_i32_0 : i32, i32
  }
  func.func @transform_2(%arg0: i32) -> (i32, i32) {
    %c0_i32 = arith.constant 0 : i32
    %c0_i32_0 = arith.constant 0 : i32
    %c0_i32_1 = arith.constant 0 : i32
    return %c0_i32, %c0_i32_0 : i32, i32
  }
  func.func @transform_3(%arg0: i32) -> (i32, i32, i32) {
    %c0_i32 = arith.constant 0 : i32
    %c0_i32_0 = arith.constant 0 : i32
    %c0_i32_1 = arith.constant 0 : i32
    %c0_i32_2 = arith.constant 0 : i32
    return %c0_i32, %c0_i32_0, %c0_i32_1 : i32, i32, i32
  }
  func.func @transform_4(%arg0: i32) -> (i32, i32) {
    %c0_i32 = arith.constant 0 : i32
    %c0_i32_0 = arith.constant 0 : i32
    %c0_i32_1 = arith.constant 0 : i32
    return %c0_i32, %c0_i32_0 : i32, i32
  }
  func.func @transform_5(%arg0: i32) -> (i32, i32) {
    %c0_i32 = arith.constant 0 : i32
    %c0_i32_0 = arith.constant 0 : i32
    %c0_i32_1 = arith.constant 0 : i32
    return %c0_i32, %c0_i32_0 : i32, i32
  }
}

</mosaic_0001>

<bundles_post_ra>
// kernel: basic_cnn_forward.1
= control target key start
LH: loop header
LB: loop body
LE: loop exit
PB: predicated region body
PF: predicated region fallthrough
CT: control target
= control target key end

     0   :  { %vm273_vm0 = vcmask 293888   ;;  %vm370_vm1 = vcmask 1041408   ;;  %v8324_v37 = vmov 0.0   ;;  %s9961_s0 = inlined_call_operand.vmem [shape: bf16[512,36], index: 0, kind: input, shape index: {}]   ;;  %s9962_s1 = inlined_call_operand.vmem [shape: bf16[36,64], index: 1, kind: input, shape index: {}]   ;;  %s9963_s2 = inlined_call_operand.vmem [shape: f32[1,64], index: 2, kind: input, shape index: {}]   ;;  %s9964_s3 = inlined_call_operand.vmem [shape: bf16[64,64,128], index: 3, kind: input, shape index: {}]   ;;  %s9965_s4 = inlined_call_operand.vmem [shape: f32[1,128], index: 4, kind: input, shape index: {}]   ;;  %s9966_s5 = inlined_call_operand.hbm [shape: f32[2,128], index: 5, kind: output, shape index: {}]  }
   0x1   :  { %v8007_v0 = vld [vmem:[%s9962_s1] sm:$0xff]   ;;  %v8008_v1 = vld [vmem:[%s9962_s1 + $0x8] sm:$0xff]   ;;  %v8009_v2 = vld [vmem:[%s9962_s1 + $0x10] ss:$0 sps:$4 sm:$0x33]   ;;  %7235 = vmatprep.subr.bf16.mxu1 %v8324_v37 }
   0x2   :  { %7165 = vmatprep.subr.bf16.mxu0 %v8007_v0  ;;  %v8010_v3 = vld [vmem:[%s9961_s0] sm:$0xff]   ;;  %v372_v4 = vsel %vm370_vm1, %v8009_v2, 0  ;;  %v8011_v5 = vld [vmem:[%s9961_s0 + $0x8] sm:$0xff]   ;;  %v8012_v6 = vld [vmem:[%s9961_s0 + $0x10] sm:$0xff]  }
   0x3   :  { %7166 = vmatpush3.bf16.msra.mxu0 %v8007_v0  ;;  %7171 = vmatprep.mubr.msk.bf16.mxu0 %vm273_vm0, %v8010_v3  ;;  %v8013_v7 = vld [vmem:[%s9961_s0 + $0x18] sm:$0xff]   ;;  %v8014_v8 = vld [vmem:[%s9961_s0 + $0x20] sm:$0xff]   ;;  %v8015_v9 = vld [vmem:[%s9961_s0 + $0x28] sm:$0xff]  }
   0x4   :  { %7167 = vmatprep.subr.bf16.mxu0 %v8008_v1  ;;  %v8016_v10 = vld [vmem:[%s9961_s0 + $0x30] sm:$0xff]   ;;  %v8017_v11 = vld [vmem:[%s9961_s0 + $0x38] sm:$0xff]   ;;  %v8018_v12 = vld [vmem:[%s9961_s0 + $0x40] sm:$0xff]  }
   0x5   :  { %v8019_v13 = vld [vmem:[%s9961_s0 + $0x48] sm:$0xff]   ;;  %v8020_v14 = vld [vmem:[%s9961_s0 + $0x50] sm:$0xff]   ;;  %v8021_v15 = vld [vmem:[%s9961_s0 + $0x58] sm:$0xff]  }
   0x6   :  { %v8022_v16 = vld [vmem:[%s9961_s0 + $0x60] sm:$0xff]   ;;  %v8023_v17 = vld [vmem:[%s9961_s0 + $0x68] sm:$0xff]   ;;  %v8024_v18 = vld [vmem:[%s9961_s0 + $0x70] sm:$0xff]  }
   0x7   :  { %7168 = vmatpush3.bf16.msra.mxu0 %v8008_v1  ;;  %v8025_v19 = vld [vmem:[%s9961_s0 + $0x78] sm:$0xff]   ;;  %v8026_v20 = vld [vmem:[%s9961_s0 + $0x80] sm:$0xff]   ;;  %v8027_v21 = vld [vmem:[%s9961_s0 + $0x88] sm:$0xff]  }
   0x8   :  { %8003 = vmatprep.subr.msk.bf16.mxu0 %vm370_vm1, %v8009_v2  ;;  %v8028_v22 = vld [vmem:[%s9961_s0 + $0x90] sm:$0xff]   ;;  %v8029_v23 = vld [vmem:[%s9961_s0 + $0x98] sm:$0xff]   ;;  %v8030_v24 = vld [vmem:[%s9961_s0 + $0xa0] sm:$0xff]  }
   0x9   :  { %v8031_v25 = vld [vmem:[%s9961_s0 + $0xa8] sm:$0xff]   ;;  %v8032_v26 = vld [vmem:[%s9961_s0 + $0xb0] sm:$0xff]   ;;  %v8033_v27 = vld [vmem:[%s9961_s0 + $0xb8] sm:$0xff]  }
   0xa   :  { %v8034_v28 = vld [vmem:[%s9961_s0 + $0xc0] sm:$0xff]   ;;  %v8035_v29 = vld [vmem:[%s9961_s0 + $0xc8] sm:$0xff]   ;;  %v8036_v30 = vld [vmem:[%s9961_s0 + $0xd0] sm:$0xff]  }
   0xb   :  { %7170 = vmatpush3.bf16.msra.mxu0 %v372_v4  ;;  %v8037_v31 = vld [vmem:[%s9961_s0 + $0xd8] sm:$0xff]   ;;  %v8038_v32 = vld [vmem:[%s9961_s0 + $0xe0] sm:$0xff]   ;;  %v8039_v33 = vld [vmem:[%s9961_s0 + $0xe8] sm:$0xff]  }
   0xc   :  { %v8040_v34 = vld [vmem:[%s9961_s0 + $0xf0] sm:$0xff]   ;;  %v8041_v35 = vld [vmem:[%s9961_s0 + $0xf8] sm:$0xff]   ;;  %v8042_v36 = vld [vmem:[%s9964_s3 + $0x100] sm:$0xff]   ;;  %7331 = vmatprep.subr.bf16.mxu0 %v8324_v37 }
   0xd   :  { %v8043_v38 = vld [vmem:[%s9964_s3 + $0x20] sm:$0xff]   ;;  %v8044_v39 = vld [vmem:[%s9964_s3 + $0x108] sm:$0xff]   ;;  %v8046_v41 = vld [vmem:[%s9964_s3 + $0x110] sm:$0xff]  }
   0xe   :  { %7172 = vmatmul.mubr.msk.bf16.vlgmr.msra.gmra.mrb[0].mxu0 %vm273_vm0, %v8011_v5  ;;  %7236 = vmatpush3.bf16.msra.mxu1 %v8043_v38  ;;  %v8045_v40 = vld [vmem:[%s9964_s3 + $0x28] sm:$0xff]   ;;  %v8047_v42 = vld [vmem:[%s9964_s3 + $0x30] sm:$0xff]  }
   0xf   :  { %7175 = vmatprep.mubr.msk.bf16.mxu0 %vm273_vm0, %v8012_v6  ;;  %7332 = vmatpush3.bf16.msra.mxu0 %v8042_v36 }
  0x10   :  { %7333 = vmatprep.subr.bf16.mxu0 %v8324_v37  ;;  %7237 = vmatprep.subr.bf16.mxu1 %v8324_v37 }
  0x12   :  { %7238 = vmatpush3.bf16.msra.mxu1 %v8045_v40 }
  0x13   :  { %7334 = vmatpush3.bf16.msra.mxu0 %v8044_v39  ;;  %7239 = vmatprep.subr.bf16.mxu1 %v8324_v37 }
  0x14   :  { %7335 = vmatprep.subr.bf16.mxu0 %v8324_v37 }
  0x16   :  { %7176 = vmatmul.mubr.msk.bf16.gmra.mrb[4].mxu0 %vm273_vm0, %v8013_v7 }
  0x17   :  { %7179 = vmatprep.mubr.msk.bf16.mxu0 %vm273_vm0, %v8014_v8  ;;  %7336 = vmatpush3.bf16.msra.mxu0 %v8046_v41 }
  0x18   :  { %7337 = vmatprep.subr.bf16.mxu0 %v8324_v37 }
  0x1e   :  { %7180 = vmatmul.mubr.msk.bf16.gmra.mrb[8].mxu0 %vm273_vm0, %v8015_v9 }
  0x1f   :  { %7183 = vmatprep.mubr.msk.bf16.mxu0 %vm273_vm0, %v8016_v10 }
  0x26   :  { %7184 = vmatmul.mubr.msk.bf16.gmra.mrb[12].mxu0 %vm273_vm0, %v8017_v11 }
  0x27   :  { %7187 = vmatprep.mubr.msk.bf16.mxu0 %vm273_vm0, %v8018_v12 }
  0x2e   :  { %7188 = vmatmul.mubr.msk.bf16.gmra.mrb[16].mxu0 %vm273_vm0, %v8019_v13 }
  0x2f   :  { %7191 = vmatprep.mubr.msk.bf16.mxu0 %vm273_vm0, %v8020_v14 }
  0x36   :  { %7192 = vmatmul.mubr.msk.bf16.gmra.mrb[20].mxu0 %vm273_vm0, %v8021_v15 }
  0x37   :  { %7195 = vmatprep.mubr.msk.bf16.mxu0 %vm273_vm0, %v8022_v16 }
  0x3e   :  { %7196 = vmatmul.mubr.msk.bf16.gmra.mrb[24].mxu0 %vm273_vm0, %v8023_v17 }
  0x3f   :  { %7199 = vmatprep.mubr.msk.bf16.mxu0 %vm273_vm0, %v8024_v18 }
  0x46   :  { %7200 = vmatmul.mubr.msk.bf16.gmra.mrb[28].mxu0 %vm273_vm0, %v8025_v19 }
  0x47   :  { %7203 = vmatprep.mubr.msk.bf16.mxu0 %vm273_vm0, %v8026_v20 }
  0x4e   :  { %7204 = vmatmul.mubr.msk.bf16.gmra.mrb[32].mxu0 %vm273_vm0, %v8027_v21 }
  0x4f   :  { %7207 = vmatprep.mubr.msk.bf16.mxu0 %vm273_vm0, %v8028_v22 }
  0x56   :  { %7208 = vmatmul.mubr.msk.bf16.gmra.mrb[36].mxu0 %vm273_vm0, %v8029_v23 }
  0x57   :  { %7211 = vmatprep.mubr.msk.bf16.mxu0 %vm273_vm0, %v8030_v24 }
  0x5e   :  { %7212 = vmatmul.mubr.msk.bf16.gmra.mrb[40].mxu0 %vm273_vm0, %v8031_v25 }
  0x5f   :  { %7215 = vmatprep.mubr.msk.bf16.mxu0 %vm273_vm0, %v8032_v26 }
  0x66   :  { %7216 = vmatmul.mubr.msk.bf16.gmra.mrb[44].mxu0 %vm273_vm0, %v8033_v27 }
  0x67   :  { %7219 = vmatprep.mubr.msk.bf16.mxu0 %vm273_vm0, %v8034_v28 }
  0x6e   :  { %7220 = vmatmul.mubr.msk.bf16.gmra.mrb[48].mxu0 %vm273_vm0, %v8035_v29 }
  0x6f   :  { %7223 = vmatprep.mubr.msk.bf16.mxu0 %vm273_vm0, %v8036_v30 }
  0x76   :  { %7224 = vmatmul.mubr.msk.bf16.gmra.mrb[52].mxu0 %vm273_vm0, %v8037_v31 }
  0x77   :  { %7227 = vmatprep.mubr.msk.bf16.mxu0 %vm273_vm0, %v8038_v32 }
  0x7e   :  { %7228 = vmatmul.mubr.msk.bf16.gmra.mrb[56].mxu0 %vm273_vm0, %v8039_v33 }
  0x7f   :  { %7231 = vmatprep.mubr.msk.bf16.mxu0 %vm273_vm0, %v8040_v34 }
  0x86   :  { %7232 = vmatmul.mubr.msk.bf16.gmra.mrb[60].mxu0 %vm273_vm0, %v8041_v35 }
  0x87   :  { %10 = vsyncpa [#allocation4], 0  ;;  %v8048_v43 = vld [vmem:[%s9964_s3 + $0x118] sm:$0xff]   ;;  %7240 = vmatpush3.bf16.msra.mxu1 %v8047_v42  ;;  %vm8325_vm2 = vmmov 0   ;;  %v8543_v61 = vld [vmem:[%s9963_s2] ss:$0 sm:$0xff] }
  0x88   :  { %7338 = vmatpush3.bf16.msra.mxu0 %v8048_v43  ;;  %7241 = vmatprep.subr.bf16.mxu1 %v8324_v37  ;;  %v8049_v44 = vld [vmem:[%s9964_s3 + $0x38] sm:$0xff]   ;;  %vm783_vm3 = vcmask 523264   ;;  %s8326_s20 = smov [#allocation3]  }
  0x89   :  { %7355 = vmatprep.subr.bf16.mxu0 %v8324_v37  ;;  %7339 = vmatprep.mubr.msk.bf16.mxu0 %vm8325_vm2, %v8324_v37  ;;  %s5909_s21 = sshll.u32 %s8326_s20, 4  ;;  %s5910_s21 = int_to_ptr.vmem [resolvable:$true] %s5909_s21 }
  0x8a   :  { %7243 = vmatprep.mubr.msk.bf16.mxu1 %vm8325_vm2, %v8324_v37  ;;  %s8300_s22 = scalar_lea.vmem %s5910_s21, 32  ;;  %p8305_p1 = scmp.lt.s32.totalorder %s5910_s21, %s5910_s21 }
  0x8b   :  { %7242 = vmatpush3.bf16.msra.mxu1 %v8049_v44  ;;  %p8301_p0 = scmp.ne.s32.totalorder %s5910_s21, %s8300_s22  ;;  %p8306_p2 = scmp.lt.s32.totalorder %s8300_s22, %s8300_s22 }
  0x8c   :  { %7247 = vmatprep.subr.bf16.mxu1 %v8324_v37 }
  0x8d   :  { %p8307_p3 = por %p8306_p2, %p8305_p1 }
  0x8f   :  { %p8308_p4 = pnand %p8307_p3, %p8301_p0 }
  0xe1   :  { %v7173_v45 = vpop.f32.mrb[0].mxu0 }
  0xe2   :  { %v408_v46 = vpop.f32.mrb[1].mxu0  ;;  %v417_v62 = vadd.f32 %v7173_v45, %v8543_v61 }
  0xe3   :  { %v7174_v47 = vpop.f32.mrb[2].mxu0  ;;  %v409_v63 = vadd.f32 %v8543_v61, %v408_v46 }
  0xe4   :  { %v411_v48 = vpop.f32.mrb[3].mxu0  ;;  %v420_v1 = vadd.f32 %v7174_v47, %v8543_v61  ;;  %v665_v7 = vmax.f32 %v417_v62, 0.0 }
  0xe5   :  { %v412_v4 = vadd.f32 %v8543_v61, %v411_v48  ;;  %v663_v11 = vmax.f32 %v409_v63, 0.0 }
  0xe6   :  { %v666_v14 = vmax.f32 %v420_v1, 0.0 }
  0xe7   :  { %v664_v17 = vmax.f32 %v412_v4, 0.0 }
  0xe9   :  { %v7177_v49 = vpop.f32.mrb[4].mxu0 }
  0xea   :  { %v424_v50 = vpop.f32.mrb[5].mxu0  ;;  %v433_v20 = vadd.f32 %v7177_v49, %v8543_v61 }
  0xeb   :  { %v7178_v51 = vpop.f32.mrb[6].mxu0  ;;  %v425_v22 = vadd.f32 %v8543_v61, %v424_v50 }
  0xec   :  { %v427_v52 = vpop.f32.mrb[7].mxu0  ;;  %v436_v25 = vadd.f32 %v7178_v51, %v8543_v61  ;;  %v669_v31 = vmax.f32 %v433_v20, 0.0 }
  0xed   :  { %v428_v28 = vadd.f32 %v8543_v61, %v427_v52  ;;  %v667_v35 = vmax.f32 %v425_v22, 0.0 }
  0xee   :  { %v670_v39 = vmax.f32 %v436_v25, 0.0 }
  0xef   :  { %v668_v42 = vmax.f32 %v428_v28, 0.0 }
  0xf1   :  { %v7181_v53 = vpop.f32.mrb[8].mxu0 }
  0xf2   :  { %v440_v54 = vpop.f32.mrb[9].mxu0  ;;  %v449_v45 = vadd.f32 %v7181_v53, %v8543_v61 }
  0xf3   :  { %v7182_v55 = vpop.f32.mrb[10].mxu0  ;;  %v441_v47 = vadd.f32 %v8543_v61, %v440_v54 }
  0xf4   :  { %v443_v56 = vpop.f32.mrb[11].mxu0  ;;  %v452_v50 = vadd.f32 %v7182_v55, %v8543_v61  ;;  %v673_v1 = vmax.f32 %v449_v45, 0.0 }
  0xf5   :  { %v444_v62 = vadd.f32 %v8543_v61, %v443_v56  ;;  %v671_v4 = vmax.f32 %v441_v47, 0.0 }
  0xf9   :  { %v8532_v57 = vpop.f32.mrb[12].mxu0 }
  0xfa   :  { %v8534_v58 = vpop.f32.mrb[13].mxu0 }
  0xfb   :  { %v8536_v59 = vpop.f32.mrb[14].mxu0 }
  0xfc   :  { %v8538_v60 = vpop.f32.mrb[15].mxu0 }
  0xfd   :  { %v460_v20 = vadd.f32 %v8543_v61, %v8538_v60 }
 0x101   :  { %v7189_v0 = vpop.f32.mrb[16].mxu0 }
 0x102   :  { %v481_v2 = vadd.f32 %v7189_v0, %v8543_v61  ;;  %v472_v3 = vpop.f32.mrb[17].mxu0 }
 0x103   :  { %v473_v5 = vadd.f32 %v8543_v61, %v472_v3  ;;  %v7190_v6 = vpop.f32.mrb[18].mxu0 }
 0x104   :  { %v681_v8 = vmax.f32 %v481_v2, 0.0  ;;  %v484_v9 = vadd.f32 %v7190_v6, %v8543_v61  ;;  %v475_v10 = vpop.f32.mrb[19].mxu0  ;;  %v674_v6 = vmax.f32 %v452_v50, 0.0 }
 0x105   :  { %v679_v12 = vmax.f32 %v473_v5, 0.0  ;;  %v476_v13 = vadd.f32 %v8543_v61, %v475_v10  ;;  %v465_v10 = vadd.f32 %v8532_v57, %v8543_v61 }
 0x106   :  { %v8553_v15 = vmax.f32 %v665_v7, %v681_v8  ;;  %v682_v16 = vmax.f32 %v484_v9, 0.0  ;;  %v672_v8 = vmax.f32 %v444_v62, 0.0 }
 0x107   :  { %v8555_v18 = vmax.f32 %v663_v11, %v679_v12  ;;  %v680_v19 = vmax.f32 %v476_v13, 0.0  ;;  %v457_v12 = vadd.f32 %v8543_v61, %v8534_v58 }
 0x108   :  { %v8558_v21 = vmax.f32 %v666_v14, %v682_v16  ;;  %v468_v16 = vadd.f32 %v8536_v59, %v8543_v61 }
 0x109   :  { %v8561_v23 = vmax.f32 %v664_v17, %v680_v19  ;;  %v7193_v24 = vpop.f32.mrb[20].mxu0 }
 0x10a   :  { %v497_v26 = vadd.f32 %v7193_v24, %v8543_v61  ;;  %v488_v27 = vpop.f32.mrb[21].mxu0  ;;  %v677_v24 = vmax.f32 %v465_v10, 0.0 }
 0x10b   :  { %v489_v29 = vadd.f32 %v8543_v61, %v488_v27  ;;  %v7194_v30 = vpop.f32.mrb[22].mxu0  ;;  %v675_v27 = vmax.f32 %v457_v12, 0.0 }
 0x10c   :  { %v685_v32 = vmax.f32 %v497_v26, 0.0  ;;  %v500_v33 = vadd.f32 %v7194_v30, %v8543_v61  ;;  %v491_v34 = vpop.f32.mrb[23].mxu0  ;;  %v678_v30 = vmax.f32 %v468_v16, 0.0 }
 0x10d   :  { %v683_v36 = vmax.f32 %v489_v29, 0.0  ;;  %v492_v38 = vadd.f32 %v8543_v61, %v491_v34 }
 0x10e   :  { %v8569_v40 = vmax.f32 %v669_v31, %v685_v32  ;;  %v686_v41 = vmax.f32 %v500_v33, 0.0  ;;  %v676_v32 = vmax.f32 %v460_v20, 0.0 }
 0x10f   :  { %v8571_v43 = vmax.f32 %v667_v35, %v683_v36  ;;  %v684_v44 = vmax.f32 %v492_v38, 0.0 }
 0x110   :  { %v8574_v46 = vmax.f32 %v670_v39, %v686_v41 }
 0x111   :  { %v8577_v48 = vmax.f32 %v668_v42, %v684_v44  ;;  %v7197_v49 = vpop.f32.mrb[24].mxu0 }
 0x112   :  { %v513_v51 = vadd.f32 %v7197_v49, %v8543_v61  ;;  %v504_v52 = vpop.f32.mrb[25].mxu0 }
 0x113   :  { %v505_v63 = vadd.f32 %v8543_v61, %v504_v52  ;;  %v7198_v0 = vpop.f32.mrb[26].mxu0 }
 0x114   :  { %v689_v2 = vmax.f32 %v513_v51, 0.0  ;;  %v516_v53 = vadd.f32 %v7198_v0, %v8543_v61  ;;  %v507_v3 = vpop.f32.mrb[27].mxu0 }
 0x115   :  { %v687_v54 = vmax.f32 %v505_v63, 0.0  ;;  %v508_v5 = vadd.f32 %v8543_v61, %v507_v3 }
 0x116   :  { %v8585_v7 = vmax.f32 %v673_v1, %v689_v2  ;;  %v690_v55 = vmax.f32 %v516_v53, 0.0 }
 0x117   :  { %v8587_v9 = vmax.f32 %v671_v4, %v687_v54  ;;  %v688_v56 = vmax.f32 %v508_v5, 0.0 }
 0x118   :  { %v8591_v11 = vmax.f32 %v674_v6, %v690_v55 }
 0x119   :  { %v8595_v13 = vmax.f32 %v672_v8, %v688_v56  ;;  %v7201_v14 = vpop.f32.mrb[28].mxu0 }
 0x11a   :  { %v529_v17 = vadd.f32 %v7201_v14, %v8543_v61  ;;  %v520_v19 = vpop.f32.mrb[29].mxu0 }
 0x11b   :  { %v521_v22 = vadd.f32 %v8543_v61, %v520_v19  ;;  %v7202_v57 = vpop.f32.mrb[30].mxu0 }
 0x11c   :  { %v693_v25 = vmax.f32 %v529_v17, 0.0  ;;  %v532_v26 = vadd.f32 %v7202_v57, %v8543_v61  ;;  %v523_v58 = vpop.f32.mrb[31].mxu0 }
 0x11d   :  { %v691_v28 = vmax.f32 %v521_v22, 0.0  ;;  %v524_v29 = vadd.f32 %v8543_v61, %v523_v58 }
 0x11e   :  { %v8605_v59 = vmax.f32 %v677_v24, %v693_v25  ;;  %v694_v31 = vmax.f32 %v532_v26, 0.0 }
 0x11f   :  { %v8607_v33 = vmax.f32 %v675_v27, %v691_v28  ;;  %v692_v60 = vmax.f32 %v524_v29, 0.0 }
 0x120   :  { %v8609_v34 = vmax.f32 %v678_v30, %v694_v31 }
 0x121   :  { %v8611_v35 = vmax.f32 %v676_v32, %v692_v60  ;;  %v7205_v36 = vpop.f32.mrb[32].mxu0 }
 0x122   :  { %v536_v38 = vpop.f32.mrb[33].mxu0  ;;  %v545_v2 = vadd.f32 %v7205_v36, %v8543_v61 }
 0x123   :  { %v7206_v39 = vpop.f32.mrb[34].mxu0  ;;  %v537_v53 = vadd.f32 %v8543_v61, %v536_v38 }
 0x124   :  { %v539_v41 = vpop.f32.mrb[35].mxu0  ;;  %v548_v4 = vadd.f32 %v7206_v39, %v8543_v61  ;;  %v697_v56 = vmax.f32 %v545_v2, 0.0 }
 0x125   :  { %v540_v6 = vadd.f32 %v8543_v61, %v539_v41  ;;  %v695_v16 = vmax.f32 %v537_v53, 0.0 }
 0x126   :  { %v698_v20 = vmax.f32 %v548_v4, 0.0 }
 0x127   :  { %v696_v24 = vmax.f32 %v540_v6, 0.0 }
 0x129   :  { %v7209_v42 = vpop.f32.mrb[36].mxu0 }
 0x12a   :  { %v552_v44 = vpop.f32.mrb[37].mxu0  ;;  %v561_v58 = vadd.f32 %v7209_v42, %v8543_v61 }
 0x12b   :  { %v7210_v45 = vpop.f32.mrb[38].mxu0  ;;  %v553_v29 = vadd.f32 %v8543_v61, %v552_v44 }
 0x12c   :  { %v555_v47 = vpop.f32.mrb[39].mxu0  ;;  %v564_v60 = vadd.f32 %v7210_v45, %v8543_v61  ;;  %v701_v44 = vmax.f32 %v561_v58, 0.0 }
 0x12d   :  { %v556_v41 = vadd.f32 %v8543_v61, %v555_v47  ;;  %v699_v45 = vmax.f32 %v553_v29, 0.0 }
 0x12e   :  { %v702_v6 = vmax.f32 %v564_v60, 0.0 }
 0x131   :  { %v8613_v49 = vpop.f32.mrb[40].mxu0 }
 0x132   :  { %v8615_v50 = vpop.f32.mrb[41].mxu0 }
 0x133   :  { %v8617_v51 = vpop.f32.mrb[42].mxu0 }
 0x134   :  { %v8619_v52 = vpop.f32.mrb[43].mxu0 }
 0x139   :  { %v8621_v62 = vpop.f32.mrb[44].mxu0 }
 0x13a   :  { %v8623_v63 = vpop.f32.mrb[45].mxu0 }
 0x13b   :  { %v8625_v0 = vpop.f32.mrb[46].mxu0 }
 0x13c   :  { %v8627_v1 = vpop.f32.mrb[47].mxu0 }
 0x141   :  { %v7221_v3 = vpop.f32.mrb[48].mxu0 }
 0x142   :  { %v609_v54 = vadd.f32 %v7221_v3, %v8543_v61  ;;  %v600_v5 = vpop.f32.mrb[49].mxu0 }
 0x143   :  { %v601_v55 = vadd.f32 %v8543_v61, %v600_v5  ;;  %v7222_v8 = vpop.f32.mrb[50].mxu0 }
 0x144   :  { %v713_v10 = vmax.f32 %v609_v54, 0.0  ;;  %v612_v12 = vadd.f32 %v7222_v8, %v8543_v61  ;;  %v603_v14 = vpop.f32.mrb[51].mxu0 }
 0x145   :  { %v711_v17 = vmax.f32 %v601_v55, 0.0  ;;  %v604_v19 = vadd.f32 %v8543_v61, %v603_v14 }
 0x146   :  { %v745_v22 = vmax.f32 %v697_v56, %v713_v10  ;;  %v714_v57 = vmax.f32 %v612_v12, 0.0  ;;  %v577_v10 = vadd.f32 %v8613_v49, %v8543_v61  ;;  %v572_v49 = vadd.f32 %v8543_v61, %v8619_v52 }
 0x147   :  { %v743_v25 = vmax.f32 %v695_v16, %v711_v17  ;;  %v712_v26 = vmax.f32 %v604_v19, 0.0  ;;  %v569_v16 = vadd.f32 %v8543_v61, %v8615_v50 }
 0x148   :  { %v761_v27 = vmax.f32 %v8553_v15, %v745_v22  ;;  %v746_v28 = vmax.f32 %v698_v20, %v714_v57  ;;  %v580_v22 = vadd.f32 %v8617_v51, %v8543_v61  ;;  %v705_v58 = vmax.f32 %v577_v10, 0.0 }
 0x149   :  { %v759_v30 = vmax.f32 %v8555_v18, %v743_v25  ;;  %v744_v31 = vmax.f32 %v696_v24, %v712_v26  ;;  %v7225_v32 = vpop.f32.mrb[52].mxu0  ;;  %v703_v29 = vmax.f32 %v569_v16, 0.0 }
 0x14a   :  { %v762_v36 = vmax.f32 %v8558_v21, %v746_v28  ;;  %v625_v38 = vadd.f32 %v7225_v32, %v8543_v61  ;;  %v616_v39 = vpop.f32.mrb[53].mxu0 }
 0x14b   :  { %v760_v42 = vmax.f32 %v8561_v23, %v744_v31  ;;  %v617_v15 = vadd.f32 %v8543_v61, %v616_v39  ;;  %v7226_v2 = vpop.f32.mrb[54].mxu0  ;;  %v700_v23 = vmax.f32 %v556_v41, 0.0  ;;  %v8051_v39 = vld [vmem:[%s9964_s3] sm:$0xff]   ;;  %v704_v41 = vmax.f32 %v572_v49, 0.0 }
 0x14c   :  { %v776_v53 = vpack.c.bf16 %v762_v36, %v761_v27  ;;  %v717_v18 = vmax.f32 %v625_v38, 0.0  ;;  %v628_v3 = vadd.f32 %v7226_v2, %v8543_v61  ;;  %v619_v4 = vpop.f32.mrb[55].mxu0 }
 0x14d   :  { %v775_v54 = vpack.c.bf16 %v760_v42, %v759_v30  ;;  %v715_v21 = vmax.f32 %v617_v15, 0.0  ;;  %v620_v5 = vadd.f32 %v8543_v61, %v619_v4  ;;  %v585_v4 = vadd.f32 %v8543_v61, %v8623_v63 }
 0x14e   :  { %785 = vst.msk [vmem:[#allocation2 + $0x8] sm:$0xff] %vm783_vm3, %v776_v53  ;;  %v749_v47 = vmax.f32 %v701_v44, %v717_v18  ;;  %v718_v55 = vmax.f32 %v628_v3, 0.0  ;;  %v8052_v44 = vld [vmem:[%s9964_s3 + $0x148] sm:$0xff]   ;;  %v593_v53 = vadd.f32 %v8621_v62, %v8543_v61 }
 0x14f   :  { %784 = vst.msk [vmem:[#allocation2] sm:$0xff] %vm783_vm3, %v775_v54  ;;  %v747_v8 = vmax.f32 %v699_v45, %v715_v21  ;;  %v716_v56 = vmax.f32 %v620_v5, 0.0  ;;  %v596_v5 = vadd.f32 %v8625_v0, %v8543_v61 }
 0x150   :  { %v765_v12 = vmax.f32 %v8569_v40, %v749_v47  ;;  %v750_v14 = vmax.f32 %v702_v6, %v718_v55  ;;  %v8053_v47 = vld [vmem:[%s9964_s3 + $0x8] sm:$0xff]   ;;  %v8054_v55 = vld [vmem:[%s9964_s3 + $0x150] sm:$0xff]  }
 0x151   :  { %v763_v17 = vmax.f32 %v8571_v43, %v747_v8  ;;  %v748_v19 = vmax.f32 %v700_v23, %v716_v56  ;;  %v7229_v20 = vpop.f32.mrb[56].mxu0  ;;  %v8050_v43 = vld [vmem:[%s9964_s3 + $0x140] sm:$0xff]   ;;  %v709_v23 = vmax.f32 %v593_v53, 0.0  ;;  %v8071_v53 = vld [vmem:[%s9964_s3 + $0x70] sm:$0xff]  }
 0x152   :  { %v766_v57 = vmax.f32 %v8574_v46, %v750_v14  ;;  %v641_v24 = vadd.f32 %v7229_v20, %v8543_v61  ;;  %v632_v25 = vpop.f32.mrb[57].mxu0 }
 0x153   :  { %v764_v40 = vmax.f32 %v8577_v48, %v748_v19  ;;  %v633_v26 = vadd.f32 %v8543_v61, %v632_v25  ;;  %v7230_v50 = vpop.f32.mrb[58].mxu0  ;;  %v706_v48 = vmax.f32 %v580_v22, 0.0  ;;  %v8055_v22 = vld [vmem:[%s9964_s3 + $0x10] sm:$0xff]  }
 0x154   :  { %v778_v27 = vpack.c.bf16 %v766_v57, %v765_v12  ;;  %v721_v51 = vmax.f32 %v641_v24, 0.0  ;;  %v644_v46 = vadd.f32 %v7230_v50, %v8543_v61  ;;  %v635_v28 = vpop.f32.mrb[59].mxu0 }
 0x155   :  { %v777_v30 = vpack.c.bf16 %v764_v40, %v763_v17  ;;  %v719_v31 = vmax.f32 %v633_v26, 0.0  ;;  %v636_v52 = vadd.f32 %v8543_v61, %v635_v28  ;;  %v1427_v32 = vld [vmem:[#allocation2 + $0x8] sm:$0x1]  ;;  %v710_v17 = vmax.f32 %v596_v5, 0.0  ;;  %v8075_v5 = vld [vmem:[%s9964_s3 + $0x80] sm:$0xff]  }
 0x156   :  { %787 = vst.msk [vmem:[#allocation2 + $0x18] sm:$0xff] %vm783_vm3, %v778_v27  ;;  %v753_v60 = vmax.f32 %v705_v58, %v721_v51  ;;  %v722_v36 = vmax.f32 %v644_v46, 0.0  ;;  %7340 = vmatmul.mubr.msk.bf16.vlgmr.msra.gmra.mrb[64].mxu0 %vm783_vm3, %v1427_v32  ;;  %v801_v38 = vld [vmem:[#allocation2] sm:$0x2]  ;;  %v8057_v27 = vld [vmem:[%s9964_s3 + $0x18] sm:$0xff]  }
 0x157   :  { %786 = vst.msk [vmem:[#allocation2 + $0x10] sm:$0xff] %vm783_vm3, %v777_v30  ;;  %v751_v42 = vmax.f32 %v703_v29, %v719_v31  ;;  %v720_v15 = vmax.f32 %v636_v52, 0.0  ;;  %7356 = vmatpush3.bf16.msra.mxu0 %v8050_v43  ;;  %v812_v2 = vrot.slane %v801_v38, 1  ;;  %7363 = vmatprep.mubr.msk.bf16.mxu0 %vm8325_vm2, %v8324_v37  ;;  %v1585_v43 = vld [vmem:[#allocation2 + $0x8] sm:$0x4]  ;;  %v8062_v31 = vld [vmem:[%s9964_s3 + $0x190] sm:$0xff]  }
 0x158   :  { %v769_v18 = vmax.f32 %v8585_v7, %v753_v60  ;;  %v754_v3 = vmax.f32 %v706_v48, %v722_v36  ;;  %7357 = vmatprep.subr.bf16.mxu0 %v8324_v37  ;;  %v792_v29 = vld [vmem:[#allocation2] sm:$0x1]  ;;  %v8061_v30 = vld [vmem:[%s9964_s3 + $0x48] sm:$0xff]   ;;  %v8063_v52 = vld [vmem:[%s9964_s3 + $0x50] sm:$0xff]  }
 0x159   :  { %v767_v45 = vmax.f32 %v8587_v9, %v751_v42  ;;  %v752_v54 = vmax.f32 %v704_v41, %v720_v15  ;;  %v7233_v21 = vpop.f32.mrb[60].mxu0  ;;  %7244 = vmatmul.mubr.msk.bf16.vlgmr.msra.gmra.mrb[0].mxu1 %vm783_vm3, %v812_v2  ;;  %v588_v9 = vadd.f32 %v8543_v61, %v8627_v1  ;;  %v707_v1 = vmax.f32 %v585_v4, 0.0  ;;  %v8064_v32 = vld [vmem:[%s9964_s3 + $0x198] sm:$0xff]   ;;  %v1745_v48 = vld [vmem:[#allocation2 + $0x8] sm:$0x10]  ;;  %v8066_v36 = vld [vmem:[%s9964_s3 + $0x1c0] sm:$0xff]  }
 0x15a   :  { %v770_v6 = vmax.f32 %v8591_v11, %v754_v3  ;;  %v657_v62 = vadd.f32 %v7233_v21, %v8543_v61  ;;  %7248 = vmatpush3.bf16.msra.mxu1 %v8051_v39  ;;  %v648_v7 = vpop.f32.mrb[61].mxu0  ;;  %7255 = vmatprep.mubr.msk.bf16.mxu1 %vm8325_vm2, %v8324_v37  ;;  %v8065_v60 = vld [vmem:[%s9964_s3 + $0x58] sm:$0xff]   ;;  %v1756_v38 = vrot.slane %v1745_v48, 4  ;;  %v947_v39 = vld [vmem:[#allocation2] sm:$0x4]  ;;  %v8068_v15 = vld [vmem:[%s9964_s3 + $0x1c8] sm:$0xff]  }
 0x15b   :  { %v768_v63 = vmax.f32 %v8595_v13, %v752_v54  ;;  %v649_v0 = vadd.f32 %v8543_v61, %v648_v7  ;;  %7358 = vmatpush3.bf16.msra.mxu0 %v8052_v44  ;;  %v7234_v11 = vpop.f32.mrb[62].mxu0  ;;  %7249 = vmatprep.subr.bf16.mxu1 %v8324_v37  ;;  %v708_v57 = vmax.f32 %v588_v9, 0.0  ;;  %v8067_v41 = vld [vmem:[%s9964_s3 + $0x60] sm:$0xff]   ;;  %v958_v42 = vrot.slane %v947_v39, 2  ;;  %v8069_v2 = vld [vmem:[%s9964_s3 + $0x68] sm:$0xff]   ;;  %v8070_v44 = vld [vmem:[%s9964_s3 + $0x1d0] sm:$0xff]  }
 0x15c   :  { %v780_v8 = vpack.c.bf16 %v770_v6, %v769_v18  ;;  %v725_v56 = vmax.f32 %v657_v62, 0.0  ;;  %v660_v10 = vadd.f32 %v7234_v11, %v8543_v61  ;;  %v651_v12 = vpop.f32.mrb[63].mxu0  ;;  %7359 = vmatprep.subr.bf16.mxu0 %v8324_v37  ;;  %v8072_v18 = vld [vmem:[%s9964_s3 + $0x1d8] sm:$0xff]   ;;  %v1905_v3 = vld [vmem:[#allocation2 + $0x8] sm:$0x40]  ;;  %v8079_v9 = vld [vmem:[%s9964_s3 + $0x90] sm:$0xff]  }
 0x15d   :  { %v779_v13 = vpack.c.bf16 %v768_v63, %v767_v45  ;;  %v723_v14 = vmax.f32 %v649_v0, 0.0  ;;  %v652_v16 = vadd.f32 %v8543_v61, %v651_v12  ;;  %v8056_v61 = vld [vmem:[%s9964_s3 + $0x158] sm:$0xff]   ;;  %v8074_v45 = vld [vmem:[%s9964_s3 + $0x200] sm:$0xff]   ;;  %v1916_v54 = vrot.slane %v1905_v3, 6  ;;  %v8076_v62 = vld [vmem:[%s9964_s3 + $0x208] sm:$0xff]  }
 0x15e   :  { %789 = vst.msk [vmem:[#allocation2 + $0x28] sm:$0xff] %vm783_vm3, %v780_v8  ;;  %v757_v19 = vmax.f32 %v709_v23, %v725_v56  ;;  %v726_v20 = vmax.f32 %v660_v10, 0.0  ;;  %7250 = vmatpush3.bf16.msra.mxu1 %v8053_v47  ;;  %v8073_v4 = vld [vmem:[%s9964_s3 + $0x78] sm:$0xff]   ;;  %v1027_v21 = vld [vmem:[#allocation2] sm:$0x8]  ;;  %v8077_v7 = vld [vmem:[%s9964_s3 + $0x88] sm:$0xff]  }
 0x15f   :  { %788 = vst.msk [vmem:[#allocation2 + $0x20] sm:$0xff] %vm783_vm3, %v779_v13  ;;  %v755_v24 = vmax.f32 %v707_v1, %v723_v14  ;;  %v724_v25 = vmax.f32 %v652_v16, 0.0  ;;  %7360 = vmatpush3.bf16.msra.mxu0 %v8054_v55  ;;  %7251 = vmatprep.subr.bf16.mxu1 %v8324_v37  ;;  %v1038_v6 = vrot.slane %v1027_v21, 3  ;;  %v8078_v47 = vld [vmem:[%s9964_s3 + $0x210] sm:$0xff]   ;;  %v8080_v63 = vld [vmem:[%s9964_s3 + $0x218] sm:$0xff]   ;;  %v8082_v11 = vld [vmem:[%s9964_s3 + $0x240] sm:$0xff]  }
 0x160   :  { %v773_v49 = vmax.f32 %v8605_v59, %v757_v19  ;;  %v758_v40 = vmax.f32 %v710_v17, %v726_v20  ;;  %7361 = vmatprep.subr.bf16.mxu0 %v8324_v37  ;;  %v8058_v59 = vld [vmem:[%s9964_s3 + $0x180] sm:$0xff]   ;;  %v8081_v0 = vld [vmem:[%s9964_s3 + $0x98] sm:$0xff]   ;;  %v2065_v23 = vld [vmem:[#allocation2 + $0x10] sm:$0x1] }
 0x161   :  { %v771_v26 = vmax.f32 %v8607_v33, %v755_v24  ;;  %v756_v50 = vmax.f32 %v708_v57, %v724_v25  ;;  %v1596_v33 = vrot.slane %v1585_v43, 2  ;;  %v1107_v55 = vld [vmem:[#allocation2] sm:$0x10]  ;;  %v8084_v10 = vld [vmem:[%s9964_s3 + $0x248] sm:$0xff]   ;;  %v8086_v1 = vld [vmem:[%s9964_s3 + $0x250] sm:$0xff]  }
 0x162   :  { %v774_v58 = vmax.f32 %v8609_v34, %v758_v40  ;;  %7252 = vmatpush3.bf16.msra.mxu1 %v8055_v22  ;;  %v8059_v34 = vld [vmem:[%s9964_s3 + $0x40] sm:$0xff]   ;;  %v1118_v56 = vrot.slane %v1107_v55, 4  ;;  %v8085_v12 = vld [vmem:[%s9964_s3 + $0xa8] sm:$0xff]   ;;  %v8087_v13 = vld [vmem:[%s9964_s3 + $0xb0] sm:$0xff]  }
 0x163   :  { %v772_v51 = vmax.f32 %v8611_v35, %v756_v50  ;;  %7362 = vmatpush3.bf16.msra.mxu0 %v8056_v61  ;;  %7253 = vmatprep.subr.bf16.mxu1 %v8324_v37  ;;  %v8060_v35 = vld [vmem:[%s9964_s3 + $0x188] sm:$0xff]   ;;  %v8083_v8 = vld [vmem:[%s9964_s3 + $0xa0] sm:$0xff]   ;;  %v8088_v14 = vld [vmem:[%s9964_s3 + $0x258] sm:$0xff]  }
 0x164   :  { %v782_v46 = vpack.c.bf16 %v774_v58, %v773_v49  ;;  %7379 = vmatprep.subr.bf16.mxu0 %v8324_v37  ;;  %v2223_v16 = vld [vmem:[#allocation2 + $0x10] sm:$0x4]  ;;  %v8089_v17 = vld [vmem:[%s9964_s3 + $0xb8] sm:$0xff]   ;;  %v8090_v19 = vld [vmem:[%s9964_s3 + $0x280] sm:$0xff]  }
 0x165   :  { %v781_v28 = vpack.c.bf16 %v772_v51, %v771_v26  ;;  %v2234_v20 = vrot.slane %v2223_v16, 2  ;;  %v1187_v22 = vld [vmem:[#allocation2] sm:$0x20]  ;;  %v8092_v25 = vld [vmem:[%s9964_s3 + $0x288] sm:$0xff]   ;;  %v8094_v49 = vld [vmem:[%s9964_s3 + $0x290] sm:$0xff]  }
 0x166   :  { %791 = vst.msk [vmem:[#allocation2 + $0x38] sm:$0xff] %vm783_vm3, %v782_v46  ;;  %7254 = vmatpush3.bf16.msra.mxu1 %v8057_v27  ;;  %7364 = vmatmul.mubr.msk.bf16.vlgmr.msra.gmra.mrb[68].mxu0 %vm783_vm3, %v1596_v33  ;;  %v8091_v57 = vld [vmem:[%s9964_s3 + $0xc0] sm:$0xff]   ;;  %v1198_v24 = vrot.slane %v1187_v22, 5  ;;  %v8093_v61 = vld [vmem:[%s9964_s3 + $0xc8] sm:$0xff]   ;;  %v8095_v40 = vld [vmem:[%s9964_s3 + $0xd0] sm:$0xff]  }
 0x167   :  { %790 = vst.msk [vmem:[#allocation2 + $0x30] sm:$0xff] %vm783_vm3, %v781_v28  ;;  %7380 = vmatpush3.bf16.msra.mxu0 %v8058_v59  ;;  %7259 = vmatprep.subr.bf16.mxu1 %v8324_v37  ;;  %v8096_v26 = vld [vmem:[%s9964_s3 + $0x298] sm:$0xff]   ;;  %v2383_v50 = vld [vmem:[#allocation2 + $0x10] sm:$0x10]  ;;  %v8098_v58 = vld [vmem:[%s9964_s3 + $0x2c0] sm:$0xff]  }
 0x168   :  { %7381 = vmatprep.subr.bf16.mxu0 %v8324_v37  ;;  %7387 = vmatprep.mubr.msk.bf16.mxu0 %vm8325_vm2, %v8324_v37  ;;  %v8097_v43 = vld [vmem:[%s9964_s3 + $0xd8] sm:$0xff]   ;;  %v2394_v27 = vrot.slane %v2383_v50, 4  ;;  %v1267_v51 = vld [vmem:[#allocation2] sm:$0x40]  ;;  %v8100_v33 = vld [vmem:[%s9964_s3 + $0x2c8] sm:$0xff]  }
 0x169   :  { %7256 = vmatmul.mubr.msk.bf16.vlgmr.msra.gmra.mrb[4].mxu1 %vm783_vm3, %v792_v29  ;;  %v8099_v59 = vld [vmem:[%s9964_s3 + $0xe0] sm:$0xff]   ;;  %v1278_v46 = vrot.slane %v1267_v51, 6  ;;  %v8101_v28 = vld [vmem:[%s9964_s3 + $0xe8] sm:$0xff]   ;;  %v8104_v29 = vld [vmem:[%s9964_s3 + $0x2d8] sm:$0xff]  }
 0x16a   :  { %7260 = vmatpush3.bf16.msra.mxu1 %v8059_v34  ;;  %7267 = vmatprep.mubr.msk.bf16.mxu1 %vm8325_vm2, %v8324_v37  ;;  %v8102_v34 = vld [vmem:[%s9964_s3 + $0x2d0] sm:$0xff]   ;;  %v1347_v48 = vld [vmem:[#allocation2] sm:$0x80]  ;;  %v8109_v39 = vld [vmem:[%s9964_s3 + $0x128] sm:$0xff]  }
 0x16b   :  { %7382 = vmatpush3.bf16.msra.mxu0 %v8060_v35  ;;  %7261 = vmatprep.subr.bf16.mxu1 %v8324_v37  ;;  %v8103_v35 = vld [vmem:[%s9964_s3 + $0xf0] sm:$0xff]   ;;  %v8115_v3 = vld [vmem:[%s9964_s3 + $0x160] sm:$0xff]   ;;  %v8124_v55 = vld [vmem:[%s9964_s3 + $0x388] sm:$0xff]  }
 0x16c   :  { %7383 = vmatprep.subr.bf16.mxu0 %v8324_v37  ;;  %v8118_v21 = vld [vmem:[%s9964_s3 + $0x350] sm:$0xff]   ;;  %v1825_v16 = vld [vmem:[#allocation2 + $0x8] sm:$0x20]  ;;  %v1985_v50 = vld [vmem:[#allocation2 + $0x8] sm:$0x80] }
 0x16d   :  { %v8133_v22 = vld [vmem:[%s9964_s3 + $0x1e8] sm:$0xff]  }
 0x16e   :  { %7262 = vmatpush3.bf16.msra.mxu1 %v8061_v30  ;;  %v2543_v30 = vld [vmem:[#allocation2 + $0x10] sm:$0x40]  ;;  %v8141_v51 = vld [vmem:[%s9964_s3 + $0x228] sm:$0xff]  }
 0x16f   :  { %7384 = vmatpush3.bf16.msra.mxu0 %v8062_v31  ;;  %7263 = vmatprep.subr.bf16.mxu1 %v8324_v37  ;;  %v8105_v31 = vld [vmem:[%s9964_s3 + $0xf8] sm:$0xff]  }
 0x170   :  { %7385 = vmatprep.subr.bf16.mxu0 %v8324_v37 }
 0x172   :  { %7264 = vmatpush3.bf16.msra.mxu1 %v8063_v52  ;;  %v8106_v52 = vld [vmem:[%s9964_s3 + $0x300] sm:$0xff]  }
 0x173   :  { %7386 = vmatpush3.bf16.msra.mxu0 %v8064_v32  ;;  %7265 = vmatprep.subr.bf16.mxu1 %v8324_v37  ;;  %v2554_v32 = vrot.slane %v2543_v30, 6  ;;  %v8147_v30 = vld [vmem:[%s9964_s3 + $0x260] sm:$0xff]  }
 0x174   :  { %7403 = vmatprep.subr.bf16.mxu0 %v8324_v37 }
 0x176   :  { %7266 = vmatpush3.bf16.msra.mxu1 %v8065_v60  ;;  %7388 = vmatmul.mubr.msk.bf16.vlgmr.msra.gmra.mrb[72].mxu0 %vm783_vm3, %v1756_v38  ;;  %v8107_v60 = vld [vmem:[%s9964_s3 + $0x120] sm:$0xff]   ;;  %v8108_v38 = vld [vmem:[%s9964_s3 + $0x308] sm:$0xff]  }
 0x177   :  { %7404 = vmatpush3.bf16.msra.mxu0 %v8066_v36  ;;  %7271 = vmatprep.subr.bf16.mxu1 %v8324_v37  ;;  %v1358_v36 = vrot.slane %v1347_v48, 7  ;;  %v8150_v48 = vld [vmem:[%s9964_s3 + $0x450] sm:$0xff]  }
 0x178   :  { %7405 = vmatprep.subr.bf16.mxu0 %v8324_v37  ;;  %7411 = vmatprep.mubr.msk.bf16.mxu0 %vm8325_vm2, %v8324_v37 }
 0x179   :  { %7268 = vmatmul.mubr.msk.bf16.vlgmr.msra.gmra.mrb[8].mxu1 %vm783_vm3, %v958_v42  ;;  %v8111_v42 = vld [vmem:[%s9964_s3 + $0x130] sm:$0xff]  }
 0x17a   :  { %7272 = vmatpush3.bf16.msra.mxu1 %v8067_v41  ;;  %7279 = vmatprep.mubr.msk.bf16.mxu1 %vm8325_vm2, %v8324_v37  ;;  %v8110_v41 = vld [vmem:[%s9964_s3 + $0x310] sm:$0xff]  }
 0x17b   :  { %7406 = vmatpush3.bf16.msra.mxu0 %v8068_v15  ;;  %7273 = vmatprep.subr.bf16.mxu1 %v8324_v37  ;;  %v8112_v15 = vld [vmem:[%s9964_s3 + $0x318] sm:$0xff]  }
 0x17c   :  { %7407 = vmatprep.subr.bf16.mxu0 %v8324_v37 }
 0x17e   :  { %7274 = vmatpush3.bf16.msra.mxu1 %v8069_v2  ;;  %v8113_v2 = vld [vmem:[%s9964_s3 + $0x138] sm:$0xff]  }
 0x17f   :  { %7408 = vmatpush3.bf16.msra.mxu0 %v8070_v44  ;;  %7275 = vmatprep.subr.bf16.mxu1 %v8324_v37  ;;  %v8114_v44 = vld [vmem:[%s9964_s3 + $0x340] sm:$0xff]  }
 0x180   :  { %7409 = vmatprep.subr.bf16.mxu0 %v8324_v37 }
 0x182   :  { %7276 = vmatpush3.bf16.msra.mxu1 %v8071_v53  ;;  %v1505_v53 = vld [vmem:[#allocation2 + $0x8] sm:$0x2] }
 0x183   :  { %7410 = vmatpush3.bf16.msra.mxu0 %v8072_v18  ;;  %7277 = vmatprep.subr.bf16.mxu1 %v8324_v37  ;;  %v2703_v18 = vld [vmem:[#allocation2 + $0x18] sm:$0x1] }
 0x184   :  { %7427 = vmatprep.subr.bf16.mxu0 %v8324_v37 }
 0x186   :  { %7278 = vmatpush3.bf16.msra.mxu1 %v8073_v4  ;;  %7412 = vmatmul.mubr.msk.bf16.vlgmr.msra.gmra.mrb[76].mxu0 %vm783_vm3, %v1916_v54  ;;  %v1516_v4 = vrot.slane %v1505_v53, 1  ;;  %v8117_v54 = vld [vmem:[%s9964_s3 + $0x168] sm:$0xff]  }
 0x187   :  { %7428 = vmatpush3.bf16.msra.mxu0 %v8074_v45  ;;  %7283 = vmatprep.subr.bf16.mxu1 %v8324_v37  ;;  %v8116_v45 = vld [vmem:[%s9964_s3 + $0x348] sm:$0xff]  }
 0x188   :  { %7429 = vmatprep.subr.bf16.mxu0 %v8324_v37  ;;  %7435 = vmatprep.mubr.msk.bf16.mxu0 %vm8325_vm2, %v8324_v37  ;;  %v8156_v53 = vld [vmem:[%s9964_s3 + $0x488] sm:$0xff]  }
 0x189   :  { %7280 = vmatmul.mubr.msk.bf16.vlgmr.msra.gmra.mrb[12].mxu1 %vm783_vm3, %v1038_v6  ;;  %v8120_v6 = vld [vmem:[%s9964_s3 + $0x358] sm:$0xff]  }
 0x18a   :  { %7284 = vmatpush3.bf16.msra.mxu1 %v8075_v5  ;;  %7291 = vmatprep.mubr.msk.bf16.mxu1 %vm8325_vm2, %v8324_v37  ;;  %v8119_v5 = vld [vmem:[%s9964_s3 + $0x170] sm:$0xff]  }
 0x18b   :  { %7430 = vmatpush3.bf16.msra.mxu0 %v8076_v62  ;;  %7285 = vmatprep.subr.bf16.mxu1 %v8324_v37  ;;  %v2861_v62 = vld [vmem:[#allocation2 + $0x18] sm:$0x4] }
 0x18c   :  { %7431 = vmatprep.subr.bf16.mxu0 %v8324_v37 }
 0x18e   :  { %7286 = vmatpush3.bf16.msra.mxu1 %v8077_v7  ;;  %v8121_v7 = vld [vmem:[%s9964_s3 + $0x178] sm:$0xff]  }
 0x18f   :  { %7432 = vmatpush3.bf16.msra.mxu0 %v8078_v47  ;;  %7287 = vmatprep.subr.bf16.mxu1 %v8324_v37  ;;  %v8122_v47 = vld [vmem:[%s9964_s3 + $0x380] sm:$0xff]  }
 0x190   :  { %7433 = vmatprep.subr.bf16.mxu0 %v8324_v37 }
 0x192   :  { %7288 = vmatpush3.bf16.msra.mxu1 %v8079_v9  ;;  %v2872_v9 = vrot.slane %v2861_v62, 2 }
 0x193   :  { %7434 = vmatpush3.bf16.msra.mxu0 %v8080_v63  ;;  %7289 = vmatprep.subr.bf16.mxu1 %v8324_v37  ;;  %v1665_v63 = vld [vmem:[#allocation2 + $0x8] sm:$0x8] }
 0x194   :  { %7451 = vmatprep.subr.bf16.mxu0 %v8324_v37 }
 0x196   :  { %7290 = vmatpush3.bf16.msra.mxu1 %v8081_v0  ;;  %7436 = vmatmul.mubr.msk.bf16.vlgmr.msra.gmra.mrb[80].mxu0 %vm783_vm3, %v2065_v23  ;;  %v8123_v0 = vld [vmem:[%s9964_s3 + $0x1a0] sm:$0xff]   ;;  %v8125_v23 = vld [vmem:[%s9964_s3 + $0x1a8] sm:$0xff]  }
 0x197   :  { %7452 = vmatpush3.bf16.msra.mxu0 %v8082_v11  ;;  %7295 = vmatprep.subr.bf16.mxu1 %v8324_v37  ;;  %v1676_v11 = vrot.slane %v1665_v63, 3  ;;  %v3659_v63 = vld [vmem:[#allocation2 + $0x20] sm:$0x10] }
 0x198   :  { %7453 = vmatprep.subr.bf16.mxu0 %v8324_v37  ;;  %7459 = vmatprep.mubr.msk.bf16.mxu0 %vm8325_vm2, %v8324_v37 }
 0x199   :  { %7292 = vmatmul.mubr.msk.bf16.vlgmr.msra.gmra.mrb[16].mxu1 %vm783_vm3, %v1118_v56  ;;  %v8127_v56 = vld [vmem:[%s9964_s3 + $0x1b0] sm:$0xff]  }
 0x19a   :  { %7296 = vmatpush3.bf16.msra.mxu1 %v8083_v8  ;;  %7303 = vmatprep.mubr.msk.bf16.mxu1 %vm8325_vm2, %v8324_v37  ;;  %v8126_v8 = vld [vmem:[%s9964_s3 + $0x390] sm:$0xff]  }
 0x19b   :  { %7454 = vmatpush3.bf16.msra.mxu0 %v8084_v10  ;;  %7297 = vmatprep.subr.bf16.mxu1 %v8324_v37  ;;  %v8128_v10 = vld [vmem:[%s9964_s3 + $0x398] sm:$0xff]  }
 0x19c   :  { %7455 = vmatprep.subr.bf16.mxu0 %v8324_v37 }
 0x19e   :  { %7298 = vmatpush3.bf16.msra.mxu1 %v8085_v12  ;;  %v3021_v12 = vld [vmem:[#allocation2 + $0x18] sm:$0x10] }
 0x19f   :  { %7456 = vmatpush3.bf16.msra.mxu0 %v8086_v1  ;;  %7299 = vmatprep.subr.bf16.mxu1 %v8324_v37  ;;  %v8129_v1 = vld [vmem:[%s9964_s3 + $0x1b8] sm:$0xff]  }
 0x1a0   :  { %7457 = vmatprep.subr.bf16.mxu0 %v8324_v37 }
 0x1a2   :  { %7300 = vmatpush3.bf16.msra.mxu1 %v8087_v13  ;;  %v8130_v13 = vld [vmem:[%s9964_s3 + $0x3c0] sm:$0xff]  }
 0x1a3   :  { %7458 = vmatpush3.bf16.msra.mxu0 %v8088_v14  ;;  %7301 = vmatprep.subr.bf16.mxu1 %v8324_v37  ;;  %v3032_v14 = vrot.slane %v3021_v12, 4 }
 0x1a4   :  { %7475 = vmatprep.subr.bf16.mxu0 %v8324_v37 }
 0x1a6   :  { %7302 = vmatpush3.bf16.msra.mxu1 %v8089_v17  ;;  %7460 = vmatmul.mubr.msk.bf16.vlgmr.msra.gmra.mrb[84].mxu0 %vm783_vm3, %v2234_v20  ;;  %v8131_v17 = vld [vmem:[%s9964_s3 + $0x1e0] sm:$0xff]   ;;  %v8132_v20 = vld [vmem:[%s9964_s3 + $0x3c8] sm:$0xff]  }
 0x1a7   :  { %7476 = vmatpush3.bf16.msra.mxu0 %v8090_v19  ;;  %7307 = vmatprep.subr.bf16.mxu1 %v8324_v37  ;;  %v1836_v19 = vrot.slane %v1825_v16, 5  ;;  %v8166_v16 = vld [vmem:[%s9964_s3 + $0x4d0] sm:$0xff]  }
 0x1a8   :  { %7477 = vmatprep.subr.bf16.mxu0 %v8324_v37  ;;  %7483 = vmatprep.mubr.msk.bf16.mxu0 %vm8325_vm2, %v8324_v37 }
 0x1a9   :  { %7304 = vmatmul.mubr.msk.bf16.vlgmr.msra.gmra.mrb[20].mxu1 %vm783_vm3, %v1198_v24  ;;  %v8135_v24 = vld [vmem:[%s9964_s3 + $0x1f0] sm:$0xff]  }
 0x1aa   :  { %7308 = vmatpush3.bf16.msra.mxu1 %v8091_v57  ;;  %7315 = vmatprep.mubr.msk.bf16.mxu1 %vm8325_vm2, %v8324_v37  ;;  %v8134_v57 = vld [vmem:[%s9964_s3 + $0x3d0] sm:$0xff]  }
 0x1ab   :  { %7478 = vmatpush3.bf16.msra.mxu0 %v8092_v25  ;;  %7309 = vmatprep.subr.bf16.mxu1 %v8324_v37  ;;  %v8136_v25 = vld [vmem:[%s9964_s3 + $0x3d8] sm:$0xff]  }
 0x1ac   :  { %7479 = vmatprep.subr.bf16.mxu0 %v8324_v37 }
 0x1ae   :  { %7310 = vmatpush3.bf16.msra.mxu1 %v8093_v61  ;;  %v3181_v61 = vld [vmem:[#allocation2 + $0x18] sm:$0x40] }
 0x1af   :  { %7480 = vmatpush3.bf16.msra.mxu0 %v8094_v49  ;;  %7311 = vmatprep.subr.bf16.mxu1 %v8324_v37  ;;  %v8137_v49 = vld [vmem:[%s9964_s3 + $0x1f8] sm:$0xff]  }
 0x1b0   :  { %7481 = vmatprep.subr.bf16.mxu0 %v8324_v37 }
 0x1b2   :  { %7312 = vmatpush3.bf16.msra.mxu1 %v8095_v40  ;;  %v8138_v40 = vld [vmem:[%s9964_s3 + $0x400] sm:$0xff]  }
 0x1b3   :  { %7482 = vmatpush3.bf16.msra.mxu0 %v8096_v26  ;;  %7313 = vmatprep.subr.bf16.mxu1 %v8324_v37  ;;  %v3192_v26 = vrot.slane %v3181_v61, 6  ;;  %v8168_v61 = vld [vmem:[%s9964_s3 + $0x4d8] sm:$0xff]  }
 0x1b4   :  { %7499 = vmatprep.subr.bf16.mxu0 %v8324_v37 }
 0x1b6   :  { %7314 = vmatpush3.bf16.msra.mxu1 %v8097_v43  ;;  %7484 = vmatmul.mubr.msk.bf16.vlgmr.msra.gmra.mrb[88].mxu0 %vm783_vm3, %v2394_v27  ;;  %v8139_v43 = vld [vmem:[%s9964_s3 + $0x220] sm:$0xff]   ;;  %v8140_v27 = vld [vmem:[%s9964_s3 + $0x408] sm:$0xff]  }
 0x1b7   :  { %7500 = vmatpush3.bf16.msra.mxu0 %v8098_v58  ;;  %7319 = vmatprep.subr.bf16.mxu1 %v8324_v37  ;;  %v1996_v58 = vrot.slane %v1985_v50, 7 }
 0x1b8   :  { %7501 = vmatprep.subr.bf16.mxu0 %v8324_v37  ;;  %7507 = vmatprep.mubr.msk.bf16.mxu0 %vm8325_vm2, %v8324_v37 }
 0x1b9   :  { %7316 = vmatmul.mubr.msk.bf16.vlgmr.msra.gmra.mrb[24].mxu1 %vm783_vm3, %v1278_v46  ;;  %v8143_v46 = vld [vmem:[%s9964_s3 + $0x230] sm:$0xff]  }
 0x1ba   :  { %7320 = vmatpush3.bf16.msra.mxu1 %v8099_v59  ;;  %7327 = vmatprep.mubr.msk.bf16.mxu1 %vm8325_vm2, %v8324_v37  ;;  %v8142_v59 = vld [vmem:[%s9964_s3 + $0x410] sm:$0xff]  }
 0x1bb   :  { %7502 = vmatpush3.bf16.msra.mxu0 %v8100_v33  ;;  %7321 = vmatprep.subr.bf16.mxu1 %v8324_v37  ;;  %v8144_v33 = vld [vmem:[%s9964_s3 + $0x418] sm:$0xff]  }
 0x1bc   :  { %7503 = vmatprep.subr.bf16.mxu0 %v8324_v37 }
 0x1be   :  { %7322 = vmatpush3.bf16.msra.mxu1 %v8101_v28  ;;  %v8145_v28 = vld [vmem:[%s9964_s3 + $0x238] sm:$0xff]  }
 0x1bf   :  { %7504 = vmatpush3.bf16.msra.mxu0 %v8102_v34  ;;  %7323 = vmatprep.subr.bf16.mxu1 %v8324_v37  ;;  %v8146_v34 = vld [vmem:[%s9964_s3 + $0x440] sm:$0xff]  }
 0x1c0   :  { %7505 = vmatprep.subr.bf16.mxu0 %v8324_v37 }
 0x1c2   :  { %7324 = vmatpush3.bf16.msra.mxu1 %v8103_v35  ;;  %v2143_v35 = vld [vmem:[#allocation2 + $0x10] sm:$0x2] }
 0x1c3   :  { %7506 = vmatpush3.bf16.msra.mxu0 %v8104_v29  ;;  %7325 = vmatprep.subr.bf16.mxu1 %v8324_v37  ;;  %v3341_v29 = vld [vmem:[#allocation2 + $0x20] sm:$0x1] }
 0x1c4   :  { %7523 = vmatprep.subr.bf16.mxu0 %v8324_v37 }
 0x1c6   :  { %7326 = vmatpush3.bf16.msra.mxu1 %v8105_v31  ;;  %7508 = vmatmul.mubr.msk.bf16.vlgmr.msra.gmra.mrb[92].mxu0 %vm783_vm3, %v2554_v32  ;;  %v2154_v31 = vrot.slane %v2143_v35, 1  ;;  %v8149_v32 = vld [vmem:[%s9964_s3 + $0x268] sm:$0xff]  }
 0x1c7   :  { %7524 = vmatpush3.bf16.msra.mxu0 %v8106_v52  ;;  %7343 = vmatprep.subr.bf16.mxu1 %v8324_v37  ;;  %v8148_v52 = vld [vmem:[%s9964_s3 + $0x448] sm:$0xff]  }
 0x1c8   :  { %7525 = vmatprep.subr.bf16.mxu0 %v8324_v37  ;;  %7531 = vmatprep.mubr.msk.bf16.mxu0 %vm8325_vm2, %v8324_v37 }
 0x1c9   :  { %7328 = vmatmul.mubr.msk.bf16.vlgmr.msra.gmra.mrb[28].mxu1 %vm783_vm3, %v1358_v36  ;;  %v8152_v36 = vld [vmem:[%s9964_s3 + $0x458] sm:$0xff]  }
 0x1ca   :  { %7344 = vmatpush3.bf16.msra.mxu1 %v8107_v60  ;;  %7351 = vmatprep.mubr.msk.bf16.mxu1 %vm8325_vm2, %v8324_v37  ;;  %v8151_v60 = vld [vmem:[%s9964_s3 + $0x270] sm:$0xff]  }
 0x1cb   :  { %7526 = vmatpush3.bf16.msra.mxu0 %v8108_v38  ;;  %7345 = vmatprep.subr.bf16.mxu1 %v8324_v37  ;;  %v3499_v38 = vld [vmem:[#allocation2 + $0x20] sm:$0x4] }
 0x1cc   :  { %7527 = vmatprep.subr.bf16.mxu0 %v8324_v37 }
 0x1ce   :  { %7346 = vmatpush3.bf16.msra.mxu1 %v8109_v39  ;;  %v8153_v39 = vld [vmem:[%s9964_s3 + $0x278] sm:$0xff]  }
 0x1cf   :  { %7528 = vmatpush3.bf16.msra.mxu0 %v8110_v41  ;;  %7347 = vmatprep.subr.bf16.mxu1 %v8324_v37  ;;  %v8154_v41 = vld [vmem:[%s9964_s3 + $0x480] sm:$0xff]  }
 0x1d0   :  { %7529 = vmatprep.subr.bf16.mxu0 %v8324_v37 }
 0x1d2   :  { %7348 = vmatpush3.bf16.msra.mxu1 %v8111_v42  ;;  %v3510_v42 = vrot.slane %v3499_v38, 2  ;;  %v8178_v38 = vld [vmem:[%s9964_s3 + $0x540] sm:$0xff]  }
 0x1d3   :  { %7530 = vmatpush3.bf16.msra.mxu0 %v8112_v15  ;;  %7349 = vmatprep.subr.bf16.mxu1 %v8324_v37  ;;  %v2303_v15 = vld [vmem:[#allocation2 + $0x10] sm:$0x8] }
 0x1d4   :  { %7547 = vmatprep.subr.bf16.mxu0 %v8324_v37 }
 0x1d6   :  { %7350 = vmatpush3.bf16.msra.mxu1 %v8113_v2  ;;  %7532 = vmatmul.mubr.msk.bf16.vlgmr.msra.gmra.mrb[96].mxu0 %vm783_vm3, %v2703_v18  ;;  %v8155_v2 = vld [vmem:[%s9964_s3 + $0x2a0] sm:$0xff]  }
 0x1d7   :  { %7548 = vmatpush3.bf16.msra.mxu0 %v8114_v44  ;;  %7367 = vmatprep.subr.bf16.mxu1 %v8324_v37  ;;  %v2314_v44 = vrot.slane %v2303_v15, 3 }
 0x1d8   :  { %7549 = vmatprep.subr.bf16.mxu0 %v8324_v37  ;;  %7555 = vmatprep.mubr.msk.bf16.mxu0 %vm8325_vm2, %v8324_v37 }
 0x1d9   :  { %7352 = vmatmul.mubr.msk.bf16.vlgmr.msra.gmra.mrb[32].mxu1 %vm783_vm3, %v1516_v4  ;;  %v8157_v4 = vld [vmem:[%s9964_s3 + $0x2a8] sm:$0xff]  }
 0x1da   :  { %7368 = vmatpush3.bf16.msra.mxu1 %v8115_v3  ;;  %7375 = vmatprep.mubr.msk.bf16.mxu1 %vm8325_vm2, %v8324_v37 }
 0x1db   :  { %7550 = vmatpush3.bf16.msra.mxu0 %v8116_v45  ;;  %7369 = vmatprep.subr.bf16.mxu1 %v8324_v37 }
 0x1dc   :  { %7551 = vmatprep.subr.bf16.mxu0 %v8324_v37 }
 0x1de   :  { %7370 = vmatpush3.bf16.msra.mxu1 %v8117_v54  ;;  %v8158_v54 = vld [vmem:[%s9964_s3 + $0x490] sm:$0xff]  }
 0x1df   :  { %7552 = vmatpush3.bf16.msra.mxu0 %v8118_v21  ;;  %7371 = vmatprep.subr.bf16.mxu1 %v8324_v37 }
 0x1e0   :  { %7553 = vmatprep.subr.bf16.mxu0 %v8324_v37 }
 0x1e2   :  { %7372 = vmatpush3.bf16.msra.mxu1 %v8119_v5 }
 0x1e3   :  { %7554 = vmatpush3.bf16.msra.mxu0 %v8120_v6  ;;  %7373 = vmatprep.subr.bf16.mxu1 %v8324_v37 }
 0x1e4   :  { %7571 = vmatprep.subr.bf16.mxu0 %v8324_v37 }
 0x1e6   :  { %7374 = vmatpush3.bf16.msra.mxu1 %v8121_v7  ;;  %7556 = vmatmul.mubr.msk.bf16.vlgmr.msra.gmra.mrb[100].mxu0 %vm783_vm3, %v2872_v9  ;;  %v8159_v7 = vld [vmem:[%s9964_s3 + $0x2b0] sm:$0xff]   ;;  %v8160_v9 = vld [vmem:[%s9964_s3 + $0x498] sm:$0xff]  }
 0x1e7   :  { %7572 = vmatpush3.bf16.msra.mxu0 %v8122_v47  ;;  %7391 = vmatprep.subr.bf16.mxu1 %v8324_v37 }
 0x1e8   :  { %7573 = vmatprep.subr.bf16.mxu0 %v8324_v37  ;;  %7579 = vmatprep.mubr.msk.bf16.mxu0 %vm8325_vm2, %v8324_v37 }
 0x1e9   :  { %7376 = vmatmul.mubr.msk.bf16.vlgmr.msra.gmra.mrb[36].mxu1 %vm783_vm3, %v1676_v11  ;;  %v8162_v11 = vld [vmem:[%s9964_s3 + $0x4c0] sm:$0xff]  }
 0x1ea   :  { %7392 = vmatpush3.bf16.msra.mxu1 %v8123_v0  ;;  %7399 = vmatprep.mubr.msk.bf16.mxu1 %vm8325_vm2, %v8324_v37  ;;  %v8161_v0 = vld [vmem:[%s9964_s3 + $0x2b8] sm:$0xff]  }
 0x1eb   :  { %7574 = vmatpush3.bf16.msra.mxu0 %v8124_v55  ;;  %7393 = vmatprep.subr.bf16.mxu1 %v8324_v37  ;;  %v3670_v55 = vrot.slane %v3659_v63, 4  ;;  %v4137_v63 = vld [vmem:[#allocation2 + $0x28] sm:$0x4] }
 0x1ec   :  { %7575 = vmatprep.subr.bf16.mxu0 %v8324_v37 }
 0x1ee   :  { %7394 = vmatpush3.bf16.msra.mxu1 %v8125_v23  ;;  %v2463_v23 = vld [vmem:[#allocation2 + $0x10] sm:$0x20] }
 0x1ef   :  { %7576 = vmatpush3.bf16.msra.mxu0 %v8126_v8  ;;  %7395 = vmatprep.subr.bf16.mxu1 %v8324_v37  ;;  %v8163_v8 = vld [vmem:[%s9964_s3 + $0x2e0] sm:$0xff]  }
 0x1f0   :  { %7577 = vmatprep.subr.bf16.mxu0 %v8324_v37 }
 0x1f2   :  { %7396 = vmatpush3.bf16.msra.mxu1 %v8127_v56  ;;  %v2474_v56 = vrot.slane %v2463_v23, 5  ;;  %v2941_v23 = vld [vmem:[#allocation2 + $0x18] sm:$0x8] }
 0x1f3   :  { %7578 = vmatpush3.bf16.msra.mxu0 %v8128_v10  ;;  %7397 = vmatprep.subr.bf16.mxu1 %v8324_v37  ;;  %v8164_v10 = vld [vmem:[%s9964_s3 + $0x4c8] sm:$0xff]  }
 0x1f4   :  { %7595 = vmatprep.subr.bf16.mxu0 %v8324_v37 }
 0x1f6   :  { %7398 = vmatpush3.bf16.msra.mxu1 %v8129_v1  ;;  %7580 = vmatmul.mubr.msk.bf16.vlgmr.msra.gmra.mrb[104].mxu0 %vm783_vm3, %v3032_v14 }
 0x1f7   :  { %7596 = vmatpush3.bf16.msra.mxu0 %v8130_v13  ;;  %7415 = vmatprep.subr.bf16.mxu1 %v8324_v37  ;;  %v8165_v13 = vld [vmem:[%s9964_s3 + $0x2e8] sm:$0xff]  }
 0x1f8   :  { %7597 = vmatprep.subr.bf16.mxu0 %v8324_v37  ;;  %7603 = vmatprep.mubr.msk.bf16.mxu0 %vm8325_vm2, %v8324_v37 }
 0x1f9   :  { %7400 = vmatmul.mubr.msk.bf16.vlgmr.msra.gmra.mrb[40].mxu1 %vm783_vm3, %v1836_v19 }
 0x1fa   :  { %7416 = vmatpush3.bf16.msra.mxu1 %v8131_v17  ;;  %7423 = vmatprep.mubr.msk.bf16.mxu1 %vm8325_vm2, %v8324_v37 }
 0x1fb   :  { %7598 = vmatpush3.bf16.msra.mxu0 %v8132_v20  ;;  %7417 = vmatprep.subr.bf16.mxu1 %v8324_v37 }
 0x1fc   :  { %7599 = vmatprep.subr.bf16.mxu0 %v8324_v37 }
 0x1fe   :  { %7418 = vmatpush3.bf16.msra.mxu1 %v8133_v22 }
 0x1ff   :  { %7600 = vmatpush3.bf16.msra.mxu0 %v8134_v57  ;;  %7419 = vmatprep.subr.bf16.mxu1 %v8324_v37 }
 0x200   :  { %7601 = vmatprep.subr.bf16.mxu0 %v8324_v37 }
 0x202   :  { %7420 = vmatpush3.bf16.msra.mxu1 %v8135_v24  ;;  %v8167_v24 = vld [vmem:[%s9964_s3 + $0x2f0] sm:$0xff]  }
 0x203   :  { %7602 = vmatpush3.bf16.msra.mxu0 %v8136_v25  ;;  %7421 = vmatprep.subr.bf16.mxu1 %v8324_v37 }
 0x204   :  { %7619 = vmatprep.subr.bf16.mxu0 %v8324_v37 }
 0x206   :  { %7422 = vmatpush3.bf16.msra.mxu1 %v8137_v49  ;;  %7604 = vmatmul.mubr.msk.bf16.vlgmr.msra.gmra.mrb[108].mxu0 %vm783_vm3, %v3192_v26  ;;  %v3819_v49 = vld [vmem:[#allocation2 + $0x20] sm:$0x40] }
 0x207   :  { %7620 = vmatpush3.bf16.msra.mxu0 %v8138_v40  ;;  %7439 = vmatprep.subr.bf16.mxu1 %v8324_v37  ;;  %v8169_v40 = vld [vmem:[%s9964_s3 + $0x2f8] sm:$0xff]   ;;  %v8170_v26 = vld [vmem:[%s9964_s3 + $0x500] sm:$0xff]   ;;  %v3830_v50 = vrot.slane %v3819_v49, 6 }
 0x208   :  { %7621 = vmatprep.subr.bf16.mxu0 %v8324_v37  ;;  %7627 = vmatprep.mubr.msk.bf16.mxu0 %vm8325_vm2, %v8324_v37  ;;  %v8192_v49 = vld [vmem:[%s9964_s3 + $0x598] sm:$0xff]  }
 0x209   :  { %7424 = vmatmul.mubr.msk.bf16.vlgmr.msra.gmra.mrb[44].mxu1 %vm783_vm3, %v1996_v58  ;;  %v8171_v58 = vld [vmem:[%s9964_s3 + $0x320] sm:$0xff]  }
 0x20a   :  { %7440 = vmatpush3.bf16.msra.mxu1 %v8139_v43  ;;  %7447 = vmatprep.mubr.msk.bf16.mxu1 %vm8325_vm2, %v8324_v37  ;;  %v2623_v43 = vld [vmem:[#allocation2 + $0x10] sm:$0x80] }
 0x20b   :  { %7622 = vmatpush3.bf16.msra.mxu0 %v8140_v27  ;;  %7441 = vmatprep.subr.bf16.mxu1 %v8324_v37  ;;  %v2634_v27 = vrot.slane %v2623_v43, 7 }
 0x20c   :  { %7623 = vmatprep.subr.bf16.mxu0 %v8324_v37 }
 0x20e   :  { %7442 = vmatpush3.bf16.msra.mxu1 %v8141_v51  ;;  %v8172_v51 = vld [vmem:[%s9964_s3 + $0x508] sm:$0xff]  }
 0x20f   :  { %7624 = vmatpush3.bf16.msra.mxu0 %v8142_v59  ;;  %7443 = vmatprep.subr.bf16.mxu1 %v8324_v37 }
 0x210   :  { %7625 = vmatprep.subr.bf16.mxu0 %v8324_v37 }
 0x212   :  { %7444 = vmatpush3.bf16.msra.mxu1 %v8143_v46 }
 0x213   :  { %7626 = vmatpush3.bf16.msra.mxu0 %v8144_v33  ;;  %7445 = vmatprep.subr.bf16.mxu1 %v8324_v37  ;;  %v8173_v33 = vld [vmem:[%s9964_s3 + $0x328] sm:$0xff]  }
 0x214   :  { %7643 = vmatprep.subr.bf16.mxu0 %v8324_v37 }
 0x216   :  { %7446 = vmatpush3.bf16.msra.mxu1 %v8145_v28  ;;  %7628 = vmatmul.mubr.msk.bf16.vlgmr.msra.gmra.mrb[112].mxu0 %vm783_vm3, %v3341_v29 }
 0x217   :  { %7644 = vmatpush3.bf16.msra.mxu0 %v8146_v34  ;;  %7463 = vmatprep.subr.bf16.mxu1 %v8324_v37  ;;  %v8174_v34 = vld [vmem:[%s9964_s3 + $0x510] sm:$0xff]  }
 0x218   :  { %7645 = vmatprep.subr.bf16.mxu0 %v8324_v37  ;;  %7651 = vmatprep.mubr.msk.bf16.mxu0 %vm8325_vm2, %v8324_v37 }
 0x219   :  { %7448 = vmatmul.mubr.msk.bf16.vlgmr.msra.gmra.mrb[48].mxu1 %vm783_vm3, %v2154_v31 }
 0x21a   :  { %7464 = vmatpush3.bf16.msra.mxu1 %v8147_v30  ;;  %7471 = vmatprep.mubr.msk.bf16.mxu1 %vm8325_vm2, %v8324_v37 }
 0x21b   :  { %7646 = vmatpush3.bf16.msra.mxu0 %v8148_v52  ;;  %7465 = vmatprep.subr.bf16.mxu1 %v8324_v37 }
 0x21c   :  { %7647 = vmatprep.subr.bf16.mxu0 %v8324_v37 }
 0x21e   :  { %7466 = vmatpush3.bf16.msra.mxu1 %v8149_v32  ;;  %v8175_v32 = vld [vmem:[%s9964_s3 + $0x330] sm:$0xff]  }
 0x21f   :  { %7648 = vmatpush3.bf16.msra.mxu0 %v8150_v48  ;;  %7467 = vmatprep.subr.bf16.mxu1 %v8324_v37 }
 0x220   :  { %7649 = vmatprep.subr.bf16.mxu0 %v8324_v37 }
 0x222   :  { %7468 = vmatpush3.bf16.msra.mxu1 %v8151_v60  ;;  %v8176_v60 = vld [vmem:[%s9964_s3 + $0x518] sm:$0xff]  }
 0x223   :  { %7650 = vmatpush3.bf16.msra.mxu0 %v8152_v36  ;;  %7469 = vmatprep.subr.bf16.mxu1 %v8324_v37  ;;  %v8177_v36 = vld [vmem:[%s9964_s3 + $0x338] sm:$0xff]  }
 0x224   :  { %7667 = vmatprep.subr.bf16.mxu0 %v8324_v37 }
 0x226   :  { %7470 = vmatpush3.bf16.msra.mxu1 %v8153_v39  ;;  %7652 = vmatmul.mubr.msk.bf16.vlgmr.msra.gmra.mrb[116].mxu0 %vm783_vm3, %v3510_v42  ;;  %v2781_v39 = vld [vmem:[#allocation2 + $0x18] sm:$0x2]  ;;  %v8179_v42 = vld [vmem:[%s9964_s3 + $0x360] sm:$0xff]  }
 0x227   :  { %7668 = vmatpush3.bf16.msra.mxu0 %v8154_v41  ;;  %7487 = vmatprep.subr.bf16.mxu1 %v8324_v37  ;;  %v3979_v41 = vld [vmem:[#allocation2 + $0x28] sm:$0x1]  ;;  %v2792_v15 = vrot.slane %v2781_v39, 1  ;;  %v4457_v39 = vld [vmem:[#allocation2 + $0x28] sm:$0x40] }
 0x228   :  { %7669 = vmatprep.subr.bf16.mxu0 %v8324_v37  ;;  %7675 = vmatprep.mubr.msk.bf16.mxu0 %vm8325_vm2, %v8324_v37 }
 0x229   :  { %7472 = vmatmul.mubr.msk.bf16.vlgmr.msra.gmra.mrb[52].mxu1 %vm783_vm3, %v2314_v44  ;;  %v9201_v18 = vpop.f32.mrb[64].mxu0 }
 0x22a   :  { %7488 = vmatpush3.bf16.msra.mxu1 %v8155_v2  ;;  %v7341_v3 = vpop.f32.mrb[65].mxu0  ;;  %7495 = vmatprep.mubr.msk.bf16.mxu1 %vm8325_vm2, %v8324_v37  ;;  %v8180_v2 = vld [vmem:[%s9964_s3 + $0x548] sm:$0xff]  }
 0x22b   :  { %7670 = vmatpush3.bf16.msra.mxu0 %v8156_v53  ;;  %v1501_v45 = vpop.f32.mrb[66].mxu0  ;;  %7489 = vmatprep.subr.bf16.mxu1 %v8324_v37  ;;  %v8181_v3 = vld [vmem:[%s9964_s3 + $0x368] sm:$0xff]  }
 0x22c   :  { %v874_v21 = vpop.f32.mrb[0].mxu1  ;;  %v7342_v5 = vpop.f32.mrb[67].mxu0  ;;  %7671 = vmatprep.subr.bf16.mxu0 %v8324_v37  ;;  %v8182_v45 = vld [vmem:[%s9964_s3 + $0x550] sm:$0xff]  }
 0x22d   :  { %v7245_v6 = vpop.f32.mrb[1].mxu1 }
 0x22e   :  { %7490 = vmatpush3.bf16.msra.mxu1 %v8157_v4  ;;  %v877_v62 = vpop.f32.mrb[2].mxu1 }
 0x22f   :  { %7672 = vmatpush3.bf16.msra.mxu0 %v8158_v54  ;;  %v7246_v47 = vpop.f32.mrb[3].mxu1  ;;  %7491 = vmatprep.subr.bf16.mxu1 %v8324_v37 }
 0x230   :  { %7673 = vmatprep.subr.bf16.mxu0 %v8324_v37 }
 0x232   :  { %7492 = vmatpush3.bf16.msra.mxu1 %v8159_v7  ;;  %v8183_v7 = vld [vmem:[%s9964_s3 + $0x370] sm:$0xff]  }
 0x233   :  { %7674 = vmatpush3.bf16.msra.mxu0 %v8160_v9  ;;  %7493 = vmatprep.subr.bf16.mxu1 %v8324_v37  ;;  %v8184_v9 = vld [vmem:[%s9964_s3 + $0x558] sm:$0xff]  }
 0x234   :  { %7691 = vmatprep.subr.bf16.mxu0 %v8324_v37 }
 0x236   :  { %7494 = vmatpush3.bf16.msra.mxu1 %v8161_v0  ;;  %7676 = vmatmul.mubr.msk.bf16.vlgmr.msra.gmra.mrb[120].mxu0 %vm783_vm3, %v3670_v55  ;;  %v8185_v0 = vld [vmem:[%s9964_s3 + $0x378] sm:$0xff]   ;;  %v4148_v55 = vrot.slane %v4137_v63, 2 }
 0x237   :  { %7692 = vmatpush3.bf16.msra.mxu0 %v8162_v11  ;;  %7511 = vmatprep.subr.bf16.mxu1 %v8324_v37  ;;  %v8186_v11 = vld [vmem:[%s9964_s3 + $0x580] sm:$0xff]  }
 0x238   :  { %7693 = vmatprep.subr.bf16.mxu0 %v8324_v37  ;;  %7699 = vmatprep.mubr.msk.bf16.mxu0 %vm8325_vm2, %v8324_v37 }
 0x239   :  { %v9240_v12 = vpop.f32.mrb[68].mxu0  ;;  %7496 = vmatmul.mubr.msk.bf16.vlgmr.msra.gmra.mrb[56].mxu1 %vm783_vm3, %v2474_v56  ;;  %v2952_v56 = vrot.slane %v2941_v23, 3  ;;  %v8209_v23 = vld [vmem:[%s9964_s3 + $0x438] sm:$0xff]  }
 0x23a   :  { %v7365_v1 = vpop.f32.mrb[69].mxu0  ;;  %7512 = vmatpush3.bf16.msra.mxu1 %v8163_v8  ;;  %7519 = vmatprep.mubr.msk.bf16.mxu1 %vm8325_vm2, %v8324_v37  ;;  %v8187_v8 = vld [vmem:[%s9964_s3 + $0x3a0] sm:$0xff]  }
 0x23b   :  { %v1661_v14 = vpop.f32.mrb[70].mxu0  ;;  %7694 = vmatpush3.bf16.msra.mxu0 %v8164_v10  ;;  %7513 = vmatprep.subr.bf16.mxu1 %v8324_v37  ;;  %v8188_v10 = vld [vmem:[%s9964_s3 + $0x588] sm:$0xff]  }
 0x23c   :  { %v941_v17 = vpop.f32.mrb[4].mxu1  ;;  %v7366_v19 = vpop.f32.mrb[71].mxu0  ;;  %7695 = vmatprep.subr.bf16.mxu0 %v8324_v37  ;;  %v8189_v14 = vld [vmem:[%s9964_s3 + $0x3a8] sm:$0xff]  }
 0x23d   :  { %v942_v20 = vadd.f32 %v941_v17, %v874_v21  ;;  %v7257_v22 = vpop.f32.mrb[5].mxu1  ;;  %v8190_v17 = vld [vmem:[%s9964_s3 + $0x590] sm:$0xff]  }
 0x23e   :  { %v944_v57 = vpop.f32.mrb[6].mxu1  ;;  %7514 = vmatpush3.bf16.msra.mxu1 %v8165_v13 }
 0x23f   :  { %v7258_v25 = vpop.f32.mrb[7].mxu1  ;;  %7696 = vmatpush3.bf16.msra.mxu0 %v8166_v16  ;;  %7515 = vmatprep.subr.bf16.mxu1 %v8324_v37 }
 0x240   :  { %7697 = vmatprep.subr.bf16.mxu0 %v8324_v37  ;;  %v8191_v25 = vld [vmem:[%s9964_s3 + $0x3b0] sm:$0xff]  }
 0x242   :  { %7516 = vmatpush3.bf16.msra.mxu1 %v8167_v24 }
 0x243   :  { %7698 = vmatpush3.bf16.msra.mxu0 %v8168_v61  ;;  %7517 = vmatprep.subr.bf16.mxu1 %v8324_v37 }
 0x244   :  { %7715 = vmatprep.subr.bf16.mxu0 %v8324_v37 }
 0x246   :  { %7518 = vmatpush3.bf16.msra.mxu1 %v8169_v40  ;;  %7700 = vmatmul.mubr.msk.bf16.vlgmr.msra.gmra.mrb[124].mxu0 %vm783_vm3, %v3830_v50  ;;  %v4297_v40 = vld [vmem:[#allocation2 + $0x28] sm:$0x10]  ;;  %v8194_v50 = vld [vmem:[%s9964_s3 + $0x5c0] sm:$0xff]  }
 0x247   :  { %7716 = vmatpush3.bf16.msra.mxu0 %v8170_v26  ;;  %7535 = vmatprep.subr.bf16.mxu1 %v8324_v37  ;;  %v8193_v26 = vld [vmem:[%s9964_s3 + $0x3b8] sm:$0xff]   ;;  %v4308_v43 = vrot.slane %v4297_v40, 4 }
 0x248   :  { %7717 = vmatprep.subr.bf16.mxu0 %v8324_v37  ;;  %7723 = vmatprep.mubr.msk.bf16.mxu0 %vm8325_vm2, %v8324_v37 }
 0x249   :  { %v9280_v59 = vpop.f32.mrb[72].mxu0  ;;  %7520 = vmatmul.mubr.msk.bf16.vlgmr.msra.gmra.mrb[60].mxu1 %vm783_vm3, %v2634_v27  ;;  %v8195_v27 = vld [vmem:[%s9964_s3 + $0x3e0] sm:$0xff]  }
 0x24a   :  { %v7389_v46 = vpop.f32.mrb[73].mxu0  ;;  %7536 = vmatpush3.bf16.msra.mxu1 %v8171_v58  ;;  %7543 = vmatprep.mubr.msk.bf16.mxu1 %vm8325_vm2, %v8324_v37  ;;  %v3101_v58 = vld [vmem:[#allocation2 + $0x18] sm:$0x20] }
 0x24b   :  { %v1821_v28 = vpop.f32.mrb[74].mxu0  ;;  %7718 = vmatpush3.bf16.msra.mxu0 %v8172_v51  ;;  %7537 = vmatprep.subr.bf16.mxu1 %v8324_v37  ;;  %v3112_v51 = vrot.slane %v3101_v58, 5  ;;  %v8196_v46 = vld [vmem:[%s9964_s3 + $0x5c8] sm:$0xff]  }
 0x24c   :  { %v1020_v35 = vpop.f32.mrb[8].mxu1  ;;  %v7390_v29 = vpop.f32.mrb[75].mxu0  ;;  %7719 = vmatprep.subr.bf16.mxu0 %v8324_v37 }
 0x24d   :  { %v1026_v30 = vadd.f32 %v1020_v35, %v942_v20  ;;  %v7269_v31 = vpop.f32.mrb[9].mxu1  ;;  %v8198_v29 = vld [vmem:[%s9964_s3 + $0x5d0] sm:$0xff]  }
 0x24e   :  { %v1023_v52 = vpop.f32.mrb[10].mxu1  ;;  %7538 = vmatpush3.bf16.msra.mxu1 %v8173_v33 }
 0x24f   :  { %v7270_v48 = vpop.f32.mrb[11].mxu1  ;;  %7720 = vmatpush3.bf16.msra.mxu0 %v8174_v34  ;;  %7539 = vmatprep.subr.bf16.mxu1 %v8324_v37  ;;  %v8197_v34 = vld [vmem:[%s9964_s3 + $0x3e8] sm:$0xff]  }
 0x250   :  { %7721 = vmatprep.subr.bf16.mxu0 %v8324_v37 }
 0x252   :  { %7540 = vmatpush3.bf16.msra.mxu1 %v8175_v32 }
 0x253   :  { %7722 = vmatpush3.bf16.msra.mxu0 %v8176_v60  ;;  %7541 = vmatprep.subr.bf16.mxu1 %v8324_v37  ;;  %v8199_v60 = vld [vmem:[%s9964_s3 + $0x3f0] sm:$0xff]  }
 0x254   :  { %7739 = vmatprep.subr.bf16.mxu0 %v8324_v37 }
 0x256   :  { %7542 = vmatpush3.bf16.msra.mxu1 %v8177_v36  ;;  %7724 = vmatmul.mubr.msk.bf16.vlgmr.msra.gmra.mrb[128].mxu0 %vm783_vm3, %v3979_v41  ;;  %v8201_v41 = vld [vmem:[%s9964_s3 + $0x3f8] sm:$0xff]  }
 0x257   :  { %7740 = vmatpush3.bf16.msra.mxu0 %v8178_v38  ;;  %7559 = vmatprep.subr.bf16.mxu1 %v8324_v37  ;;  %v8200_v38 = vld [vmem:[%s9964_s3 + $0x5d8] sm:$0xff]  }
 0x258   :  { %7741 = vmatprep.subr.bf16.mxu0 %v8324_v37  ;;  %7747 = vmatprep.mubr.msk.bf16.mxu0 %vm8325_vm2, %v8324_v37 }
 0x259   :  { %v9320_v44 = vpop.f32.mrb[76].mxu0  ;;  %7544 = vmatmul.mubr.msk.bf16.vlgmr.msra.gmra.mrb[64].mxu1 %vm783_vm3, %v2792_v15  ;;  %v4468_v15 = vrot.slane %v4457_v39, 6 }
 0x25a   :  { %v7413_v53 = vpop.f32.mrb[77].mxu0  ;;  %7560 = vmatpush3.bf16.msra.mxu1 %v8179_v42  ;;  %7567 = vmatprep.mubr.msk.bf16.mxu1 %vm8325_vm2, %v8324_v37  ;;  %v8202_v42 = vld [vmem:[%s9964_s3 + $0x600] sm:$0xff]  }
 0x25b   :  { %v1981_v4 = vpop.f32.mrb[78].mxu0  ;;  %7742 = vmatpush3.bf16.msra.mxu0 %v8180_v2  ;;  %7561 = vmatprep.subr.bf16.mxu1 %v8324_v37  ;;  %v3261_v2 = vld [vmem:[#allocation2 + $0x18] sm:$0x80]  ;;  %v8203_v53 = vld [vmem:[%s9964_s3 + $0x420] sm:$0xff]  }
 0x25c   :  { %v1100_v54 = vpop.f32.mrb[12].mxu1  ;;  %v7414_v21 = vpop.f32.mrb[79].mxu0  ;;  %7743 = vmatprep.subr.bf16.mxu0 %v8324_v37  ;;  %v8204_v4 = vld [vmem:[%s9964_s3 + $0x608] sm:$0xff]  }
 0x25d   :  { %v1106_v5 = vadd.f32 %v1100_v54, %v1026_v30  ;;  %v7281_v6 = vpop.f32.mrb[13].mxu1  ;;  %v8205_v21 = vld [vmem:[%s9964_s3 + $0x428] sm:$0xff]  }
 0x25e   :  { %v1103_v62 = vpop.f32.mrb[14].mxu1  ;;  %7562 = vmatpush3.bf16.msra.mxu1 %v8181_v3  ;;  %v3272_v3 = vrot.slane %v3261_v2, 7  ;;  %v8206_v6 = vld [vmem:[%s9964_s3 + $0x610] sm:$0xff]   ;;  %v8224_v2 = vld [vmem:[%s9964_s3 + $0x698] sm:$0xff]  }
 0x25f   :  { %v7282_v47 = vpop.f32.mrb[15].mxu1  ;;  %7744 = vmatpush3.bf16.msra.mxu0 %v8182_v45  ;;  %7563 = vmatprep.subr.bf16.mxu1 %v8324_v37 }
 0x260   :  { %7745 = vmatprep.subr.bf16.mxu0 %v8324_v37 }
 0x262   :  { %7564 = vmatpush3.bf16.msra.mxu1 %v8183_v7 }
 0x263   :  { %7746 = vmatpush3.bf16.msra.mxu0 %v8184_v9  ;;  %7565 = vmatprep.subr.bf16.mxu1 %v8324_v37 }
 0x264   :  { %7763 = vmatprep.subr.bf16.mxu0 %v8324_v37 }
 0x266   :  { %7566 = vmatpush3.bf16.msra.mxu1 %v8185_v0  ;;  %7748 = vmatmul.mubr.msk.bf16.vlgmr.msra.gmra.mrb[132].mxu0 %vm783_vm3, %v4148_v55  ;;  %v8207_v0 = vld [vmem:[%s9964_s3 + $0x430] sm:$0xff]   ;;  %v8208_v55 = vld [vmem:[%s9964_s3 + $0x618] sm:$0xff]  }
 0x267   :  { %7764 = vmatpush3.bf16.msra.mxu0 %v8186_v11  ;;  %7583 = vmatprep.subr.bf16.mxu1 %v8324_v37 }
 0x268   :  { %7765 = vmatprep.subr.bf16.mxu0 %v8324_v37  ;;  %7771 = vmatprep.mubr.msk.bf16.mxu0 %vm8325_vm2, %v8324_v37 }
 0x269   :  { %v9360_v1 = vpop.f32.mrb[80].mxu0  ;;  %7568 = vmatmul.mubr.msk.bf16.vlgmr.msra.gmra.mrb[68].mxu1 %vm783_vm3, %v2952_v56  ;;  %v3419_v56 = vld [vmem:[#allocation2 + $0x20] sm:$0x2] }
 0x26a   :  { %v7437_v13 = vpop.f32.mrb[81].mxu0  ;;  %7584 = vmatpush3.bf16.msra.mxu1 %v8187_v8  ;;  %7591 = vmatprep.mubr.msk.bf16.mxu1 %vm8325_vm2, %v8324_v37  ;;  %v8210_v8 = vld [vmem:[%s9964_s3 + $0x640] sm:$0xff]  }
 0x26b   :  { %v2139_v16 = vpop.f32.mrb[82].mxu0  ;;  %7766 = vmatpush3.bf16.msra.mxu0 %v8188_v10  ;;  %7585 = vmatprep.subr.bf16.mxu1 %v8324_v37  ;;  %v4617_v10 = vld [vmem:[#allocation2 + $0x30] sm:$0x1]  ;;  %v8211_v13 = vld [vmem:[%s9964_s3 + $0x460] sm:$0xff]  }
 0x26c   :  { %v1180_v19 = vpop.f32.mrb[16].mxu1  ;;  %v7438_v20 = vpop.f32.mrb[83].mxu0  ;;  %7767 = vmatprep.subr.bf16.mxu0 %v8324_v37  ;;  %v8212_v16 = vld [vmem:[%s9964_s3 + $0x648] sm:$0xff]  }
 0x26d   :  { %v1186_v22 = vadd.f32 %v1180_v19, %v1106_v5  ;;  %v7293_v57 = vpop.f32.mrb[17].mxu1  ;;  %v8213_v20 = vld [vmem:[%s9964_s3 + $0x468] sm:$0xff]  }
 0x26e   :  { %v1183_v24 = vpop.f32.mrb[18].mxu1  ;;  %7586 = vmatpush3.bf16.msra.mxu1 %v8189_v14  ;;  %v3430_v14 = vrot.slane %v3419_v56, 1  ;;  %v8214_v57 = vld [vmem:[%s9964_s3 + $0x650] sm:$0xff]  }
 0x26f   :  { %v7294_v61 = vpop.f32.mrb[19].mxu1  ;;  %7768 = vmatpush3.bf16.msra.mxu0 %v8190_v17  ;;  %7587 = vmatprep.subr.bf16.mxu1 %v8324_v37 }
 0x270   :  { %7769 = vmatprep.subr.bf16.mxu0 %v8324_v37 }
 0x272   :  { %7588 = vmatpush3.bf16.msra.mxu1 %v8191_v25 }
 0x273   :  { %7770 = vmatpush3.bf16.msra.mxu0 %v8192_v49  ;;  %7589 = vmatprep.subr.bf16.mxu1 %v8324_v37 }
 0x274   :  { %7787 = vmatprep.subr.bf16.mxu0 %v8324_v37 }
 0x276   :  { %7590 = vmatpush3.bf16.msra.mxu1 %v8193_v26  ;;  %7772 = vmatmul.mubr.msk.bf16.vlgmr.msra.gmra.mrb[136].mxu0 %vm783_vm3, %v4308_v43  ;;  %v8215_v26 = vld [vmem:[%s9964_s3 + $0x470] sm:$0xff]   ;;  %v8216_v43 = vld [vmem:[%s9964_s3 + $0x658] sm:$0xff]  }
 0x277   :  { %7788 = vmatpush3.bf16.msra.mxu0 %v8194_v50  ;;  %7607 = vmatprep.subr.bf16.mxu1 %v8324_v37 }
 0x278   :  { %7789 = vmatprep.subr.bf16.mxu0 %v8324_v37  ;;  %7795 = vmatprep.mubr.msk.bf16.mxu0 %vm8325_vm2, %v8324_v37 }
 0x279   :  { %v9400_v33 = vpop.f32.mrb[84].mxu0  ;;  %7592 = vmatmul.mubr.msk.bf16.vlgmr.msra.gmra.mrb[72].mxu1 %vm783_vm3, %v3112_v51  ;;  %v8217_v51 = vld [vmem:[%s9964_s3 + $0x478] sm:$0xff]  }
 0x27a   :  { %v7461_v28 = vpop.f32.mrb[85].mxu0  ;;  %7608 = vmatpush3.bf16.msra.mxu1 %v8195_v27  ;;  %7615 = vmatprep.mubr.msk.bf16.mxu1 %vm8325_vm2, %v8324_v37  ;;  %v4775_v27 = vld [vmem:[#allocation2 + $0x30] sm:$0x4] }
 0x27b   :  { %v2299_v35 = vpop.f32.mrb[86].mxu0  ;;  %7790 = vmatpush3.bf16.msra.mxu0 %v8196_v46  ;;  %7609 = vmatprep.subr.bf16.mxu1 %v8324_v37  ;;  %v8218_v46 = vld [vmem:[%s9964_s3 + $0x680] sm:$0xff]   ;;  %v4786_v28 = vrot.slane %v4775_v27, 2 }
 0x27c   :  { %v1260_v30 = vpop.f32.mrb[20].mxu1  ;;  %v7462_v31 = vpop.f32.mrb[87].mxu0  ;;  %7791 = vmatprep.subr.bf16.mxu0 %v8324_v37 }
 0x27d   :  { %v1266_v52 = vadd.f32 %v1260_v30, %v1186_v22  ;;  %v7305_v32 = vpop.f32.mrb[21].mxu1 }
 0x27e   :  { %v1263_v48 = vpop.f32.mrb[22].mxu1  ;;  %7610 = vmatpush3.bf16.msra.mxu1 %v8197_v34  ;;  %v3579_v34 = vld [vmem:[#allocation2 + $0x20] sm:$0x8] }
 0x27f   :  { %v7306_v36 = vpop.f32.mrb[23].mxu1  ;;  %7792 = vmatpush3.bf16.msra.mxu0 %v8198_v29  ;;  %7611 = vmatprep.subr.bf16.mxu1 %v8324_v37  ;;  %v3590_v35 = vrot.slane %v3579_v34, 3  ;;  %v8220_v29 = vld [vmem:[%s9964_s3 + $0x688] sm:$0xff]   ;;  %v8222_v48 = vld [vmem:[%s9964_s3 + $0x690] sm:$0xff]  }
 0x280   :  { %7793 = vmatprep.subr.bf16.mxu0 %v8324_v37  ;;  %v8239_v34 = vld [vmem:[%s9964_s3 + $0x530] sm:$0xff]  }
 0x282   :  { %7612 = vmatpush3.bf16.msra.mxu1 %v8199_v60 }
 0x283   :  { %7794 = vmatpush3.bf16.msra.mxu0 %v8200_v38  ;;  %7613 = vmatprep.subr.bf16.mxu1 %v8324_v37 }
 0x284   :  { %7811 = vmatprep.subr.bf16.mxu0 %v8324_v37 }
 0x286   :  { %7614 = vmatpush3.bf16.msra.mxu1 %v8201_v41  ;;  %7796 = vmatmul.mubr.msk.bf16.vlgmr.msra.gmra.mrb[140].mxu0 %vm783_vm3, %v4468_v15 }
 0x287   :  { %7812 = vmatpush3.bf16.msra.mxu0 %v8202_v42  ;;  %7631 = vmatprep.subr.bf16.mxu1 %v8324_v37  ;;  %v8223_v42 = vld [vmem:[%s9964_s3 + $0x4b0] sm:$0xff]  }
 0x288   :  { %7813 = vmatprep.subr.bf16.mxu0 %v8324_v37  ;;  %7819 = vmatprep.mubr.msk.bf16.mxu0 %vm8325_vm2, %v8324_v37 }
 0x289   :  { %v9440_v45 = vpop.f32.mrb[88].mxu0  ;;  %7616 = vmatmul.mubr.msk.bf16.vlgmr.msra.gmra.mrb[76].mxu1 %vm783_vm3, %v3272_v3  ;;  %v4935_v3 = vld [vmem:[#allocation2 + $0x30] sm:$0x10] }
 0x28a   :  { %v7485_v54 = vpop.f32.mrb[89].mxu0  ;;  %7632 = vmatpush3.bf16.msra.mxu1 %v8203_v53  ;;  %7639 = vmatprep.mubr.msk.bf16.mxu1 %vm8325_vm2, %v8324_v37 }
 0x28b   :  { %v2459_v5 = vpop.f32.mrb[90].mxu0  ;;  %7814 = vmatpush3.bf16.msra.mxu0 %v8204_v4  ;;  %7633 = vmatprep.subr.bf16.mxu1 %v8324_v37  ;;  %v8225_v4 = vld [vmem:[%s9964_s3 + $0x4b8] sm:$0xff]   ;;  %v8226_v54 = vld [vmem:[%s9964_s3 + $0x6c0] sm:$0xff]  }
 0x28c   :  { %v1340_v62 = vpop.f32.mrb[24].mxu1  ;;  %v7486_v7 = vpop.f32.mrb[91].mxu0  ;;  %7815 = vmatprep.subr.bf16.mxu0 %v8324_v37  ;;  %v3739_v5 = vld [vmem:[#allocation2 + $0x20] sm:$0x20] }
 0x28d   :  { %v1346_v47 = vadd.f32 %v1340_v62, %v1266_v52  ;;  %v7317_v9 = vpop.f32.mrb[25].mxu1  ;;  %v8221_v52 = vld [vmem:[%s9964_s3 + $0x4a8] sm:$0xff]  }
 0x28e   :  { %v1343_v63 = vpop.f32.mrb[26].mxu1  ;;  %7634 = vmatpush3.bf16.msra.mxu1 %v8205_v21  ;;  %v4946_v21 = vrot.slane %v4935_v3, 4  ;;  %v8228_v62 = vld [vmem:[%s9964_s3 + $0x6c8] sm:$0xff]  }
 0x28f   :  { %v7318_v11 = vpop.f32.mrb[27].mxu1  ;;  %7816 = vmatpush3.bf16.msra.mxu0 %v8206_v6  ;;  %7635 = vmatprep.subr.bf16.mxu1 %v8324_v37  ;;  %v3750_v6 = vrot.slane %v3739_v5, 5  ;;  %v8229_v9 = vld [vmem:[%s9964_s3 + $0x4e8] sm:$0xff]  }
 0x290   :  { %7817 = vmatprep.subr.bf16.mxu0 %v8324_v37 }
 0x292   :  { %7636 = vmatpush3.bf16.msra.mxu1 %v8207_v0  ;;  %v8230_v0 = vld [vmem:[%s9964_s3 + $0x6d0] sm:$0xff]  }
 0x293   :  { %7818 = vmatpush3.bf16.msra.mxu0 %v8208_v55  ;;  %7637 = vmatprep.subr.bf16.mxu1 %v8324_v37 }
 0x294   :  { %7835 = vmatprep.subr.bf16.mxu0 %v8324_v37 }
 0x296   :  { %7638 = vmatpush3.bf16.msra.mxu1 %v8209_v23  ;;  %7820 = vmatmul.mubr.msk.bf16.vlgmr.msra.gmra.mrb[144].mxu0 %vm783_vm3, %v4617_v10  ;;  %v8231_v10 = vld [vmem:[%s9964_s3 + $0x4f0] sm:$0xff]  }
 0x297   :  { %7836 = vmatpush3.bf16.msra.mxu0 %v8210_v8  ;;  %7655 = vmatprep.subr.bf16.mxu1 %v8324_v37 }
 0x298   :  { %7837 = vmatprep.subr.bf16.mxu0 %v8324_v37  ;;  %7843 = vmatprep.mubr.msk.bf16.mxu0 %vm8325_vm2, %v8324_v37 }
 0x299   :  { %v9480_v17 = vpop.f32.mrb[92].mxu0  ;;  %7640 = vmatmul.mubr.msk.bf16.vlgmr.msra.gmra.mrb[80].mxu1 %vm783_vm3, %v3430_v14  ;;  %v8232_v14 = vld [vmem:[%s9964_s3 + $0x6d8] sm:$0xff]  }
 0x29a   :  { %v7509_v19 = vpop.f32.mrb[93].mxu0  ;;  %7656 = vmatpush3.bf16.msra.mxu1 %v8211_v13  ;;  %7663 = vmatprep.mubr.msk.bf16.mxu1 %vm8325_vm2, %v8324_v37 }
 0x29b   :  { %v2619_v22 = vpop.f32.mrb[94].mxu0  ;;  %7838 = vmatpush3.bf16.msra.mxu0 %v8212_v16  ;;  %7657 = vmatprep.subr.bf16.mxu1 %v8324_v37  ;;  %v5095_v19 = vld [vmem:[#allocation2 + $0x30] sm:$0x40] }
 0x29c   :  { %v1420_v24 = vpop.f32.mrb[28].mxu1  ;;  %v7510_v25 = vpop.f32.mrb[95].mxu0  ;;  %7839 = vmatprep.subr.bf16.mxu0 %v8324_v37  ;;  %v8234_v22 = vld [vmem:[%s9964_s3 + $0x700] sm:$0xff]  }
 0x29d   :  { %v1426_v61 = vadd.f32 %v1420_v24, %v1346_v47  ;;  %v7329_v49 = vpop.f32.mrb[29].mxu1  ;;  %v3899_v24 = vld [vmem:[#allocation2 + $0x20] sm:$0x80] }
 0x29e   :  { %v1423_v40 = vpop.f32.mrb[30].mxu1  ;;  %7658 = vmatpush3.bf16.msra.mxu1 %v8213_v20  ;;  %v8233_v20 = vld [vmem:[%s9964_s3 + $0x4f8] sm:$0xff]   ;;  %v3910_v25 = vrot.slane %v3899_v24, 7 }
 0x29f   :  { %v7330_v50 = vpop.f32.mrb[31].mxu1  ;;  %7840 = vmatpush3.bf16.msra.mxu0 %v8214_v57  ;;  %7659 = vmatprep.subr.bf16.mxu1 %v8324_v37  ;;  %v1504_v58 = vadd.f32 %v9201_v18, %v1426_v61  ;;  %v8219_v18 = vld [vmem:[%s9964_s3 + $0x4a0] sm:$0xff]   ;;  %v5106_v57 = vrot.slane %v5095_v19, 6  ;;  %v8236_v61 = vld [vmem:[%s9964_s3 + $0x708] sm:$0xff]  }
 0x2a0   :  { %7841 = vmatprep.subr.bf16.mxu0 %v8324_v37 }
 0x2a2   :  { %7660 = vmatpush3.bf16.msra.mxu1 %v8215_v26  ;;  %v8237_v26 = vld [vmem:[%s9964_s3 + $0x528] sm:$0xff]  }
 0x2a3   :  { %7842 = vmatpush3.bf16.msra.mxu0 %v8216_v43  ;;  %7661 = vmatprep.subr.bf16.mxu1 %v8324_v37  ;;  %v8238_v43 = vld [vmem:[%s9964_s3 + $0x710] sm:$0xff]  }
 0x2a4   :  { %7859 = vmatprep.subr.bf16.mxu0 %v8324_v37 }
 0x2a6   :  { %7662 = vmatpush3.bf16.msra.mxu1 %v8217_v51  ;;  %7844 = vmatmul.mubr.msk.bf16.vlgmr.msra.gmra.mrb[148].mxu0 %vm783_vm3, %v4786_v28 }
 0x2a7   :  { %7860 = vmatpush3.bf16.msra.mxu0 %v8218_v46  ;;  %7679 = vmatprep.subr.bf16.mxu1 %v8324_v37 }
 0x2a8   :  { %7861 = vmatprep.subr.bf16.mxu0 %v8324_v37  ;;  %7867 = vmatprep.mubr.msk.bf16.mxu0 %vm8325_vm2, %v8324_v37 }
 0x2a9   :  { %v9521_v30 = vpop.f32.mrb[96].mxu0  ;;  %7664 = vmatmul.mubr.msk.bf16.vlgmr.msra.gmra.mrb[84].mxu1 %vm783_vm3, %v3590_v35  ;;  %v8240_v35 = vld [vmem:[%s9964_s3 + $0x718] sm:$0xff]  }
 0x2aa   :  { %v7533_v31 = vpop.f32.mrb[97].mxu0  ;;  %7680 = vmatpush3.bf16.msra.mxu1 %v8219_v18  ;;  %7687 = vmatprep.mubr.msk.bf16.mxu1 %vm8325_vm2, %v8324_v37 }
 0x2ab   :  { %v2777_v32 = vpop.f32.mrb[98].mxu0  ;;  %7862 = vmatpush3.bf16.msra.mxu0 %v8220_v29  ;;  %7681 = vmatprep.subr.bf16.mxu1 %v8324_v37  ;;  %v8241_v31 = vld [vmem:[%s9964_s3 + $0x538] sm:$0xff]  }
 0x2ac   :  { %v1578_v60 = vpop.f32.mrb[32].mxu1  ;;  %v7534_v36 = vpop.f32.mrb[99].mxu0  ;;  %7863 = vmatprep.subr.bf16.mxu0 %v8324_v37  ;;  %v4057_v32 = vld [vmem:[#allocation2 + $0x28] sm:$0x2] }
 0x2ad   :  { %v1584_v38 = vadd.f32 %v1578_v60, %v1504_v58  ;;  %v7353_v39 = vpop.f32.mrb[33].mxu1  ;;  %v4068_v60 = vrot.slane %v4057_v32, 1  ;;  %v8244_v36 = vld [vmem:[%s9964_s3 + $0x748] sm:$0xff]  }
 0x2ae   :  { %v1581_v41 = vpop.f32.mrb[34].mxu1  ;;  %7682 = vmatpush3.bf16.msra.mxu1 %v8221_v52  ;;  %v8242_v52 = vld [vmem:[%s9964_s3 + $0x740] sm:$0xff]  }
 0x2af   :  { %v7354_v15 = vpop.f32.mrb[35].mxu1  ;;  %7864 = vmatpush3.bf16.msra.mxu0 %v8222_v48  ;;  %7683 = vmatprep.subr.bf16.mxu1 %v8324_v37  ;;  %v1664_v53 = vadd.f32 %v9240_v12, %v1584_v38  ;;  %v8227_v12 = vld [vmem:[%s9964_s3 + $0x4e0] sm:$0xff]   ;;  %v5255_v48 = vld [vmem:[#allocation2 + $0x38] sm:$0x1]  ;;  %v8245_v41 = vld [vmem:[%s9964_s3 + $0x568] sm:$0xff]  }
 0x2b0   :  { %7865 = vmatprep.subr.bf16.mxu0 %v8324_v37  ;;  %v8246_v15 = vld [vmem:[%s9964_s3 + $0x750] sm:$0xff]  }
 0x2b2   :  { %7684 = vmatpush3.bf16.msra.mxu1 %v8223_v42 }
 0x2b3   :  { %7866 = vmatpush3.bf16.msra.mxu0 %v8224_v2  ;;  %7685 = vmatprep.subr.bf16.mxu1 %v8324_v37 }
 0x2b4   :  { %7883 = vmatprep.subr.bf16.mxu0 %v8324_v37 }
 0x2b6   :  { %7686 = vmatpush3.bf16.msra.mxu1 %v8225_v4  ;;  %7868 = vmatmul.mubr.msk.bf16.vlgmr.msra.gmra.mrb[152].mxu0 %vm783_vm3, %v4946_v21  ;;  %v8247_v21 = vld [vmem:[%s9964_s3 + $0x570] sm:$0xff]  }
 0x2b7   :  { %7884 = vmatpush3.bf16.msra.mxu0 %v8226_v54  ;;  %7703 = vmatprep.subr.bf16.mxu1 %v8324_v37 }
 0x2b8   :  { %7885 = vmatprep.subr.bf16.mxu0 %v8324_v37  ;;  %7891 = vmatprep.mubr.msk.bf16.mxu0 %vm8325_vm2, %v8324_v37 }
 0x2b9   :  { %v9562_v7 = vpop.f32.mrb[100].mxu0  ;;  %7688 = vmatmul.mubr.msk.bf16.vlgmr.msra.gmra.mrb[88].mxu1 %vm783_vm3, %v3750_v6 }
 0x2ba   :  { %v7557_v47 = vpop.f32.mrb[101].mxu0  ;;  %7704 = vmatpush3.bf16.msra.mxu1 %v8227_v12  ;;  %7711 = vmatprep.mubr.msk.bf16.mxu1 %vm8325_vm2, %v8324_v37  ;;  %v8248_v12 = vld [vmem:[%s9964_s3 + $0x758] sm:$0xff]  }
 0x2bb   :  { %v2937_v63 = vpop.f32.mrb[102].mxu0  ;;  %7886 = vmatpush3.bf16.msra.mxu0 %v8228_v62  ;;  %7705 = vmatprep.subr.bf16.mxu1 %v8324_v37  ;;  %v5413_v62 = vld [vmem:[#allocation2 + $0x38] sm:$0x4] }
 0x2bc   :  { %v1738_v11 = vpop.f32.mrb[36].mxu1  ;;  %v7558_v55 = vpop.f32.mrb[103].mxu0  ;;  %7887 = vmatprep.subr.bf16.mxu0 %v8324_v37  ;;  %v8249_v47 = vld [vmem:[%s9964_s3 + $0x578] sm:$0xff]   ;;  %v5424_v63 = vrot.slane %v5413_v62, 2 }
 0x2bd   :  { %v1744_v23 = vadd.f32 %v1738_v11, %v1664_v53  ;;  %v7377_v8 = vpop.f32.mrb[37].mxu1  ;;  %v8252_v55 = vld [vmem:[%s9964_s3 + $0x788] sm:$0xff]  }
 0x2be   :  { %v1741_v56 = vpop.f32.mrb[38].mxu1  ;;  %7706 = vmatpush3.bf16.msra.mxu1 %v8229_v9  ;;  %v8250_v9 = vld [vmem:[%s9964_s3 + $0x780] sm:$0xff]  }
 0x2bf   :  { %v7378_v13 = vpop.f32.mrb[39].mxu1  ;;  %7888 = vmatpush3.bf16.msra.mxu0 %v8230_v0  ;;  %7707 = vmatprep.subr.bf16.mxu1 %v8324_v37  ;;  %v1824_v16 = vadd.f32 %v9280_v59, %v1744_v23  ;;  %v8235_v59 = vld [vmem:[%s9964_s3 + $0x520] sm:$0xff]   ;;  %v4217_v0 = vld [vmem:[#allocation2 + $0x28] sm:$0x8] }
 0x2c0   :  { %7889 = vmatprep.subr.bf16.mxu0 %v8324_v37  ;;  %v4228_v11 = vrot.slane %v4217_v0, 3  ;;  %v8253_v56 = vld [vmem:[%s9964_s3 + $0x5a8] sm:$0xff]   ;;  %v8254_v13 = vld [vmem:[%s9964_s3 + $0x790] sm:$0xff]   ;;  %v8269_v0 = vld [vmem:[%s9964_s3 + $0x638] sm:$0xff]  }
 0x2c2   :  { %7708 = vmatpush3.bf16.msra.mxu1 %v8231_v10 }
 0x2c3   :  { %7890 = vmatpush3.bf16.msra.mxu0 %v8232_v14  ;;  %7709 = vmatprep.subr.bf16.mxu1 %v8324_v37 }
 0x2c4   :  { %7907 = vmatprep.subr.bf16.mxu0 %v8324_v37 }
 0x2c6   :  { %7710 = vmatpush3.bf16.msra.mxu1 %v8233_v20  ;;  %7892 = vmatmul.mubr.msk.bf16.vlgmr.msra.gmra.mrb[156].mxu0 %vm783_vm3, %v5106_v57  ;;  %v8255_v57 = vld [vmem:[%s9964_s3 + $0x5b0] sm:$0xff]  }
 0x2c7   :  { %7908 = vmatpush3.bf16.msra.mxu0 %v8234_v22  ;;  %7727 = vmatprep.subr.bf16.mxu1 %v8324_v37 }
 0x2c8   :  { %7909 = vmatprep.subr.bf16.mxu0 %v8324_v37  ;;  %7915 = vmatprep.mubr.msk.bf16.mxu0 %vm8325_vm2, %v8324_v37 }
 0x2c9   :  { %v9603_v49 = vpop.f32.mrb[104].mxu0  ;;  %7712 = vmatmul.mubr.msk.bf16.vlgmr.msra.gmra.mrb[92].mxu1 %vm783_vm3, %v3910_v25 }
 0x2ca   :  { %v7581_v40 = vpop.f32.mrb[105].mxu0  ;;  %7728 = vmatpush3.bf16.msra.mxu1 %v8235_v59  ;;  %7735 = vmatprep.mubr.msk.bf16.mxu1 %vm8325_vm2, %v8324_v37  ;;  %v8256_v59 = vld [vmem:[%s9964_s3 + $0x798] sm:$0xff]  }
 0x2cb   :  { %v3097_v50 = vpop.f32.mrb[106].mxu0  ;;  %7910 = vmatpush3.bf16.msra.mxu0 %v8236_v61  ;;  %7729 = vmatprep.subr.bf16.mxu1 %v8324_v37  ;;  %v5573_v61 = vld [vmem:[#allocation2 + $0x38] sm:$0x10] }
 0x2cc   :  { %v1898_v58 = vpop.f32.mrb[40].mxu1  ;;  %v7582_v27 = vpop.f32.mrb[107].mxu0  ;;  %7911 = vmatprep.subr.bf16.mxu0 %v8324_v37  ;;  %v8257_v40 = vld [vmem:[%s9964_s3 + $0x5b8] sm:$0xff]   ;;  %v5584_v50 = vrot.slane %v5573_v61, 4  ;;  %v8274_v61 = vld [vmem:[%s9964_s3 + $0x6a0] sm:$0xff]  }
 0x2cd   :  { %v1904_v51 = vadd.f32 %v1898_v58, %v1824_v16  ;;  %v7401_v46 = vpop.f32.mrb[41].mxu1  ;;  %v8260_v27 = vld [vmem:[%s9964_s3 + $0x7c8] sm:$0xff]  }
 0x2ce   :  { %v1901_v28 = vpop.f32.mrb[42].mxu1  ;;  %7730 = vmatpush3.bf16.msra.mxu1 %v8237_v26  ;;  %v8258_v26 = vld [vmem:[%s9964_s3 + $0x7c0] sm:$0xff]  }
 0x2cf   :  { %v7402_v18 = vpop.f32.mrb[43].mxu1  ;;  %7912 = vmatpush3.bf16.msra.mxu0 %v8238_v43  ;;  %7731 = vmatprep.subr.bf16.mxu1 %v8324_v37  ;;  %v1984_v29 = vadd.f32 %v9320_v44, %v1904_v51  ;;  %v8243_v44 = vld [vmem:[%s9964_s3 + $0x560] sm:$0xff]   ;;  %v4377_v43 = vld [vmem:[#allocation2 + $0x28] sm:$0x20] }
 0x2d0   :  { %7913 = vmatprep.subr.bf16.mxu0 %v8324_v37  ;;  %v4388_v58 = vrot.slane %v4377_v43, 5  ;;  %v8261_v28 = vld [vmem:[%s9964_s3 + $0x5e8] sm:$0xff]   ;;  %v8262_v18 = vld [vmem:[%s9964_s3 + $0x7d0] sm:$0xff]  }
 0x2d2   :  { %7732 = vmatpush3.bf16.msra.mxu1 %v8239_v34 }
 0x2d3   :  { %7914 = vmatpush3.bf16.msra.mxu0 %v8240_v35  ;;  %7733 = vmatprep.subr.bf16.mxu1 %v8324_v37 }
 0x2d4   :  { %7931 = vmatprep.subr.bf16.mxu0 %v8324_v37 }
 0x2d6   :  { %7734 = vmatpush3.bf16.msra.mxu1 %v8241_v31  ;;  %7916 = vmatmul.mubr.msk.bf16.vlgmr.msra.gmra.mrb[160].mxu0 %vm783_vm3, %v5255_v48  ;;  %v8263_v48 = vld [vmem:[%s9964_s3 + $0x5f0] sm:$0xff]  }
 0x2d7   :  { %7932 = vmatpush3.bf16.msra.mxu0 %v8242_v52  ;;  %7751 = vmatprep.subr.bf16.mxu1 %v8324_v37 }
 0x2d8   :  { %7933 = vmatprep.subr.bf16.mxu0 %v8324_v37  ;;  %7939 = vmatprep.mubr.msk.bf16.mxu0 %vm8325_vm2, %v8324_v37 }
 0x2d9   :  { %v9644_v38 = vpop.f32.mrb[108].mxu0  ;;  %7736 = vmatmul.mubr.msk.bf16.vlgmr.msra.gmra.mrb[96].mxu1 %vm783_vm3, %v4068_v60  ;;  %v8264_v60 = vld [vmem:[%s9964_s3 + $0x7d8] sm:$0xff]  }
 0x2da   :  { %v7605_v39 = vpop.f32.mrb[109].mxu0  ;;  %7752 = vmatpush3.bf16.msra.mxu1 %v8243_v44  ;;  %7759 = vmatprep.mubr.msk.bf16.mxu1 %vm8325_vm2, %v8324_v37 }
 0x2db   :  { %v3257_v42 = vpop.f32.mrb[110].mxu0  ;;  %7934 = vmatpush3.bf16.msra.mxu0 %v8244_v36  ;;  %7753 = vmatprep.subr.bf16.mxu1 %v8324_v37  ;;  %v5733_v39 = vld [vmem:[#allocation2 + $0x38] sm:$0x40] }
 0x2dc   :  { %v2058_v2 = vpop.f32.mrb[44].mxu1  ;;  %v7606_v53 = vpop.f32.mrb[111].mxu0  ;;  %7935 = vmatprep.subr.bf16.mxu0 %v8324_v37  ;;  %v5744_v42 = vrot.slane %v5733_v39, 6 }
 0x2dd   :  { %v2064_v3 = vadd.f32 %v2058_v2, %v1984_v29  ;;  %v7425_v4 = vpop.f32.mrb[45].mxu1 }
 0x2de   :  { %v2061_v54 = vpop.f32.mrb[46].mxu1  ;;  %7754 = vmatpush3.bf16.msra.mxu1 %v8245_v41  ;;  %v8265_v41 = vld [vmem:[%s9964_s3 + $0x5f8] sm:$0xff]   ;;  %v8267_v4 = vld [vmem:[%s9964_s3 + $0x628] sm:$0xff]  }
 0x2df   :  { %v7426_v5 = vpop.f32.mrb[47].mxu1  ;;  %7936 = vmatpush3.bf16.msra.mxu0 %v8246_v15  ;;  %7755 = vmatprep.subr.bf16.mxu1 %v8324_v37  ;;  %v2142_v6 = vadd.f32 %v9360_v1, %v2064_v3  ;;  %v8251_v1 = vld [vmem:[%s9964_s3 + $0x5a0] sm:$0xff]   ;;  %v4537_v15 = vld [vmem:[#allocation2 + $0x28] sm:$0x80] }
 0x2e0   :  { %7937 = vmatprep.subr.bf16.mxu0 %v8324_v37  ;;  %v4548_v2 = vrot.slane %v4537_v15, 7 }
 0x2e2   :  { %7756 = vmatpush3.bf16.msra.mxu1 %v8247_v21 }
 0x2e3   :  { %7938 = vmatpush3.bf16.msra.mxu0 %v8248_v12  ;;  %7757 = vmatprep.subr.bf16.mxu1 %v8324_v37 }
 0x2e4   :  { %7955 = vmatprep.subr.bf16.mxu0 %v8324_v37 }
 0x2e6   :  { %7758 = vmatpush3.bf16.msra.mxu1 %v8249_v47  ;;  %7940 = vmatmul.mubr.msk.bf16.vlgmr.msra.gmra.mrb[164].mxu0 %vm783_vm3, %v5424_v63  ;;  %v8268_v47 = vld [vmem:[%s9964_s3 + $0x630] sm:$0xff]  }
 0x2e7   :  { %7956 = vmatpush3.bf16.msra.mxu0 %v8250_v9  ;;  %7775 = vmatprep.subr.bf16.mxu1 %v8324_v37 }
 0x2e8   :  { %7957 = vmatprep.subr.bf16.mxu0 %v8324_v37  ;;  %7963 = vmatprep.mubr.msk.bf16.mxu0 %vm8325_vm2, %v8324_v37 }
 0x2e9   :  { %v9685_v23 = vpop.f32.mrb[112].mxu0  ;;  %7760 = vmatmul.mubr.msk.bf16.vlgmr.msra.gmra.mrb[100].mxu1 %vm783_vm3, %v4228_v11  ;;  %v8270_v11 = vld [vmem:[%s9964_s3 + $0x660] sm:$0xff]  }
 0x2ea   :  { %v7629_v8 = vpop.f32.mrb[113].mxu0  ;;  %7776 = vmatpush3.bf16.msra.mxu1 %v8251_v1  ;;  %7783 = vmatprep.mubr.msk.bf16.mxu1 %vm8325_vm2, %v8324_v37  ;;  %v4695_v1 = vld [vmem:[#allocation2 + $0x30] sm:$0x2] }
 0x2eb   :  { %v3415_v10 = vpop.f32.mrb[114].mxu0  ;;  %7958 = vmatpush3.bf16.msra.mxu0 %v8252_v55  ;;  %7777 = vmatprep.subr.bf16.mxu1 %v8324_v37  ;;  %v4706_v55 = vrot.slane %v4695_v1, 1 }
 0x2ec   :  { %v2216_v14 = vpop.f32.mrb[48].mxu1  ;;  %v7630_v16 = vpop.f32.mrb[115].mxu0  ;;  %7959 = vmatprep.subr.bf16.mxu0 %v8324_v37 }
 0x2ed   :  { %v2222_v19 = vadd.f32 %v2216_v14, %v2142_v6  ;;  %v7449_v20 = vpop.f32.mrb[49].mxu1 }
 0x2ee   :  { %v2219_v22 = vpop.f32.mrb[50].mxu1  ;;  %7778 = vmatpush3.bf16.msra.mxu1 %v8253_v56  ;;  %v8271_v56 = vld [vmem:[%s9964_s3 + $0x668] sm:$0xff]  }
 0x2ef   :  { %v7450_v24 = vpop.f32.mrb[51].mxu1  ;;  %7960 = vmatpush3.bf16.msra.mxu0 %v8254_v13  ;;  %7779 = vmatprep.subr.bf16.mxu1 %v8324_v37  ;;  %v2302_v25 = vadd.f32 %v9400_v33, %v2222_v19  ;;  %v8259_v33 = vld [vmem:[%s9964_s3 + $0x5e0] sm:$0xff]   ;;  %v8272_v22 = vld [vmem:[%s9964_s3 + $0x670] sm:$0xff]  }
 0x2f0   :  { %7961 = vmatprep.subr.bf16.mxu0 %v8324_v37 }
 0x2f2   :  { %7780 = vmatpush3.bf16.msra.mxu1 %v8255_v57 }
 0x2f3   :  { %7962 = vmatpush3.bf16.msra.mxu0 %v8256_v59  ;;  %7781 = vmatprep.subr.bf16.mxu1 %v8324_v37  ;;  %v8273_v59 = vld [vmem:[%s9964_s3 + $0x678] sm:$0xff]  }
 0x2f4   :  { %7979 = vmatprep.subr.bf16.mxu0 %v8324_v37 }
 0x2f6   :  { %7782 = vmatpush3.bf16.msra.mxu1 %v8257_v40  ;;  %7964 = vmatmul.mubr.msk.bf16.vlgmr.msra.gmra.mrb[168].mxu0 %vm783_vm3, %v5584_v50  ;;  %v8275_v50 = vld [vmem:[%s9964_s3 + $0x6a8] sm:$0xff]  }
 0x2f7   :  { %7980 = vmatpush3.bf16.msra.mxu0 %v8258_v26  ;;  %7799 = vmatprep.subr.bf16.mxu1 %v8324_v37 }
 0x2f8   :  { %7981 = vmatprep.subr.bf16.mxu0 %v8324_v37  ;;  %7987 = vmatprep.mubr.msk.bf16.mxu0 %vm8325_vm2, %v8324_v37 }
 0x2f9   :  { %v9726_v51 = vpop.f32.mrb[116].mxu0  ;;  %7784 = vmatmul.mubr.msk.bf16.vlgmr.msra.gmra.mrb[104].mxu1 %vm783_vm3, %v4388_v58 }
 0x2fa   :  { %v7653_v46 = vpop.f32.mrb[117].mxu0  ;;  %7800 = vmatpush3.bf16.msra.mxu1 %v8259_v33  ;;  %7807 = vmatprep.mubr.msk.bf16.mxu1 %vm8325_vm2, %v8324_v37 }
 0x2fb   :  { %v3575_v34 = vpop.f32.mrb[118].mxu0  ;;  %7982 = vmatpush3.bf16.msra.mxu0 %v8260_v27  ;;  %7801 = vmatprep.subr.bf16.mxu1 %v8324_v37 }
 0x2fc   :  { %v2376_v35 = vpop.f32.mrb[52].mxu1  ;;  %v7654_v29 = vpop.f32.mrb[119].mxu0  ;;  %7983 = vmatprep.subr.bf16.mxu0 %v8324_v37  ;;  %v8276_v34 = vld [vmem:[%s9964_s3 + $0x6b0] sm:$0xff]  }
 0x2fd   :  { %v2382_v31 = vadd.f32 %v2376_v35, %v2302_v25  ;;  %v7473_v52 = vpop.f32.mrb[53].mxu1  ;;  %v4855_v25 = vld [vmem:[#allocation2 + $0x30] sm:$0x8]  ;;  %v8277_v29 = vld [vmem:[%s9964_s3 + $0x6b8] sm:$0xff]  }
 0x2fe   :  { %v2379_v32 = vpop.f32.mrb[54].mxu1  ;;  %7802 = vmatpush3.bf16.msra.mxu1 %v8261_v28  ;;  %v4866_v40 = vrot.slane %v4855_v25, 3  ;;  %v8278_v52 = vld [vmem:[%s9964_s3 + $0x6e0] sm:$0xff]  }
 0x2ff   :  { %v7474_v44 = vpop.f32.mrb[55].mxu1  ;;  %7984 = vmatpush3.bf16.msra.mxu0 %v8262_v18  ;;  %7803 = vmatprep.subr.bf16.mxu1 %v8324_v37  ;;  %v2462_v36 = vadd.f32 %v9440_v45, %v2382_v31  ;;  %v8266_v45 = vld [vmem:[%s9964_s3 + $0x620] sm:$0xff]   ;;  %v5015_v31 = vld [vmem:[#allocation2 + $0x30] sm:$0x20] }
 0x300   :  { %7985 = vmatprep.subr.bf16.mxu0 %v8324_v37  ;;  %v5026_v32 = vrot.slane %v5015_v31, 5  ;;  %v8279_v44 = vld [vmem:[%s9964_s3 + $0x6e8] sm:$0xff]  }
 0x302   :  { %7804 = vmatpush3.bf16.msra.mxu1 %v8263_v48 }
 0x303   :  { %7986 = vmatpush3.bf16.msra.mxu0 %v8264_v60  ;;  %7805 = vmatprep.subr.bf16.mxu1 %v8324_v37 }
 0x306   :  { %7806 = vmatpush3.bf16.msra.mxu1 %v8265_v41  ;;  %7988 = vmatmul.mubr.msk.bf16.vlgmr.msra.gmra.mrb[172].mxu0 %vm783_vm3, %v5744_v42 }
 0x307   :  { %7823 = vmatprep.subr.bf16.mxu1 %v8324_v37 }
 0x309   :  { %v9757_v53 = vpop.f32.mrb[120].mxu0  ;;  %7808 = vmatmul.mubr.msk.bf16.vlgmr.msra.gmra.mrb[108].mxu1 %vm783_vm3, %v4548_v2 }
 0x30a   :  { %v7677_v3 = vpop.f32.mrb[121].mxu0  ;;  %7824 = vmatpush3.bf16.msra.mxu1 %v8266_v45  ;;  %7831 = vmatprep.mubr.msk.bf16.mxu1 %vm8325_vm2, %v8324_v37  ;;  %v8280_v45 = vld [vmem:[%s9964_s3 + $0x6f0] sm:$0xff]  }
 0x30b   :  { %v3735_v54 = vpop.f32.mrb[122].mxu0  ;;  %7825 = vmatprep.subr.bf16.mxu1 %v8324_v37 }
 0x30c   :  { %v2536_v21 = vpop.f32.mrb[56].mxu1  ;;  %v7678_v5 = vpop.f32.mrb[123].mxu0  ;;  %v5175_v54 = vld [vmem:[#allocation2 + $0x30] sm:$0x80] }
 0x30d   :  { %v2542_v12 = vadd.f32 %v2536_v21, %v2462_v36  ;;  %v7497_v6 = vpop.f32.mrb[57].mxu1  ;;  %v8282_v21 = vld [vmem:[%s9964_s3 + $0x720] sm:$0xff]   ;;  %v5186_v5 = vrot.slane %v5175_v54, 7 }
 0x30e   :  { %v2539_v62 = vpop.f32.mrb[58].mxu1  ;;  %7826 = vmatpush3.bf16.msra.mxu1 %v8267_v4  ;;  %v8281_v4 = vld [vmem:[%s9964_s3 + $0x6f8] sm:$0xff]   ;;  %v8283_v6 = vld [vmem:[%s9964_s3 + $0x728] sm:$0xff]  }
 0x30f   :  { %v7498_v9 = vpop.f32.mrb[59].mxu1  ;;  %7827 = vmatprep.subr.bf16.mxu1 %v8324_v37  ;;  %v2622_v63 = vadd.f32 %v9480_v17, %v2542_v12 }
 0x312   :  { %7828 = vmatpush3.bf16.msra.mxu1 %v8268_v47 }
 0x313   :  { %7829 = vmatprep.subr.bf16.mxu1 %v8324_v37 }
 0x316   :  { %7830 = vmatpush3.bf16.msra.mxu1 %v8269_v0 }
 0x317   :  { %7847 = vmatprep.subr.bf16.mxu1 %v8324_v37 }
 0x319   :  { %v9779_v8 = vpop.f32.mrb[124].mxu0  ;;  %7832 = vmatmul.mubr.msk.bf16.vlgmr.msra.gmra.mrb[112].mxu1 %vm783_vm3, %v4706_v55 }
 0x31a   :  { %v7701_v17 = vpop.f32.mrb[125].mxu0  ;;  %7848 = vmatpush3.bf16.msra.mxu1 %v8270_v11  ;;  %7855 = vmatprep.mubr.msk.bf16.mxu1 %vm8325_vm2, %v8324_v37  ;;  %v8284_v11 = vld [vmem:[%s9964_s3 + $0x730] sm:$0xff]  }
 0x31b   :  { %v3895_v10 = vpop.f32.mrb[126].mxu0  ;;  %7849 = vmatprep.subr.bf16.mxu1 %v8324_v37 }
 0x31c   :  { %v2696_v13 = vpop.f32.mrb[60].mxu1  ;;  %v7702_v14 = vpop.f32.mrb[127].mxu0  ;;  %v5333_v10 = vld [vmem:[#allocation2 + $0x38] sm:$0x2] }
 0x31d   :  { %v2702_v16 = vadd.f32 %v2696_v13, %v2622_v63  ;;  %v7521_v19 = vpop.f32.mrb[61].mxu1  ;;  %v8286_v13 = vld [vmem:[%s9964_s3 + $0x760] sm:$0xff]   ;;  %v5344_v14 = vrot.slane %v5333_v10, 1 }
 0x31e   :  { %v2699_v20 = vpop.f32.mrb[62].mxu1  ;;  %7850 = vmatpush3.bf16.msra.mxu1 %v8271_v56  ;;  %v8285_v56 = vld [vmem:[%s9964_s3 + $0x738] sm:$0xff]   ;;  %v8287_v19 = vld [vmem:[%s9964_s3 + $0x768] sm:$0xff]  }
 0x31f   :  { %v7522_v57 = vpop.f32.mrb[63].mxu1  ;;  %7851 = vmatprep.subr.bf16.mxu1 %v8324_v37  ;;  %v2780_v24 = vadd.f32 %v9521_v30, %v2702_v16 }
 0x322   :  { %7852 = vmatpush3.bf16.msra.mxu1 %v8272_v22 }
 0x323   :  { %7853 = vmatprep.subr.bf16.mxu1 %v8324_v37 }
 0x326   :  { %7854 = vmatpush3.bf16.msra.mxu1 %v8273_v59 }
 0x327   :  { %7871 = vmatprep.subr.bf16.mxu1 %v8324_v37 }
 0x329   :  { %v9801_v26 = vpop.f32.mrb[128].mxu0  ;;  %7856 = vmatmul.mubr.msk.bf16.vlgmr.msra.gmra.mrb[116].mxu1 %vm783_vm3, %v4866_v40 }
 0x32a   :  { %v7725_v30 = vpop.f32.mrb[129].mxu0  ;;  %7872 = vmatpush3.bf16.msra.mxu1 %v8274_v61  ;;  %7879 = vmatprep.mubr.msk.bf16.mxu1 %vm8325_vm2, %v8324_v37  ;;  %v8288_v61 = vld [vmem:[%s9964_s3 + $0x770] sm:$0xff]  }
 0x32b   :  { %v4053_v43 = vpop.f32.mrb[130].mxu0  ;;  %7873 = vmatprep.subr.bf16.mxu1 %v8324_v37 }
 0x32c   :  { %v2854_v33 = vpop.f32.mrb[64].mxu1  ;;  %v7726_v58 = vpop.f32.mrb[131].mxu0  ;;  %v5493_v43 = vld [vmem:[#allocation2 + $0x38] sm:$0x8] }
 0x32d   :  { %v2860_v27 = vadd.f32 %v2854_v33, %v2780_v24  ;;  %v7545_v46 = vpop.f32.mrb[65].mxu1  ;;  %v8290_v33 = vld [vmem:[%s9964_s3 + $0x7a0] sm:$0xff]   ;;  %v5504_v58 = vrot.slane %v5493_v43, 3 }
 0x32e   :  { %v2857_v28 = vpop.f32.mrb[66].mxu1  ;;  %7874 = vmatpush3.bf16.msra.mxu1 %v8275_v50  ;;  %v8289_v50 = vld [vmem:[%s9964_s3 + $0x778] sm:$0xff]   ;;  %v8291_v46 = vld [vmem:[%s9964_s3 + $0x7a8] sm:$0xff]  }
 0x32f   :  { %v7546_v18 = vpop.f32.mrb[67].mxu1  ;;  %7875 = vmatprep.subr.bf16.mxu1 %v8324_v37  ;;  %v2940_v35 = vadd.f32 %v9562_v7, %v2860_v27 }
 0x332   :  { %7876 = vmatpush3.bf16.msra.mxu1 %v8276_v34 }
 0x333   :  { %7877 = vmatprep.subr.bf16.mxu1 %v8324_v37 }
 0x336   :  { %7878 = vmatpush3.bf16.msra.mxu1 %v8277_v29 }
 0x337   :  { %7895 = vmatprep.subr.bf16.mxu1 %v8324_v37 }
 0x339   :  { %v9823_v48 = vpop.f32.mrb[132].mxu0  ;;  %7880 = vmatmul.mubr.msk.bf16.vlgmr.msra.gmra.mrb[120].mxu1 %vm783_vm3, %v5026_v32 }
 0x33a   :  { %v7749_v7 = vpop.f32.mrb[133].mxu0  ;;  %7896 = vmatpush3.bf16.msra.mxu1 %v8278_v52  ;;  %7903 = vmatprep.mubr.msk.bf16.mxu1 %vm8325_vm2, %v8324_v37  ;;  %v8292_v52 = vld [vmem:[%s9964_s3 + $0x7b0] sm:$0xff]  }
 0x33b   :  { %v4213_v60 = vpop.f32.mrb[134].mxu0  ;;  %7897 = vmatprep.subr.bf16.mxu1 %v8324_v37 }
 0x33c   :  { %v3014_v36 = vpop.f32.mrb[68].mxu1  ;;  %v7750_v39 = vpop.f32.mrb[135].mxu0  ;;  %v5653_v60 = vld [vmem:[#allocation2 + $0x38] sm:$0x20] }
 0x33d   :  { %v3020_v41 = vadd.f32 %v3014_v36, %v2940_v35  ;;  %v7569_v42 = vpop.f32.mrb[69].mxu1  ;;  %v8294_v36 = vld [vmem:[%s9964_s3 + $0x7e0] sm:$0xff]   ;;  %v5664_v39 = vrot.slane %v5653_v60, 5 }
 0x33e   :  { %v3017_v15 = vpop.f32.mrb[70].mxu1  ;;  %7898 = vmatpush3.bf16.msra.mxu1 %v8279_v44  ;;  %v8293_v44 = vld [vmem:[%s9964_s3 + $0x7b8] sm:$0xff]   ;;  %v8295_v42 = vld [vmem:[%s9964_s3 + $0x7e8] sm:$0xff]  }
 0x33f   :  { %v7570_v2 = vpop.f32.mrb[71].mxu1  ;;  %7899 = vmatprep.subr.bf16.mxu1 %v8324_v37  ;;  %v3100_v3 = vadd.f32 %v9603_v49, %v3020_v41 }
 0x342   :  { %7900 = vmatpush3.bf16.msra.mxu1 %v8280_v45 }
 0x343   :  { %7901 = vmatprep.subr.bf16.mxu1 %v8324_v37 }
 0x346   :  { %7902 = vmatpush3.bf16.msra.mxu1 %v8281_v4 }
 0x347   :  { %7919 = vmatprep.subr.bf16.mxu1 %v8324_v37 }
 0x349   :  { %v9845_v12 = vpop.f32.mrb[136].mxu0  ;;  %7904 = vmatmul.mubr.msk.bf16.vlgmr.msra.gmra.mrb[124].mxu1 %vm783_vm3, %v5186_v5 }
 0x34a   :  { %v7773_v49 = vpop.f32.mrb[137].mxu0  ;;  %7920 = vmatpush3.bf16.msra.mxu1 %v8282_v21  ;;  %7927 = vmatprep.mubr.msk.bf16.mxu1 %vm8325_vm2, %v8324_v37  ;;  %v8296_v21 = vld [vmem:[%s9964_s3 + $0x7f0] sm:$0xff]  }
 0x34b   :  { %v4373_v62 = vpop.f32.mrb[138].mxu0  ;;  %7921 = vmatprep.subr.bf16.mxu1 %v8324_v37 }
 0x34c   :  { %v3174_v47 = vpop.f32.mrb[72].mxu1  ;;  %v7774_v9 = vpop.f32.mrb[139].mxu0  ;;  %v5813_v62 = vld [vmem:[#allocation2 + $0x38] sm:$0x80] }
 0x34d   :  { %v3180_v63 = vadd.f32 %v3174_v47, %v3100_v3  ;;  %v7593_v0 = vpop.f32.mrb[73].mxu1  ;;  %v5824_v47 = vrot.slane %v5813_v62, 7 }
 0x34e   :  { %v3177_v1 = vpop.f32.mrb[74].mxu1  ;;  %7922 = vmatpush3.bf16.msra.mxu1 %v8283_v6  ;;  %v8297_v6 = vld [vmem:[%s9964_s3 + $0x7f8] sm:$0xff]  }
 0x34f   :  { %v7594_v55 = vpop.f32.mrb[75].mxu1  ;;  %7923 = vmatprep.subr.bf16.mxu1 %v8324_v37  ;;  %v3260_v17 = vadd.f32 %v9644_v38, %v3180_v63 }
 0x352   :  { %7924 = vmatpush3.bf16.msra.mxu1 %v8284_v11 }
 0x353   :  { %7925 = vmatprep.subr.bf16.mxu1 %v8324_v37 }
 0x356   :  { %7926 = vmatpush3.bf16.msra.mxu1 %v8285_v56 }
 0x357   :  { %7943 = vmatprep.subr.bf16.mxu1 %v8324_v37 }
 0x359   :  { %v9867_v16 = vpop.f32.mrb[140].mxu0  ;;  %7928 = vmatmul.mubr.msk.bf16.vlgmr.msra.gmra.mrb[128].mxu1 %vm783_vm3, %v5344_v14 }
 0x35a   :  { %v7797_v38 = vpop.f32.mrb[141].mxu0  ;;  %7944 = vmatpush3.bf16.msra.mxu1 %v8286_v13  ;;  %7951 = vmatprep.mubr.msk.bf16.mxu1 %vm8325_vm2, %v8324_v37 }
 0x35b   :  { %v4533_v20 = vpop.f32.mrb[142].mxu0  ;;  %7945 = vmatprep.subr.bf16.mxu1 %v8324_v37 }
 0x35c   :  { %v3334_v22 = vpop.f32.mrb[76].mxu1  ;;  %v7798_v57 = vpop.f32.mrb[143].mxu0 }
 0x35d   :  { %v3340_v24 = vadd.f32 %v3334_v22, %v3260_v17  ;;  %v7617_v59 = vpop.f32.mrb[77].mxu1 }
 0x35e   :  { %v3337_v25 = vpop.f32.mrb[78].mxu1  ;;  %7946 = vmatpush3.bf16.msra.mxu1 %v8287_v19 }
 0x35f   :  { %v7618_v40 = vpop.f32.mrb[79].mxu1  ;;  %7947 = vmatprep.subr.bf16.mxu1 %v8324_v37  ;;  %v3418_v30 = vadd.f32 %v9685_v23, %v3340_v24 }
 0x362   :  { %7948 = vmatpush3.bf16.msra.mxu1 %v8288_v61 }
 0x363   :  { %7949 = vmatprep.subr.bf16.mxu1 %v8324_v37 }
 0x366   :  { %7950 = vmatpush3.bf16.msra.mxu1 %v8289_v50 }
 0x367   :  { %7967 = vmatprep.subr.bf16.mxu1 %v8324_v37 }
 0x369   :  { %v9889_v27 = vpop.f32.mrb[144].mxu0  ;;  %7952 = vmatmul.mubr.msk.bf16.vlgmr.msra.gmra.mrb[132].mxu1 %vm783_vm3, %v5504_v58 }
 0x36a   :  { %v7821_v23 = vpop.f32.mrb[145].mxu0  ;;  %7968 = vmatpush3.bf16.msra.mxu1 %v8290_v33  ;;  %7975 = vmatprep.mubr.msk.bf16.mxu1 %vm8325_vm2, %v8324_v37 }
 0x36b   :  { %v4691_v28 = vpop.f32.mrb[146].mxu0  ;;  %7969 = vmatprep.subr.bf16.mxu1 %v8324_v37 }
 0x36c   :  { %v3492_v34 = vpop.f32.mrb[80].mxu1  ;;  %v7822_v18 = vpop.f32.mrb[147].mxu0 }
 0x36d   :  { %v3498_v35 = vadd.f32 %v3492_v34, %v3418_v30  ;;  %v7641_v29 = vpop.f32.mrb[81].mxu1 }
 0x36e   :  { %v3495_v31 = vpop.f32.mrb[82].mxu1  ;;  %7970 = vmatpush3.bf16.msra.mxu1 %v8291_v46 }
 0x36f   :  { %v7642_v32 = vpop.f32.mrb[83].mxu1  ;;  %7971 = vmatprep.subr.bf16.mxu1 %v8324_v37  ;;  %v3578_v7 = vadd.f32 %v9726_v51, %v3498_v35 }
 0x372   :  { %7972 = vmatpush3.bf16.msra.mxu1 %v8292_v52 }
 0x373   :  { %7973 = vmatprep.subr.bf16.mxu1 %v8324_v37 }
 0x376   :  { %7974 = vmatpush3.bf16.msra.mxu1 %v8293_v44 }
 0x377   :  { %7991 = vmatprep.subr.bf16.mxu1 %v8324_v37 }
 0x379   :  { %v9911_v41 = vpop.f32.mrb[148].mxu0  ;;  %7976 = vmatmul.mubr.msk.bf16.vlgmr.msra.gmra.mrb[136].mxu1 %vm783_vm3, %v5664_v39 }
 0x37a   :  { %v7845_v51 = vpop.f32.mrb[149].mxu0  ;;  %7992 = vmatpush3.bf16.msra.mxu1 %v8294_v36  ;;  %7999 = vmatprep.mubr.msk.bf16.mxu1 %vm8325_vm2, %v8324_v37 }
 0x37b   :  { %v4851_v15 = vpop.f32.mrb[150].mxu0  ;;  %7993 = vmatprep.subr.bf16.mxu1 %v8324_v37 }
 0x37c   :  { %v3652_v45 = vpop.f32.mrb[84].mxu1  ;;  %v7846_v2 = vpop.f32.mrb[151].mxu0 }
 0x37d   :  { %v3658_v3 = vadd.f32 %v3652_v45, %v3578_v7  ;;  %v7665_v4 = vpop.f32.mrb[85].mxu1 }
 0x37e   :  { %v3655_v54 = vpop.f32.mrb[86].mxu1  ;;  %7994 = vmatpush3.bf16.msra.mxu1 %v8295_v42 }
 0x37f   :  { %v7666_v5 = vpop.f32.mrb[87].mxu1  ;;  %7995 = vmatprep.subr.bf16.mxu1 %v8324_v37  ;;  %v3738_v49 = vadd.f32 %v9757_v53, %v3658_v3 }
 0x382   :  { %7996 = vmatpush3.bf16.msra.mxu1 %v8296_v21 }
 0x383   :  { %7997 = vmatprep.subr.bf16.mxu1 %v8324_v37 }
 0x386   :  { %7998 = vmatpush3.bf16.msra.mxu1 %v8297_v6 }
 0x389   :  { %v9929_v9 = vpop.f32.mrb[152].mxu0  ;;  %8000 = vmatmul.mubr.msk.bf16.vlgmr.msra.gmra.mrb[140].mxu1 %vm783_vm3, %v5824_v47 }
 0x38a   :  { %v7869_v63 = vpop.f32.mrb[153].mxu0 }
 0x38b   :  { %v5011_v0 = vpop.f32.mrb[154].mxu0 }
 0x38c   :  { %v3812_v1 = vpop.f32.mrb[88].mxu1  ;;  %v7870_v11 = vpop.f32.mrb[155].mxu0 }
 0x38d   :  { %v3818_v55 = vadd.f32 %v3812_v1, %v3738_v49  ;;  %v7689_v53 = vpop.f32.mrb[89].mxu1 }
 0x38e   :  { %v3815_v17 = vpop.f32.mrb[90].mxu1 }
 0x38f   :  { %v7690_v56 = vpop.f32.mrb[91].mxu1  ;;  %v3898_v10 = vadd.f32 %v9779_v8, %v3818_v55 }
 0x399   :  { %v9933_v13 = vpop.f32.mrb[156].mxu0 }
 0x39a   :  { %v7893_v37 = vpop.f32.mrb[157].mxu0 }
 0x39b   :  { %v5171_v14 = vpop.f32.mrb[158].mxu0 }
 0x39c   :  { %v3972_v38 = vpop.f32.mrb[92].mxu1  ;;  %v7894_v19 = vpop.f32.mrb[159].mxu0 }
 0x39d   :  { %v3978_v20 = vadd.f32 %v3972_v38, %v3898_v10  ;;  %v7713_v22 = vpop.f32.mrb[93].mxu1 }
 0x39e   :  { %v3975_v57 = vpop.f32.mrb[94].mxu1 }
 0x39f   :  { %v7714_v24 = vpop.f32.mrb[95].mxu1  ;;  %v4056_v59 = vadd.f32 %v9801_v26, %v3978_v20 }
 0x3a9   :  { %v9936_v25 = vpop.f32.mrb[160].mxu0 }
 0x3aa   :  { %v7917_v61 = vpop.f32.mrb[161].mxu0 }
 0x3ab   :  { %v5329_v40 = vpop.f32.mrb[162].mxu0 }
 0x3ac   :  { %v4130_v30 = vpop.f32.mrb[96].mxu1  ;;  %v7918_v50 = vpop.f32.mrb[163].mxu0 }
 0x3ad   :  { %v4136_v43 = vadd.f32 %v4130_v30, %v4056_v59  ;;  %v7737_v8 = vpop.f32.mrb[97].mxu1 }
 0x3ae   :  { %v4133_v33 = vpop.f32.mrb[98].mxu1 }
 0x3af   :  { %v7738_v58 = vpop.f32.mrb[99].mxu1  ;;  %v4216_v23 = vadd.f32 %v9823_v48, %v4136_v43 }
 0x3b9   :  { %v5486_v46 = vpop.f32.mrb[164].mxu0 }
 0x3ba   :  { %v7941_v28 = vpop.f32.mrb[165].mxu0 }
 0x3bb   :  { %v5489_v34 = vpop.f32.mrb[166].mxu0 }
 0x3bc   :  { %v4290_v18 = vpop.f32.mrb[100].mxu1  ;;  %v7942_v35 = vpop.f32.mrb[167].mxu0 }
 0x3bd   :  { %v4296_v29 = vadd.f32 %v4290_v18, %v4216_v23  ;;  %v7761_v31 = vpop.f32.mrb[101].mxu1 }
 0x3be   :  { %v4293_v26 = vpop.f32.mrb[102].mxu1 }
 0x3bf   :  { %v7762_v52 = vpop.f32.mrb[103].mxu1  ;;  %v4376_v32 = vadd.f32 %v9845_v12, %v4296_v29 }
 0x3c9   :  { %v5646_v7 = vpop.f32.mrb[168].mxu0 }
 0x3ca   :  { %v7965_v44 = vpop.f32.mrb[169].mxu0 }
 0x3cb   :  { %v5649_v60 = vpop.f32.mrb[170].mxu0 }
 0x3cc   :  { %v4450_v36 = vpop.f32.mrb[104].mxu1  ;;  %v7966_v39 = vpop.f32.mrb[171].mxu0 }
 0x3cd   :  { %v4456_v51 = vadd.f32 %v4450_v36, %v4376_v32  ;;  %v7785_v42 = vpop.f32.mrb[105].mxu1 }
 0x3ce   :  { %v4453_v15 = vpop.f32.mrb[106].mxu1 }
 0x3cf   :  { %v7786_v48 = vpop.f32.mrb[107].mxu1  ;;  %v4536_v45 = vadd.f32 %v9867_v16, %v4456_v51 }
 0x3d9   :  { %v5806_v2 = vpop.f32.mrb[172].mxu0 }
 0x3da   :  { %v7989_v3 = vpop.f32.mrb[173].mxu0 }
 0x3db   :  { %v5809_v4 = vpop.f32.mrb[174].mxu0 }
 0x3dc   :  { %v4610_v54 = vpop.f32.mrb[108].mxu1  ;;  %v7990_v21 = vpop.f32.mrb[175].mxu0 }
 0x3dd   :  { %v4616_v5 = vadd.f32 %v4610_v54, %v4536_v45  ;;  %v7809_v49 = vpop.f32.mrb[109].mxu1 }
 0x3de   :  { %v4613_v6 = vpop.f32.mrb[110].mxu1 }
 0x3df   :  { %v7810_v12 = vpop.f32.mrb[111].mxu1  ;;  %v4694_v62 = vadd.f32 %v9889_v27, %v4616_v5 }
 0x3ec   :  { %v4768_v47 = vpop.f32.mrb[112].mxu1 }
 0x3ed   :  { %v4774_v63 = vadd.f32 %v4768_v47, %v4694_v62  ;;  %v7833_v0 = vpop.f32.mrb[113].mxu1 }
 0x3ee   :  { %v4771_v1 = vpop.f32.mrb[114].mxu1 }
 0x3ef   :  { %v7834_v11 = vpop.f32.mrb[115].mxu1  ;;  %v4854_v55 = vadd.f32 %v9911_v41, %v4774_v63 }
 0x3fc   :  { %v4928_v53 = vpop.f32.mrb[116].mxu1 }
 0x3fd   :  { %v4934_v16 = vadd.f32 %v4928_v53, %v4854_v55  ;;  %v7857_v17 = vpop.f32.mrb[117].mxu1 }
 0x3fe   :  { %v4931_v56 = vpop.f32.mrb[118].mxu1 }
 0x3ff   :  { %v7858_v10 = vpop.f32.mrb[119].mxu1  ;;  %v5014_v37 = vadd.f32 %v9929_v9, %v4934_v16 }
 0x40c   :  { %v5088_v14 = vpop.f32.mrb[120].mxu1 }
 0x40d   :  { %v5094_v38 = vadd.f32 %v5088_v14, %v5014_v37  ;;  %v7881_v19 = vpop.f32.mrb[121].mxu1 }
 0x40e   :  { %v5091_v20 = vpop.f32.mrb[122].mxu1 }
 0x40f   :  { %v7882_v22 = vpop.f32.mrb[123].mxu1  ;;  %v5174_v27 = vadd.f32 %v9933_v13, %v5094_v38 }
 0x41c   :  { %v5248_v57 = vpop.f32.mrb[124].mxu1 }
 0x41d   :  { %v5254_v24 = vadd.f32 %v5248_v57, %v5174_v27  ;;  %v7905_v59 = vpop.f32.mrb[125].mxu1 }
 0x41e   :  { %v5251_v61 = vpop.f32.mrb[126].mxu1 }
 0x41f   :  { %v7906_v40 = vpop.f32.mrb[127].mxu1  ;;  %v5332_v41 = vadd.f32 %v9936_v25, %v5254_v24  ;;  %v6809_v25 = vld [vmem:[%s9965_s4] ss:$0 sm:$0xff] }
 0x42c   :  { %v5406_v30 = vpop.f32.mrb[128].mxu1 }
 0x42d   :  { %v5412_v50 = vadd.f32 %v5406_v30, %v5332_v41  ;;  %v7929_v43 = vpop.f32.mrb[129].mxu1 }
 0x42e   :  { %v5409_v8 = vpop.f32.mrb[130].mxu1 }
 0x42f   :  { %v7930_v33 = vpop.f32.mrb[131].mxu1  ;;  %v5492_v9 = vadd.f32 %v5486_v46, %v5412_v50 }
 0x43c   :  { %v5566_v58 = vpop.f32.mrb[132].mxu1 }
 0x43d   :  { %v5572_v23 = vadd.f32 %v5566_v58, %v5492_v9  ;;  %v7953_v28 = vpop.f32.mrb[133].mxu1 }
 0x43e   :  { %v5569_v34 = vpop.f32.mrb[134].mxu1 }
 0x43f   :  { %v7954_v18 = vpop.f32.mrb[135].mxu1  ;;  %v5652_v35 = vadd.f32 %v5646_v7, %v5572_v23 }
 0x44c   :  { %v5726_v13 = vpop.f32.mrb[136].mxu1 }
 0x44d   :  { %v5732_v29 = vadd.f32 %v5726_v13, %v5652_v35  ;;  %v7977_v31 = vpop.f32.mrb[137].mxu1 }
 0x44e   :  { %v5729_v26 = vpop.f32.mrb[138].mxu1 }
 0x44f   :  { %v7978_v52 = vpop.f32.mrb[139].mxu1  ;;  %v5812_v32 = vadd.f32 %v5806_v2, %v5732_v29 }
 0x45c   :  { %v5886_v44 = vpop.f32.mrb[140].mxu1 }
 0x45d   :  { %v5892_v60 = vadd.f32 %v5886_v44, %v5812_v32  ;;  %v8001_v36 = vpop.f32.mrb[141].mxu1 }
 0x45e   :  { %v5889_v46 = vpop.f32.mrb[142].mxu1 }
 0x45f   :  { %v5900_v39 = vadd.f32 %v6809_v25, %v5892_v60  ;;  %v8002_v51 = vpop.f32.mrb[143].mxu1 }
 0x461   :  { %8298 = vtanh.f32 %v5900_v39 }
 0x46b   :  { %v8299_v7 = vpop.eup %8298 }
 0x46c   :  { %5902 = vst [vmem:[#allocation3] sm:$0x3] %v8299_v7 }
 0x46d   :  { %8311 = shalt.err (!%p8308_p4)
}
 0x46e   :  { %s8312_s24 = scalar_lea.hbm %s9966_s5, 32 }
 0x46f   :  { %p8313_p5 = scmp.ne.s32.totalorder %s9966_s5, %s8312_s24  ;;  %p8316_p6 = scmp.lt.u32.totalorder %s8312_s24, %s9966_s5 }
 0x471   :  { %p8318_p7 = pnand %p8316_p6, %p8313_p5 }
 0x473   :  { %8321 = shalt.err (!%p8318_p7)
}
 0x474   :  { %5912 = dma.vmem_to_hbm [thread:$0]  %s5910_s21, 32, %s9966_s5, [#allocation4]  }
 0x475   :  { %8322 = dma.done.wait [#allocation4], 32  }
 0x476   :  { %8323 = vsyncadd [#allocation4], 4294967264 }
 0x477   :  { %5916 = vsyncpa [#allocation4], 1 }

</bundles_post_ra>
